<compile_context>
chip_gen: v7x
topology: tpu7x:2x2x1
jax: 0.10.0
libtpu: 0.0.40
codegen_flags: <defaults>
</compile_context>

<pallas_src>
import math

import jax
import jax.numpy as jnp
from jax.experimental import pallas as pl
from jax.experimental.pallas import tpu as pltpu

# ---- small synthetic hyper-parameters (DeBERTa-base would be H=768, 12 layers)
B, S = 2, 8
H = 64
N_HEADS = 4
D_HEAD = H // N_HEADS
FFN = 128
N_LAYERS = 2
VOCAB = 100
NUM_LABELS = 5
LN_EPS = 1e-7
LOGIT_PAD = 128          # classifier output padded to a full 128-lane register


# --------------------------------------------------------------------------
# Fused Pallas kernel: whole forward in one invocation, activations in VMEM
# --------------------------------------------------------------------------
def _layernorm(h, g, b):
    mu = jnp.mean(h, axis=-1, keepdims=True)
    c = h - mu
    var = jnp.mean(c * c, axis=-1, keepdims=True)
    return c * jax.lax.rsqrt(var + LN_EPS) * g + b


def _gelu(x):
    # TODO(synk): HF DeBERTa uses exact erf GELU; tanh approximation used here.
    return 0.5 * x * (1.0 + jnp.tanh(0.7978845608028654 *
                                     (x + 0.044715 * x * x * x)))


def _fused_forward_kernel(
        x_ref, bias_ref, eg_ref, eb_ref,
        wqkv_ref, bqkv_ref, wo_ref, bo_ref,
        ln1g_ref, ln1b_ref, w1_ref, b1_ref, w2_ref, b2_ref,
        ln2g_ref, ln2b_ref, clsw_ref, clsb_ref,
        out_ref, ctx_ref):
    scale = 1.0 / math.sqrt(D_HEAD)

    hidden = _layernorm(x_ref[...], eg_ref[...], eb_ref[...])       # [B*S, H]
    mask_bias = bias_ref[...]                                       # [B, S]

    for l in range(N_LAYERS):
        # ---- fused QKV projection: one [B*S,H] @ [H,3H] MXU op
        qkv = (jnp.dot(hidden, wqkv_ref[l],
                       preferred_element_type=jnp.float32) + bqkv_ref[l])
        q = qkv[:, 0:H]
        k = qkv[:, H:2 * H]
        v = qkv[:, 2 * H:3 * H]

        # ---- attention: all (batch, head) pairs unrolled in this invocation;
        #      heads are contiguous 16-lane groups of the [B*S, H] slab.
        for b in range(B):
            rows = slice(b * S, (b + 1) * S)
            qb, kb, vb = q[rows, :], k[rows, :], v[rows, :]
            bias_b = mask_bias[b:b + 1, :]                           # [1, S]
            for h in range(N_HEADS):
                lanes = slice(h * D_HEAD, (h + 1) * D_HEAD)
                qh, kh, vh = qb[:, lanes], kb[:, lanes], vb[:, lanes]
                s = jax.lax.dot_general(
                    qh, kh, (((1,), (1,)), ((), ())),
                    preferred_element_type=jnp.float32) * scale      # [S, S]
                s = s + bias_b                                       # key mask
                m = jnp.max(s, axis=-1, keepdims=True)
                p = jnp.exp(s - m)
                p = p * pl.reciprocal(jnp.sum(p, axis=-1, keepdims=True),
                                      approx=True)
                ctx_ref[rows, lanes] = jnp.dot(
                    p, vh, preferred_element_type=jnp.float32)

        ctx = ctx_ref[...]                                           # [B*S, H]
        attn = (jnp.dot(ctx, wo_ref[l],
                        preferred_element_type=jnp.float32) + bo_ref[l])
        hidden = _layernorm(hidden + attn, ln1g_ref[l], ln1b_ref[l])

        # ---- FFN
        h1 = _gelu(jnp.dot(hidden, w1_ref[l],
                           preferred_element_type=jnp.float32) + b1_ref[l])
        h2 = (jnp.dot(h1, w2_ref[l],
                      preferred_element_type=jnp.float32) + b2_ref[l])
        hidden = _layernorm(hidden + h2, ln2g_ref[l], ln2b_ref[l])

    # ---- CLS pooling + classifier (Dropout(0.1) -> identity at inference).
    # Output is padded to 128 lanes for dense stores; sliced in JAX.
    for b in range(B):
        cls_row = hidden[b * S:b * S + 1, :]                         # [1, H]
        out_ref[b:b + 1, :] = (
            jnp.dot(cls_row, clsw_ref[...],
                    preferred_element_type=jnp.float32) + clsb_ref[...])


# --------------------------------------------------------------------------
# JAX wrapper (embedding gather is glue; everything else is one pallas_call)
# --------------------------------------------------------------------------
@jax.jit
def deberta_classifier_forward(params, input_ids, attention_mask):
    emb = params["word_emb"][input_ids] + params["pos_emb"][None, :S, :]
    x = emb.reshape(B * S, H)
    mask_bias = (1.0 - attention_mask.astype(jnp.float32)) * (-1e9)  # [B, S]

    logits_padded = pl.pallas_call(
        _fused_forward_kernel,
        out_shape=jax.ShapeDtypeStruct((B, LOGIT_PAD), jnp.float32),
        scratch_shapes=[pltpu.VMEM((B * S, H), jnp.float32)],
    )(x, mask_bias,
      params["emb_ln_g"], params["emb_ln_b"],
      params["wqkv"], params["bqkv"], params["wo"], params["bo"],
      params["ln1_g"], params["ln1_b"], params["w1"], params["b1"],
      params["w2"], params["b2"], params["ln2_g"], params["ln2_b"],
      params["cls_w_pad"], params["cls_b_pad"])

    return logits_padded[:, :NUM_LABELS]


def init_params(key):
    keys = jax.random.split(key, 8)

    def normal(kk, shape):
        return jax.random.normal(kk, shape, jnp.float32) * 0.02

    cls_w = normal(keys[2], (H, NUM_LABELS))
    cls_w_pad = jnp.zeros((H, LOGIT_PAD), jnp.float32).at[:, :NUM_LABELS].set(cls_w)

    return {
        "word_emb": normal(keys[0], (VOCAB, H)),
        "pos_emb": normal(keys[1], (S, H)),
        "emb_ln_g": jnp.ones((1, H), jnp.float32),
        "emb_ln_b": jnp.zeros((1, H), jnp.float32),
        "cls_w_pad": cls_w_pad,
        "cls_b_pad": jnp.zeros((1, LOGIT_PAD), jnp.float32),
        # per-layer params stacked along a leading layer axis
        "wqkv": normal(keys[3], (N_LAYERS, H, 3 * H)),
        "bqkv": jnp.zeros((N_LAYERS, 1, 3 * H), jnp.float32),
        "wo": normal(keys[4], (N_LAYERS, H, H)),
        "bo": jnp.zeros((N_LAYERS, 1, H), jnp.float32),
        "ln1_g": jnp.ones((N_LAYERS, 1, H), jnp.float32),
        "ln1_b": jnp.zeros((N_LAYERS, 1, H), jnp.float32),
        "w1": normal(keys[5], (N_LAYERS, H, FFN)),
        "b1": jnp.zeros((N_LAYERS, 1, FFN), jnp.float32),
        "w2": normal(keys[6], (N_LAYERS, FFN, H)),
        "b2": jnp.zeros((N_LAYERS, 1, H), jnp.float32),
        "ln2_g": jnp.ones((N_LAYERS, 1, H), jnp.float32),
        "ln2_b": jnp.zeros((N_LAYERS, 1, H), jnp.float32),
    }


if __name__ == "__main__":
    key = jax.random.PRNGKey(0)
    pkey, dkey = jax.random.split(key)
    params = init_params(pkey)

    input_ids = jax.random.randint(dkey, (B, S), 0, VOCAB, dtype=jnp.int32)
    # second example has its last two tokens padded
    attention_mask = jnp.array(
        [[1, 1, 1, 1, 1, 1, 1, 1],
         [1, 1, 1, 1, 1, 1, 0, 0]], dtype=jnp.int32)

    logits = deberta_classifier_forward(params, input_ids, attention_mask)
    logits = jax.block_until_ready(logits)
    assert logits.shape == (B, NUM_LABELS) and logits.dtype == jnp.float32
    assert bool(jnp.all(jnp.isfinite(logits)))
    print("KERNEL_OK")
</pallas_src>

<mosaic_0001>
module attributes {stable_mosaic.version = 11 : i64} {
  func.func @_fused_forward_kernel(%arg0: memref<16x64xf32, #tpu.memory_space<vmem>>, %arg1: memref<2x8xf32, #tpu.memory_space<vmem>>, %arg2: memref<1x64xf32, #tpu.memory_space<vmem>>, %arg3: memref<1x64xf32, #tpu.memory_space<vmem>>, %arg4: memref<2x64x192xf32, #tpu.memory_space<vmem>>, %arg5: memref<2x1x192xf32, #tpu.memory_space<vmem>>, %arg6: memref<2x64x64xf32, #tpu.memory_space<vmem>>, %arg7: memref<2x1x64xf32, #tpu.memory_space<vmem>>, %arg8: memref<2x1x64xf32, #tpu.memory_space<vmem>>, %arg9: memref<2x1x64xf32, #tpu.memory_space<vmem>>, %arg10: memref<2x64x128xf32, #tpu.memory_space<vmem>>, %arg11: memref<2x1x128xf32, #tpu.memory_space<vmem>>, %arg12: memref<2x128x64xf32, #tpu.memory_space<vmem>>, %arg13: memref<2x1x64xf32, #tpu.memory_space<vmem>>, %arg14: memref<2x1x64xf32, #tpu.memory_space<vmem>>, %arg15: memref<2x1x64xf32, #tpu.memory_space<vmem>>, %arg16: memref<64x128xf32, #tpu.memory_space<vmem>>, %arg17: memref<1x128xf32, #tpu.memory_space<vmem>>, %arg18: memref<2x128xf32, #tpu.memory_space<vmem>>, %arg19: memref<16x64xf32, #tpu.memory_space<vmem>>) attributes {dimension_semantics = [], scalar_prefetch = 0 : i64, scratch_operands = 1 : i64, tpu.core_type = #tpu.core_type<tc>} {
    %c0 = arith.constant 0 : index
    %c0_0 = arith.constant 0 : index
    %0 = vector.load %arg0[%c0, %c0_0] : memref<16x64xf32, #tpu.memory_space<vmem>>, vector<16x64xf32>
    %c0_1 = arith.constant 0 : index
    %c0_2 = arith.constant 0 : index
    %1 = vector.load %arg2[%c0_1, %c0_2] : memref<1x64xf32, #tpu.memory_space<vmem>>, vector<1x64xf32>
    %c0_3 = arith.constant 0 : index
    %c0_4 = arith.constant 0 : index
    %2 = vector.load %arg3[%c0_3, %c0_4] : memref<1x64xf32, #tpu.memory_space<vmem>>, vector<1x64xf32>
    %cst = arith.constant dense<0.000000e+00> : vector<16xf32>
    %3 = vector.multi_reduction <add>, %0, %cst [1] : vector<16x64xf32> to vector<16xf32>
    %4 = vector.shape_cast %3 : vector<16xf32> to vector<16x1xf32>
    %cst_5 = arith.constant 6.400000e+01 : f32
    %5 = vector.broadcast %cst_5 : f32 to vector<16x1xf32>
    %6 = arith.divf %4, %5 : vector<16x1xf32>
    %7 = vector.broadcast %6 : vector<16x1xf32> to vector<16x64xf32>
    %8 = arith.subf %0, %7 : vector<16x64xf32>
    %9 = arith.mulf %8, %8 : vector<16x64xf32>
    %cst_6 = arith.constant dense<0.000000e+00> : vector<16xf32>
    %10 = vector.multi_reduction <add>, %9, %cst_6 [1] : vector<16x64xf32> to vector<16xf32>
    %11 = vector.shape_cast %10 : vector<16xf32> to vector<16x1xf32>
    %cst_7 = arith.constant 6.400000e+01 : f32
    %12 = vector.broadcast %cst_7 : f32 to vector<16x1xf32>
    %13 = arith.divf %11, %12 : vector<16x1xf32>
    %cst_8 = arith.constant 1.000000e-07 : f32
    %14 = vector.broadcast %cst_8 : f32 to vector<16x1xf32>
    %15 = arith.addf %13, %14 : vector<16x1xf32>
    %16 = math.rsqrt %15 : vector<16x1xf32>
    %17 = vector.broadcast %16 : vector<16x1xf32> to vector<16x64xf32>
    %18 = arith.mulf %8, %17 : vector<16x64xf32>
    %19 = vector.broadcast %1 : vector<1x64xf32> to vector<16x64xf32>
    %20 = arith.mulf %18, %19 : vector<16x64xf32>
    %21 = vector.broadcast %2 : vector<1x64xf32> to vector<16x64xf32>
    %22 = arith.addf %20, %21 : vector<16x64xf32>
    %c0_9 = arith.constant 0 : index
    %c0_10 = arith.constant 0 : index
    %23 = vector.load %arg1[%c0_9, %c0_10] : memref<2x8xf32, #tpu.memory_space<vmem>>, vector<2x8xf32>
    %c0_11 = arith.constant 0 : index
    %c0_12 = arith.constant 0 : index
    %c0_13 = arith.constant 0 : index
    %24 = vector.load %arg4[%c0_11, %c0_12, %c0_13] : memref<2x64x192xf32, #tpu.memory_space<vmem>>, vector<1x64x192xf32>
    %25 = vector.shape_cast %24 : vector<1x64x192xf32> to vector<64x192xf32>
    %cst_14 = arith.constant dense<0.000000e+00> : vector<16x192xf32>
    %26 = tpu.matmul %22, %25, %cst_14 {dimension_numbers = #tpu.dot_dimension_numbers<[1], [0], [0], [1], [0, 0, 1, 1], [], []>} : vector<16x64xf32>, vector<64x192xf32>, vector<16x192xf32> -> vector<16x192xf32>
    %c0_15 = arith.constant 0 : index
    %c0_16 = arith.constant 0 : index
    %c0_17 = arith.constant 0 : index
    %27 = vector.load %arg5[%c0_15, %c0_16, %c0_17] : memref<2x1x192xf32, #tpu.memory_space<vmem>>, vector<1x1x192xf32>
    %28 = vector.shape_cast %27 : vector<1x1x192xf32> to vector<1x192xf32>
    %29 = vector.broadcast %28 : vector<1x192xf32> to vector<16x192xf32>
    %30 = arith.addf %26, %29 : vector<16x192xf32>
    %31 = vector.extract_strided_slice %30 {offsets = [0, 0], sizes = [16, 64], strides = [1, 1]} : vector<16x192xf32> to vector<16x64xf32>
    %32 = vector.extract_strided_slice %30 {offsets = [0, 64], sizes = [16, 64], strides = [1, 1]} : vector<16x192xf32> to vector<16x64xf32>
    %33 = vector.extract_strided_slice %30 {offsets = [0, 128], sizes = [16, 64], strides = [1, 1]} : vector<16x192xf32> to vector<16x64xf32>
    %34 = vector.extract_strided_slice %31 {offsets = [0, 0], sizes = [8, 64], strides = [1, 1]} : vector<16x64xf32> to vector<8x64xf32>
    %35 = vector.extract_strided_slice %32 {offsets = [0, 0], sizes = [8, 64], strides = [1, 1]} : vector<16x64xf32> to vector<8x64xf32>
    %36 = vector.extract_strided_slice %33 {offsets = [0, 0], sizes = [8, 64], strides = [1, 1]} : vector<16x64xf32> to vector<8x64xf32>
    %37 = vector.extract_strided_slice %23 {offsets = [0, 0], sizes = [1, 8], strides = [1, 1]} : vector<2x8xf32> to vector<1x8xf32>
    %38 = vector.extract_strided_slice %34 {offsets = [0, 0], sizes = [8, 16], strides = [1, 1]} : vector<8x64xf32> to vector<8x16xf32>
    %39 = vector.extract_strided_slice %35 {offsets = [0, 0], sizes = [8, 16], strides = [1, 1]} : vector<8x64xf32> to vector<8x16xf32>
    %40 = vector.extract_strided_slice %36 {offsets = [0, 0], sizes = [8, 16], strides = [1, 1]} : vector<8x64xf32> to vector<8x16xf32>
    %cst_18 = arith.constant dense<0.000000e+00> : vector<8x8xf32>
    %41 = tpu.matmul %38, %39, %cst_18 {dimension_numbers = #tpu.dot_dimension_numbers<[1], [1], [0], [0], [0, 0, 1, 0], [], []>} : vector<8x16xf32>, vector<8x16xf32>, vector<8x8xf32> -> vector<8x8xf32>
    %cst_19 = arith.constant 2.500000e-01 : f32
    %42 = vector.broadcast %cst_19 : f32 to vector<8x8xf32>
    %43 = arith.mulf %41, %42 : vector<8x8xf32>
    %44 = vector.broadcast %37 : vector<1x8xf32> to vector<8x8xf32>
    %45 = arith.addf %43, %44 : vector<8x8xf32>
    %cst_20 = arith.constant dense<0xFF800000> : vector<8xf32>
    %46 = vector.multi_reduction <maximumf>, %45, %cst_20 [1] : vector<8x8xf32> to vector<8xf32>
    %47 = vector.shape_cast %46 : vector<8xf32> to vector<8x1xf32>
    %48 = vector.broadcast %47 : vector<8x1xf32> to vector<8x8xf32>
    %49 = arith.subf %45, %48 : vector<8x8xf32>
    %50 = math.exp %49 : vector<8x8xf32>
    %cst_21 = arith.constant dense<0.000000e+00> : vector<8xf32>
    %51 = vector.multi_reduction <add>, %50, %cst_21 [1] : vector<8x8xf32> to vector<8xf32>
    %52 = vector.shape_cast %51 : vector<8xf32> to vector<8x1xf32>
    %53 = tpu.reciprocal %52 {approx = true} : vector<8x1xf32> -> vector<8x1xf32>
    %54 = vector.broadcast %53 : vector<8x1xf32> to vector<8x8xf32>
    %55 = arith.mulf %50, %54 : vector<8x8xf32>
    %cst_22 = arith.constant dense<0.000000e+00> : vector<8x16xf32>
    %56 = tpu.matmul %55, %40, %cst_22 {dimension_numbers = #tpu.dot_dimension_numbers<[1], [0], [0], [1], [0, 0, 1, 1], [], []>} : vector<8x8xf32>, vector<8x16xf32>, vector<8x16xf32> -> vector<8x16xf32>
    %c0_23 = arith.constant 0 : index
    %c0_24 = arith.constant 0 : index
    %57 = vector.load %arg19[%c0_23, %c0_24] : memref<16x64xf32, #tpu.memory_space<vmem>>, vector<8x16xf32>
    tpu.vector_store %arg19[%c0_23, %c0_24], %56 {strides = array<i32>} : memref<16x64xf32, #tpu.memory_space<vmem>>, vector<8x16xf32>,
    %58 = vector.extract_strided_slice %34 {offsets = [0, 16], sizes = [8, 16], strides = [1, 1]} : vector<8x64xf32> to vector<8x16xf32>
    %59 = vector.extract_strided_slice %35 {offsets = [0, 16], sizes = [8, 16], strides = [1, 1]} : vector<8x64xf32> to vector<8x16xf32>
    %60 = vector.extract_strided_slice %36 {offsets = [0, 16], sizes = [8, 16], strides = [1, 1]} : vector<8x64xf32> to vector<8x16xf32>
    %cst_25 = arith.constant dense<0.000000e+00> : vector<8x8xf32>
    %61 = tpu.matmul %58, %59, %cst_25 {dimension_numbers = #tpu.dot_dimension_numbers<[1], [1], [0], [0], [0, 0, 1, 0], [], []>} : vector<8x16xf32>, vector<8x16xf32>, vector<8x8xf32> -> vector<8x8xf32>
    %cst_26 = arith.constant 2.500000e-01 : f32
    %62 = vector.broadcast %cst_26 : f32 to vector<8x8xf32>
    %63 = arith.mulf %61, %62 : vector<8x8xf32>
    %64 = vector.broadcast %37 : vector<1x8xf32> to vector<8x8xf32>
    %65 = arith.addf %63, %64 : vector<8x8xf32>
    %cst_27 = arith.constant dense<0xFF800000> : vector<8xf32>
    %66 = vector.multi_reduction <maximumf>, %65, %cst_27 [1] : vector<8x8xf32> to vector<8xf32>
    %67 = vector.shape_cast %66 : vector<8xf32> to vector<8x1xf32>
    %68 = vector.broadcast %67 : vector<8x1xf32> to vector<8x8xf32>
    %69 = arith.subf %65, %68 : vector<8x8xf32>
    %70 = math.exp %69 : vector<8x8xf32>
    %cst_28 = arith.constant dense<0.000000e+00> : vector<8xf32>
    %71 = vector.multi_reduction <add>, %70, %cst_28 [1] : vector<8x8xf32> to vector<8xf32>
    %72 = vector.shape_cast %71 : vector<8xf32> to vector<8x1xf32>
    %73 = tpu.reciprocal %72 {approx = true} : vector<8x1xf32> -> vector<8x1xf32>
    %74 = vector.broadcast %73 : vector<8x1xf32> to vector<8x8xf32>
    %75 = arith.mulf %70, %74 : vector<8x8xf32>
    %cst_29 = arith.constant dense<0.000000e+00> : vector<8x16xf32>
    %76 = tpu.matmul %75, %60, %cst_29 {dimension_numbers = #tpu.dot_dimension_numbers<[1], [0], [0], [1], [0, 0, 1, 1], [], []>} : vector<8x8xf32>, vector<8x16xf32>, vector<8x16xf32> -> vector<8x16xf32>
    %c0_30 = arith.constant 0 : index
    %c16 = arith.constant 16 : index
    %77 = vector.load %arg19[%c0_30, %c16] : memref<16x64xf32, #tpu.memory_space<vmem>>, vector<8x16xf32>
    tpu.vector_store %arg19[%c0_30, %c16], %76 {strides = array<i32>} : memref<16x64xf32, #tpu.memory_space<vmem>>, vector<8x16xf32>,
    %78 = vector.extract_strided_slice %34 {offsets = [0, 32], sizes = [8, 16], strides = [1, 1]} : vector<8x64xf32> to vector<8x16xf32>
    %79 = vector.extract_strided_slice %35 {offsets = [0, 32], sizes = [8, 16], strides = [1, 1]} : vector<8x64xf32> to vector<8x16xf32>
    %80 = vector.extract_strided_slice %36 {offsets = [0, 32], sizes = [8, 16], strides = [1, 1]} : vector<8x64xf32> to vector<8x16xf32>
    %cst_31 = arith.constant dense<0.000000e+00> : vector<8x8xf32>
    %81 = tpu.matmul %78, %79, %cst_31 {dimension_numbers = #tpu.dot_dimension_numbers<[1], [1], [0], [0], [0, 0, 1, 0], [], []>} : vector<8x16xf32>, vector<8x16xf32>, vector<8x8xf32> -> vector<8x8xf32>
    %cst_32 = arith.constant 2.500000e-01 : f32
    %82 = vector.broadcast %cst_32 : f32 to vector<8x8xf32>
    %83 = arith.mulf %81, %82 : vector<8x8xf32>
    %84 = vector.broadcast %37 : vector<1x8xf32> to vector<8x8xf32>
    %85 = arith.addf %83, %84 : vector<8x8xf32>
    %cst_33 = arith.constant dense<0xFF800000> : vector<8xf32>
    %86 = vector.multi_reduction <maximumf>, %85, %cst_33 [1] : vector<8x8xf32> to vector<8xf32>
    %87 = vector.shape_cast %86 : vector<8xf32> to vector<8x1xf32>
    %88 = vector.broadcast %87 : vector<8x1xf32> to vector<8x8xf32>
    %89 = arith.subf %85, %88 : vector<8x8xf32>
    %90 = math.exp %89 : vector<8x8xf32>
    %cst_34 = arith.constant dense<0.000000e+00> : vector<8xf32>
    %91 = vector.multi_reduction <add>, %90, %cst_34 [1] : vector<8x8xf32> to vector<8xf32>
    %92 = vector.shape_cast %91 : vector<8xf32> to vector<8x1xf32>
    %93 = tpu.reciprocal %92 {approx = true} : vector<8x1xf32> -> vector<8x1xf32>
    %94 = vector.broadcast %93 : vector<8x1xf32> to vector<8x8xf32>
    %95 = arith.mulf %90, %94 : vector<8x8xf32>
    %cst_35 = arith.constant dense<0.000000e+00> : vector<8x16xf32>
    %96 = tpu.matmul %95, %80, %cst_35 {dimension_numbers = #tpu.dot_dimension_numbers<[1], [0], [0], [1], [0, 0, 1, 1], [], []>} : vector<8x8xf32>, vector<8x16xf32>, vector<8x16xf32> -> vector<8x16xf32>
    %c0_36 = arith.constant 0 : index
    %c32 = arith.constant 32 : index
    %97 = vector.load %arg19[%c0_36, %c32] : memref<16x64xf32, #tpu.memory_space<vmem>>, vector<8x16xf32>
    tpu.vector_store %arg19[%c0_36, %c32], %96 {strides = array<i32>} : memref<16x64xf32, #tpu.memory_space<vmem>>, vector<8x16xf32>,
    %98 = vector.extract_strided_slice %34 {offsets = [0, 48], sizes = [8, 16], strides = [1, 1]} : vector<8x64xf32> to vector<8x16xf32>
    %99 = vector.extract_strided_slice %35 {offsets = [0, 48], sizes = [8, 16], strides = [1, 1]} : vector<8x64xf32> to vector<8x16xf32>
    %100 = vector.extract_strided_slice %36 {offsets = [0, 48], sizes = [8, 16], strides = [1, 1]} : vector<8x64xf32> to vector<8x16xf32>
    %cst_37 = arith.constant dense<0.000000e+00> : vector<8x8xf32>
    %101 = tpu.matmul %98, %99, %cst_37 {dimension_numbers = #tpu.dot_dimension_numbers<[1], [1], [0], [0], [0, 0, 1, 0], [], []>} : vector<8x16xf32>, vector<8x16xf32>, vector<8x8xf32> -> vector<8x8xf32>
    %cst_38 = arith.constant 2.500000e-01 : f32
    %102 = vector.broadcast %cst_38 : f32 to vector<8x8xf32>
    %103 = arith.mulf %101, %102 : vector<8x8xf32>
    %104 = vector.broadcast %37 : vector<1x8xf32> to vector<8x8xf32>
    %105 = arith.addf %103, %104 : vector<8x8xf32>
    %cst_39 = arith.constant dense<0xFF800000> : vector<8xf32>
    %106 = vector.multi_reduction <maximumf>, %105, %cst_39 [1] : vector<8x8xf32> to vector<8xf32>
    %107 = vector.shape_cast %106 : vector<8xf32> to vector<8x1xf32>
    %108 = vector.broadcast %107 : vector<8x1xf32> to vector<8x8xf32>
    %109 = arith.subf %105, %108 : vector<8x8xf32>
    %110 = math.exp %109 : vector<8x8xf32>
    %cst_40 = arith.constant dense<0.000000e+00> : vector<8xf32>
    %111 = vector.multi_reduction <add>, %110, %cst_40 [1] : vector<8x8xf32> to vector<8xf32>
    %112 = vector.shape_cast %111 : vector<8xf32> to vector<8x1xf32>
    %113 = tpu.reciprocal %112 {approx = true} : vector<8x1xf32> -> vector<8x1xf32>
    %114 = vector.broadcast %113 : vector<8x1xf32> to vector<8x8xf32>
    %115 = arith.mulf %110, %114 : vector<8x8xf32>
    %cst_41 = arith.constant dense<0.000000e+00> : vector<8x16xf32>
    %116 = tpu.matmul %115, %100, %cst_41 {dimension_numbers = #tpu.dot_dimension_numbers<[1], [0], [0], [1], [0, 0, 1, 1], [], []>} : vector<8x8xf32>, vector<8x16xf32>, vector<8x16xf32> -> vector<8x16xf32>
    %c0_42 = arith.constant 0 : index
    %c48 = arith.constant 48 : index
    %117 = vector.load %arg19[%c0_42, %c48] : memref<16x64xf32, #tpu.memory_space<vmem>>, vector<8x16xf32>
    tpu.vector_store %arg19[%c0_42, %c48], %116 {strides = array<i32>} : memref<16x64xf32, #tpu.memory_space<vmem>>, vector<8x16xf32>,
    %118 = vector.extract_strided_slice %31 {offsets = [8, 0], sizes = [8, 64], strides = [1, 1]} : vector<16x64xf32> to vector<8x64xf32>
    %119 = vector.extract_strided_slice %32 {offsets = [8, 0], sizes = [8, 64], strides = [1, 1]} : vector<16x64xf32> to vector<8x64xf32>
    %120 = vector.extract_strided_slice %33 {offsets = [8, 0], sizes = [8, 64], strides = [1, 1]} : vector<16x64xf32> to vector<8x64xf32>
    %121 = vector.extract_strided_slice %23 {offsets = [1, 0], sizes = [1, 8], strides = [1, 1]} : vector<2x8xf32> to vector<1x8xf32>
    %122 = vector.extract_strided_slice %118 {offsets = [0, 0], sizes = [8, 16], strides = [1, 1]} : vector<8x64xf32> to vector<8x16xf32>
    %123 = vector.extract_strided_slice %119 {offsets = [0, 0], sizes = [8, 16], strides = [1, 1]} : vector<8x64xf32> to vector<8x16xf32>
    %124 = vector.extract_strided_slice %120 {offsets = [0, 0], sizes = [8, 16], strides = [1, 1]} : vector<8x64xf32> to vector<8x16xf32>
    %cst_43 = arith.constant dense<0.000000e+00> : vector<8x8xf32>
    %125 = tpu.matmul %122, %123, %cst_43 {dimension_numbers = #tpu.dot_dimension_numbers<[1], [1], [0], [0], [0, 0, 1, 0], [], []>} : vector<8x16xf32>, vector<8x16xf32>, vector<8x8xf32> -> vector<8x8xf32>
    %cst_44 = arith.constant 2.500000e-01 : f32
    %126 = vector.broadcast %cst_44 : f32 to vector<8x8xf32>
    %127 = arith.mulf %125, %126 : vector<8x8xf32>
    %128 = vector.broadcast %121 : vector<1x8xf32> to vector<8x8xf32>
    %129 = arith.addf %127, %128 : vector<8x8xf32>
    %cst_45 = arith.constant dense<0xFF800000> : vector<8xf32>
    %130 = vector.multi_reduction <maximumf>, %129, %cst_45 [1] : vector<8x8xf32> to vector<8xf32>
    %131 = vector.shape_cast %130 : vector<8xf32> to vector<8x1xf32>
    %132 = vector.broadcast %131 : vector<8x1xf32> to vector<8x8xf32>
    %133 = arith.subf %129, %132 : vector<8x8xf32>
    %134 = math.exp %133 : vector<8x8xf32>
    %cst_46 = arith.constant dense<0.000000e+00> : vector<8xf32>
    %135 = vector.multi_reduction <add>, %134, %cst_46 [1] : vector<8x8xf32> to vector<8xf32>
    %136 = vector.shape_cast %135 : vector<8xf32> to vector<8x1xf32>
    %137 = tpu.reciprocal %136 {approx = true} : vector<8x1xf32> -> vector<8x1xf32>
    %138 = vector.broadcast %137 : vector<8x1xf32> to vector<8x8xf32>
    %139 = arith.mulf %134, %138 : vector<8x8xf32>
    %cst_47 = arith.constant dense<0.000000e+00> : vector<8x16xf32>
    %140 = tpu.matmul %139, %124, %cst_47 {dimension_numbers = #tpu.dot_dimension_numbers<[1], [0], [0], [1], [0, 0, 1, 1], [], []>} : vector<8x8xf32>, vector<8x16xf32>, vector<8x16xf32> -> vector<8x16xf32>
    %c8 = arith.constant 8 : index
    %c0_48 = arith.constant 0 : index
    %141 = vector.load %arg19[%c8, %c0_48] : memref<16x64xf32, #tpu.memory_space<vmem>>, vector<8x16xf32>
    tpu.vector_store %arg19[%c8, %c0_48], %140 {strides = array<i32>} : memref<16x64xf32, #tpu.memory_space<vmem>>, vector<8x16xf32>,
    %142 = vector.extract_strided_slice %118 {offsets = [0, 16], sizes = [8, 16], strides = [1, 1]} : vector<8x64xf32> to vector<8x16xf32>
    %143 = vector.extract_strided_slice %119 {offsets = [0, 16], sizes = [8, 16], strides = [1, 1]} : vector<8x64xf32> to vector<8x16xf32>
    %144 = vector.extract_strided_slice %120 {offsets = [0, 16], sizes = [8, 16], strides = [1, 1]} : vector<8x64xf32> to vector<8x16xf32>
    %cst_49 = arith.constant dense<0.000000e+00> : vector<8x8xf32>
    %145 = tpu.matmul %142, %143, %cst_49 {dimension_numbers = #tpu.dot_dimension_numbers<[1], [1], [0], [0], [0, 0, 1, 0], [], []>} : vector<8x16xf32>, vector<8x16xf32>, vector<8x8xf32> -> vector<8x8xf32>
    %cst_50 = arith.constant 2.500000e-01 : f32
    %146 = vector.broadcast %cst_50 : f32 to vector<8x8xf32>
    %147 = arith.mulf %145, %146 : vector<8x8xf32>
    %148 = vector.broadcast %121 : vector<1x8xf32> to vector<8x8xf32>
    %149 = arith.addf %147, %148 : vector<8x8xf32>
    %cst_51 = arith.constant dense<0xFF800000> : vector<8xf32>
    %150 = vector.multi_reduction <maximumf>, %149, %cst_51 [1] : vector<8x8xf32> to vector<8xf32>
    %151 = vector.shape_cast %150 : vector<8xf32> to vector<8x1xf32>
    %152 = vector.broadcast %151 : vector<8x1xf32> to vector<8x8xf32>
    %153 = arith.subf %149, %152 : vector<8x8xf32>
    %154 = math.exp %153 : vector<8x8xf32>
    %cst_52 = arith.constant dense<0.000000e+00> : vector<8xf32>
    %155 = vector.multi_reduction <add>, %154, %cst_52 [1] : vector<8x8xf32> to vector<8xf32>
    %156 = vector.shape_cast %155 : vector<8xf32> to vector<8x1xf32>
    %157 = tpu.reciprocal %156 {approx = true} : vector<8x1xf32> -> vector<8x1xf32>
    %158 = vector.broadcast %157 : vector<8x1xf32> to vector<8x8xf32>
    %159 = arith.mulf %154, %158 : vector<8x8xf32>
    %cst_53 = arith.constant dense<0.000000e+00> : vector<8x16xf32>
    %160 = tpu.matmul %159, %144, %cst_53 {dimension_numbers = #tpu.dot_dimension_numbers<[1], [0], [0], [1], [0, 0, 1, 1], [], []>} : vector<8x8xf32>, vector<8x16xf32>, vector<8x16xf32> -> vector<8x16xf32>
    %c8_54 = arith.constant 8 : index
    %c16_55 = arith.constant 16 : index
    %161 = vector.load %arg19[%c8_54, %c16_55] : memref<16x64xf32, #tpu.memory_space<vmem>>, vector<8x16xf32>
    tpu.vector_store %arg19[%c8_54, %c16_55], %160 {strides = array<i32>} : memref<16x64xf32, #tpu.memory_space<vmem>>, vector<8x16xf32>,
    %162 = vector.extract_strided_slice %118 {offsets = [0, 32], sizes = [8, 16], strides = [1, 1]} : vector<8x64xf32> to vector<8x16xf32>
    %163 = vector.extract_strided_slice %119 {offsets = [0, 32], sizes = [8, 16], strides = [1, 1]} : vector<8x64xf32> to vector<8x16xf32>
    %164 = vector.extract_strided_slice %120 {offsets = [0, 32], sizes = [8, 16], strides = [1, 1]} : vector<8x64xf32> to vector<8x16xf32>
    %cst_56 = arith.constant dense<0.000000e+00> : vector<8x8xf32>
    %165 = tpu.matmul %162, %163, %cst_56 {dimension_numbers = #tpu.dot_dimension_numbers<[1], [1], [0], [0], [0, 0, 1, 0], [], []>} : vector<8x16xf32>, vector<8x16xf32>, vector<8x8xf32> -> vector<8x8xf32>
    %cst_57 = arith.constant 2.500000e-01 : f32
    %166 = vector.broadcast %cst_57 : f32 to vector<8x8xf32>
    %167 = arith.mulf %165, %166 : vector<8x8xf32>
    %168 = vector.broadcast %121 : vector<1x8xf32> to vector<8x8xf32>
    %169 = arith.addf %167, %168 : vector<8x8xf32>
    %cst_58 = arith.constant dense<0xFF800000> : vector<8xf32>
    %170 = vector.multi_reduction <maximumf>, %169, %cst_58 [1] : vector<8x8xf32> to vector<8xf32>
    %171 = vector.shape_cast %170 : vector<8xf32> to vector<8x1xf32>
    %172 = vector.broadcast %171 : vector<8x1xf32> to vector<8x8xf32>
    %173 = arith.subf %169, %172 : vector<8x8xf32>
    %174 = math.exp %173 : vector<8x8xf32>
    %cst_59 = arith.constant dense<0.000000e+00> : vector<8xf32>
    %175 = vector.multi_reduction <add>, %174, %cst_59 [1] : vector<8x8xf32> to vector<8xf32>
    %176 = vector.shape_cast %175 : vector<8xf32> to vector<8x1xf32>
    %177 = tpu.reciprocal %176 {approx = true} : vector<8x1xf32> -> vector<8x1xf32>
    %178 = vector.broadcast %177 : vector<8x1xf32> to vector<8x8xf32>
    %179 = arith.mulf %174, %178 : vector<8x8xf32>
    %cst_60 = arith.constant dense<0.000000e+00> : vector<8x16xf32>
    %180 = tpu.matmul %179, %164, %cst_60 {dimension_numbers = #tpu.dot_dimension_numbers<[1], [0], [0], [1], [0, 0, 1, 1], [], []>} : vector<8x8xf32>, vector<8x16xf32>, vector<8x16xf32> -> vector<8x16xf32>
    %c8_61 = arith.constant 8 : index
    %c32_62 = arith.constant 32 : index
    %181 = vector.load %arg19[%c8_61, %c32_62] : memref<16x64xf32, #tpu.memory_space<vmem>>, vector<8x16xf32>
    tpu.vector_store %arg19[%c8_61, %c32_62], %180 {strides = array<i32>} : memref<16x64xf32, #tpu.memory_space<vmem>>, vector<8x16xf32>,
    %182 = vector.extract_strided_slice %118 {offsets = [0, 48], sizes = [8, 16], strides = [1, 1]} : vector<8x64xf32> to vector<8x16xf32>
    %183 = vector.extract_strided_slice %119 {offsets = [0, 48], sizes = [8, 16], strides = [1, 1]} : vector<8x64xf32> to vector<8x16xf32>
    %184 = vector.extract_strided_slice %120 {offsets = [0, 48], sizes = [8, 16], strides = [1, 1]} : vector<8x64xf32> to vector<8x16xf32>
    %cst_63 = arith.constant dense<0.000000e+00> : vector<8x8xf32>
    %185 = tpu.matmul %182, %183, %cst_63 {dimension_numbers = #tpu.dot_dimension_numbers<[1], [1], [0], [0], [0, 0, 1, 0], [], []>} : vector<8x16xf32>, vector<8x16xf32>, vector<8x8xf32> -> vector<8x8xf32>
    %cst_64 = arith.constant 2.500000e-01 : f32
    %186 = vector.broadcast %cst_64 : f32 to vector<8x8xf32>
    %187 = arith.mulf %185, %186 : vector<8x8xf32>
    %188 = vector.broadcast %121 : vector<1x8xf32> to vector<8x8xf32>
    %189 = arith.addf %187, %188 : vector<8x8xf32>
    %cst_65 = arith.constant dense<0xFF800000> : vector<8xf32>
    %190 = vector.multi_reduction <maximumf>, %189, %cst_65 [1] : vector<8x8xf32> to vector<8xf32>
    %191 = vector.shape_cast %190 : vector<8xf32> to vector<8x1xf32>
    %192 = vector.broadcast %191 : vector<8x1xf32> to vector<8x8xf32>
    %193 = arith.subf %189, %192 : vector<8x8xf32>
    %194 = math.exp %193 : vector<8x8xf32>
    %cst_66 = arith.constant dense<0.000000e+00> : vector<8xf32>
    %195 = vector.multi_reduction <add>, %194, %cst_66 [1] : vector<8x8xf32> to vector<8xf32>
    %196 = vector.shape_cast %195 : vector<8xf32> to vector<8x1xf32>
    %197 = tpu.reciprocal %196 {approx = true} : vector<8x1xf32> -> vector<8x1xf32>
    %198 = vector.broadcast %197 : vector<8x1xf32> to vector<8x8xf32>
    %199 = arith.mulf %194, %198 : vector<8x8xf32>
    %cst_67 = arith.constant dense<0.000000e+00> : vector<8x16xf32>
    %200 = tpu.matmul %199, %184, %cst_67 {dimension_numbers = #tpu.dot_dimension_numbers<[1], [0], [0], [1], [0, 0, 1, 1], [], []>} : vector<8x8xf32>, vector<8x16xf32>, vector<8x16xf32> -> vector<8x16xf32>
    %c8_68 = arith.constant 8 : index
    %c48_69 = arith.constant 48 : index
    %201 = vector.load %arg19[%c8_68, %c48_69] : memref<16x64xf32, #tpu.memory_space<vmem>>, vector<8x16xf32>
    tpu.vector_store %arg19[%c8_68, %c48_69], %200 {strides = array<i32>} : memref<16x64xf32, #tpu.memory_space<vmem>>, vector<8x16xf32>,
    %c0_70 = arith.constant 0 : index
    %c0_71 = arith.constant 0 : index
    %202 = vector.load %arg19[%c0_70, %c0_71] : memref<16x64xf32, #tpu.memory_space<vmem>>, vector<16x64xf32>
    %c0_72 = arith.constant 0 : index
    %c0_73 = arith.constant 0 : index
    %c0_74 = arith.constant 0 : index
    %203 = vector.load %arg6[%c0_72, %c0_73, %c0_74] : memref<2x64x64xf32, #tpu.memory_space<vmem>>, vector<1x64x64xf32>
    %204 = vector.shape_cast %203 : vector<1x64x64xf32> to vector<64x64xf32>
    %cst_75 = arith.constant dense<0.000000e+00> : vector<16x64xf32>
    %205 = tpu.matmul %202, %204, %cst_75 {dimension_numbers = #tpu.dot_dimension_numbers<[1], [0], [0], [1], [0, 0, 1, 1], [], []>} : vector<16x64xf32>, vector<64x64xf32>, vector<16x64xf32> -> vector<16x64xf32>
    %c0_76 = arith.constant 0 : index
    %c0_77 = arith.constant 0 : index
    %c0_78 = arith.constant 0 : index
    %206 = vector.load %arg7[%c0_76, %c0_77, %c0_78] : memref<2x1x64xf32, #tpu.memory_space<vmem>>, vector<1x1x64xf32>
    %207 = vector.shape_cast %206 : vector<1x1x64xf32> to vector<1x64xf32>
    %208 = vector.broadcast %207 : vector<1x64xf32> to vector<16x64xf32>
    %209 = arith.addf %205, %208 : vector<16x64xf32>
    %210 = arith.addf %22, %209 : vector<16x64xf32>
    %c0_79 = arith.constant 0 : index
    %c0_80 = arith.constant 0 : index
    %c0_81 = arith.constant 0 : index
    %211 = vector.load %arg8[%c0_79, %c0_80, %c0_81] : memref<2x1x64xf32, #tpu.memory_space<vmem>>, vector<1x1x64xf32>
    %212 = vector.shape_cast %211 : vector<1x1x64xf32> to vector<1x64xf32>
    %c0_82 = arith.constant 0 : index
    %c0_83 = arith.constant 0 : index
    %c0_84 = arith.constant 0 : index
    %213 = vector.load %arg9[%c0_82, %c0_83, %c0_84] : memref<2x1x64xf32, #tpu.memory_space<vmem>>, vector<1x1x64xf32>
    %214 = vector.shape_cast %213 : vector<1x1x64xf32> to vector<1x64xf32>
    %cst_85 = arith.constant dense<0.000000e+00> : vector<16xf32>
    %215 = vector.multi_reduction <add>, %210, %cst_85 [1] : vector<16x64xf32> to vector<16xf32>
    %216 = vector.shape_cast %215 : vector<16xf32> to vector<16x1xf32>
    %cst_86 = arith.constant 6.400000e+01 : f32
    %217 = vector.broadcast %cst_86 : f32 to vector<16x1xf32>
    %218 = arith.divf %216, %217 : vector<16x1xf32>
    %219 = vector.broadcast %218 : vector<16x1xf32> to vector<16x64xf32>
    %220 = arith.subf %210, %219 : vector<16x64xf32>
    %221 = arith.mulf %220, %220 : vector<16x64xf32>
    %cst_87 = arith.constant dense<0.000000e+00> : vector<16xf32>
    %222 = vector.multi_reduction <add>, %221, %cst_87 [1] : vector<16x64xf32> to vector<16xf32>
    %223 = vector.shape_cast %222 : vector<16xf32> to vector<16x1xf32>
    %cst_88 = arith.constant 6.400000e+01 : f32
    %224 = vector.broadcast %cst_88 : f32 to vector<16x1xf32>
    %225 = arith.divf %223, %224 : vector<16x1xf32>
    %cst_89 = arith.constant 1.000000e-07 : f32
    %226 = vector.broadcast %cst_89 : f32 to vector<16x1xf32>
    %227 = arith.addf %225, %226 : vector<16x1xf32>
    %228 = math.rsqrt %227 : vector<16x1xf32>
    %229 = vector.broadcast %228 : vector<16x1xf32> to vector<16x64xf32>
    %230 = arith.mulf %220, %229 : vector<16x64xf32>
    %231 = vector.broadcast %212 : vector<1x64xf32> to vector<16x64xf32>
    %232 = arith.mulf %230, %231 : vector<16x64xf32>
    %233 = vector.broadcast %214 : vector<1x64xf32> to vector<16x64xf32>
    %234 = arith.addf %232, %233 : vector<16x64xf32>
    %c0_90 = arith.constant 0 : index
    %c0_91 = arith.constant 0 : index
    %c0_92 = arith.constant 0 : index
    %235 = vector.load %arg10[%c0_90, %c0_91, %c0_92] : memref<2x64x128xf32, #tpu.memory_space<vmem>>, vector<1x64x128xf32>
    %236 = vector.shape_cast %235 : vector<1x64x128xf32> to vector<64x128xf32>
    %cst_93 = arith.constant dense<0.000000e+00> : vector<16x128xf32>
    %237 = tpu.matmul %234, %236, %cst_93 {dimension_numbers = #tpu.dot_dimension_numbers<[1], [0], [0], [1], [0, 0, 1, 1], [], []>} : vector<16x64xf32>, vector<64x128xf32>, vector<16x128xf32> -> vector<16x128xf32>
    %c0_94 = arith.constant 0 : index
    %c0_95 = arith.constant 0 : index
    %c0_96 = arith.constant 0 : index
    %238 = vector.load %arg11[%c0_94, %c0_95, %c0_96] : memref<2x1x128xf32, #tpu.memory_space<vmem>>, vector<1x1x128xf32>
    %239 = vector.shape_cast %238 : vector<1x1x128xf32> to vector<1x128xf32>
    %240 = vector.broadcast %239 : vector<1x128xf32> to vector<16x128xf32>
    %241 = arith.addf %237, %240 : vector<16x128xf32>
    %cst_97 = arith.constant 5.000000e-01 : f32
    %242 = vector.broadcast %cst_97 : f32 to vector<16x128xf32>
    %243 = arith.mulf %242, %241 : vector<16x128xf32>
    %cst_98 = arith.constant 4.471500e-02 : f32
    %244 = vector.broadcast %cst_98 : f32 to vector<16x128xf32>
    %245 = arith.mulf %244, %241 : vector<16x128xf32>
    %246 = arith.mulf %245, %241 : vector<16x128xf32>
    %247 = arith.mulf %246, %241 : vector<16x128xf32>
    %248 = arith.addf %241, %247 : vector<16x128xf32>
    %cst_99 = arith.constant 0.797884583 : f32
    %249 = vector.broadcast %cst_99 : f32 to vector<16x128xf32>
    %250 = arith.mulf %249, %248 : vector<16x128xf32>
    %251 = math.tanh %250 : vector<16x128xf32>
    %cst_100 = arith.constant 1.000000e+00 : f32
    %252 = vector.broadcast %cst_100 : f32 to vector<16x128xf32>
    %253 = arith.addf %252, %251 : vector<16x128xf32>
    %254 = arith.mulf %243, %253 : vector<16x128xf32>
    %c0_101 = arith.constant 0 : index
    %c0_102 = arith.constant 0 : index
    %c0_103 = arith.constant 0 : index
    %255 = vector.load %arg12[%c0_101, %c0_102, %c0_103] : memref<2x128x64xf32, #tpu.memory_space<vmem>>, vector<1x128x64xf32>
    %256 = vector.shape_cast %255 : vector<1x128x64xf32> to vector<128x64xf32>
    %cst_104 = arith.constant dense<0.000000e+00> : vector<16x64xf32>
    %257 = tpu.matmul %254, %256, %cst_104 {dimension_numbers = #tpu.dot_dimension_numbers<[1], [0], [0], [1], [0, 0, 1, 1], [], []>} : vector<16x128xf32>, vector<128x64xf32>, vector<16x64xf32> -> vector<16x64xf32>
    %c0_105 = arith.constant 0 : index
    %c0_106 = arith.constant 0 : index
    %c0_107 = arith.constant 0 : index
    %258 = vector.load %arg13[%c0_105, %c0_106, %c0_107] : memref<2x1x64xf32, #tpu.memory_space<vmem>>, vector<1x1x64xf32>
    %259 = vector.shape_cast %258 : vector<1x1x64xf32> to vector<1x64xf32>
    %260 = vector.broadcast %259 : vector<1x64xf32> to vector<16x64xf32>
    %261 = arith.addf %257, %260 : vector<16x64xf32>
    %262 = arith.addf %234, %261 : vector<16x64xf32>
    %c0_108 = arith.constant 0 : index
    %c0_109 = arith.constant 0 : index
    %c0_110 = arith.constant 0 : index
    %263 = vector.load %arg14[%c0_108, %c0_109, %c0_110] : memref<2x1x64xf32, #tpu.memory_space<vmem>>, vector<1x1x64xf32>
    %264 = vector.shape_cast %263 : vector<1x1x64xf32> to vector<1x64xf32>
    %c0_111 = arith.constant 0 : index
    %c0_112 = arith.constant 0 : index
    %c0_113 = arith.constant 0 : index
    %265 = vector.load %arg15[%c0_111, %c0_112, %c0_113] : memref<2x1x64xf32, #tpu.memory_space<vmem>>, vector<1x1x64xf32>
    %266 = vector.shape_cast %265 : vector<1x1x64xf32> to vector<1x64xf32>
    %cst_114 = arith.constant dense<0.000000e+00> : vector<16xf32>
    %267 = vector.multi_reduction <add>, %262, %cst_114 [1] : vector<16x64xf32> to vector<16xf32>
    %268 = vector.shape_cast %267 : vector<16xf32> to vector<16x1xf32>
    %cst_115 = arith.constant 6.400000e+01 : f32
    %269 = vector.broadcast %cst_115 : f32 to vector<16x1xf32>
    %270 = arith.divf %268, %269 : vector<16x1xf32>
    %271 = vector.broadcast %270 : vector<16x1xf32> to vector<16x64xf32>
    %272 = arith.subf %262, %271 : vector<16x64xf32>
    %273 = arith.mulf %272, %272 : vector<16x64xf32>
    %cst_116 = arith.constant dense<0.000000e+00> : vector<16xf32>
    %274 = vector.multi_reduction <add>, %273, %cst_116 [1] : vector<16x64xf32> to vector<16xf32>
    %275 = vector.shape_cast %274 : vector<16xf32> to vector<16x1xf32>
    %cst_117 = arith.constant 6.400000e+01 : f32
    %276 = vector.broadcast %cst_117 : f32 to vector<16x1xf32>
    %277 = arith.divf %275, %276 : vector<16x1xf32>
    %cst_118 = arith.constant 1.000000e-07 : f32
    %278 = vector.broadcast %cst_118 : f32 to vector<16x1xf32>
    %279 = arith.addf %277, %278 : vector<16x1xf32>
    %280 = math.rsqrt %279 : vector<16x1xf32>
    %281 = vector.broadcast %280 : vector<16x1xf32> to vector<16x64xf32>
    %282 = arith.mulf %272, %281 : vector<16x64xf32>
    %283 = vector.broadcast %264 : vector<1x64xf32> to vector<16x64xf32>
    %284 = arith.mulf %282, %283 : vector<16x64xf32>
    %285 = vector.broadcast %266 : vector<1x64xf32> to vector<16x64xf32>
    %286 = arith.addf %284, %285 : vector<16x64xf32>
    %c1 = arith.constant 1 : index
    %c0_119 = arith.constant 0 : index
    %c0_120 = arith.constant 0 : index
    %287 = vector.load %arg4[%c1, %c0_119, %c0_120] : memref<2x64x192xf32, #tpu.memory_space<vmem>>, vector<1x64x192xf32>
    %288 = vector.shape_cast %287 : vector<1x64x192xf32> to vector<64x192xf32>
    %cst_121 = arith.constant dense<0.000000e+00> : vector<16x192xf32>
    %289 = tpu.matmul %286, %288, %cst_121 {dimension_numbers = #tpu.dot_dimension_numbers<[1], [0], [0], [1], [0, 0, 1, 1], [], []>} : vector<16x64xf32>, vector<64x192xf32>, vector<16x192xf32> -> vector<16x192xf32>
    %c1_122 = arith.constant 1 : index
    %c0_123 = arith.constant 0 : index
    %c0_124 = arith.constant 0 : index
    %290 = vector.load %arg5[%c1_122, %c0_123, %c0_124] : memref<2x1x192xf32, #tpu.memory_space<vmem>>, vector<1x1x192xf32>
    %291 = vector.shape_cast %290 : vector<1x1x192xf32> to vector<1x192xf32>
    %292 = vector.broadcast %291 : vector<1x192xf32> to vector<16x192xf32>
    %293 = arith.addf %289, %292 : vector<16x192xf32>
    %294 = vector.extract_strided_slice %293 {offsets = [0, 0], sizes = [16, 64], strides = [1, 1]} : vector<16x192xf32> to vector<16x64xf32>
    %295 = vector.extract_strided_slice %293 {offsets = [0, 64], sizes = [16, 64], strides = [1, 1]} : vector<16x192xf32> to vector<16x64xf32>
    %296 = vector.extract_strided_slice %293 {offsets = [0, 128], sizes = [16, 64], strides = [1, 1]} : vector<16x192xf32> to vector<16x64xf32>
    %297 = vector.extract_strided_slice %294 {offsets = [0, 0], sizes = [8, 64], strides = [1, 1]} : vector<16x64xf32> to vector<8x64xf32>
    %298 = vector.extract_strided_slice %295 {offsets = [0, 0], sizes = [8, 64], strides = [1, 1]} : vector<16x64xf32> to vector<8x64xf32>
    %299 = vector.extract_strided_slice %296 {offsets = [0, 0], sizes = [8, 64], strides = [1, 1]} : vector<16x64xf32> to vector<8x64xf32>
    %300 = vector.extract_strided_slice %23 {offsets = [0, 0], sizes = [1, 8], strides = [1, 1]} : vector<2x8xf32> to vector<1x8xf32>
    %301 = vector.extract_strided_slice %297 {offsets = [0, 0], sizes = [8, 16], strides = [1, 1]} : vector<8x64xf32> to vector<8x16xf32>
    %302 = vector.extract_strided_slice %298 {offsets = [0, 0], sizes = [8, 16], strides = [1, 1]} : vector<8x64xf32> to vector<8x16xf32>
    %303 = vector.extract_strided_slice %299 {offsets = [0, 0], sizes = [8, 16], strides = [1, 1]} : vector<8x64xf32> to vector<8x16xf32>
    %cst_125 = arith.constant dense<0.000000e+00> : vector<8x8xf32>
    %304 = tpu.matmul %301, %302, %cst_125 {dimension_numbers = #tpu.dot_dimension_numbers<[1], [1], [0], [0], [0, 0, 1, 0], [], []>} : vector<8x16xf32>, vector<8x16xf32>, vector<8x8xf32> -> vector<8x8xf32>
    %cst_126 = arith.constant 2.500000e-01 : f32
    %305 = vector.broadcast %cst_126 : f32 to vector<8x8xf32>
    %306 = arith.mulf %304, %305 : vector<8x8xf32>
    %307 = vector.broadcast %300 : vector<1x8xf32> to vector<8x8xf32>
    %308 = arith.addf %306, %307 : vector<8x8xf32>
    %cst_127 = arith.constant dense<0xFF800000> : vector<8xf32>
    %309 = vector.multi_reduction <maximumf>, %308, %cst_127 [1] : vector<8x8xf32> to vector<8xf32>
    %310 = vector.shape_cast %309 : vector<8xf32> to vector<8x1xf32>
    %311 = vector.broadcast %310 : vector<8x1xf32> to vector<8x8xf32>
    %312 = arith.subf %308, %311 : vector<8x8xf32>
    %313 = math.exp %312 : vector<8x8xf32>
    %cst_128 = arith.constant dense<0.000000e+00> : vector<8xf32>
    %314 = vector.multi_reduction <add>, %313, %cst_128 [1] : vector<8x8xf32> to vector<8xf32>
    %315 = vector.shape_cast %314 : vector<8xf32> to vector<8x1xf32>
    %316 = tpu.reciprocal %315 {approx = true} : vector<8x1xf32> -> vector<8x1xf32>
    %317 = vector.broadcast %316 : vector<8x1xf32> to vector<8x8xf32>
    %318 = arith.mulf %313, %317 : vector<8x8xf32>
    %cst_129 = arith.constant dense<0.000000e+00> : vector<8x16xf32>
    %319 = tpu.matmul %318, %303, %cst_129 {dimension_numbers = #tpu.dot_dimension_numbers<[1], [0], [0], [1], [0, 0, 1, 1], [], []>} : vector<8x8xf32>, vector<8x16xf32>, vector<8x16xf32> -> vector<8x16xf32>
    %c0_130 = arith.constant 0 : index
    %c0_131 = arith.constant 0 : index
    %320 = vector.load %arg19[%c0_130, %c0_131] : memref<16x64xf32, #tpu.memory_space<vmem>>, vector<8x16xf32>
    tpu.vector_store %arg19[%c0_130, %c0_131], %319 {strides = array<i32>} : memref<16x64xf32, #tpu.memory_space<vmem>>, vector<8x16xf32>,
    %321 = vector.extract_strided_slice %297 {offsets = [0, 16], sizes = [8, 16], strides = [1, 1]} : vector<8x64xf32> to vector<8x16xf32>
    %322 = vector.extract_strided_slice %298 {offsets = [0, 16], sizes = [8, 16], strides = [1, 1]} : vector<8x64xf32> to vector<8x16xf32>
    %323 = vector.extract_strided_slice %299 {offsets = [0, 16], sizes = [8, 16], strides = [1, 1]} : vector<8x64xf32> to vector<8x16xf32>
    %cst_132 = arith.constant dense<0.000000e+00> : vector<8x8xf32>
    %324 = tpu.matmul %321, %322, %cst_132 {dimension_numbers = #tpu.dot_dimension_numbers<[1], [1], [0], [0], [0, 0, 1, 0], [], []>} : vector<8x16xf32>, vector<8x16xf32>, vector<8x8xf32> -> vector<8x8xf32>
    %cst_133 = arith.constant 2.500000e-01 : f32
    %325 = vector.broadcast %cst_133 : f32 to vector<8x8xf32>
    %326 = arith.mulf %324, %325 : vector<8x8xf32>
    %327 = vector.broadcast %300 : vector<1x8xf32> to vector<8x8xf32>
    %328 = arith.addf %326, %327 : vector<8x8xf32>
    %cst_134 = arith.constant dense<0xFF800000> : vector<8xf32>
    %329 = vector.multi_reduction <maximumf>, %328, %cst_134 [1] : vector<8x8xf32> to vector<8xf32>
    %330 = vector.shape_cast %329 : vector<8xf32> to vector<8x1xf32>
    %331 = vector.broadcast %330 : vector<8x1xf32> to vector<8x8xf32>
    %332 = arith.subf %328, %331 : vector<8x8xf32>
    %333 = math.exp %332 : vector<8x8xf32>
    %cst_135 = arith.constant dense<0.000000e+00> : vector<8xf32>
    %334 = vector.multi_reduction <add>, %333, %cst_135 [1] : vector<8x8xf32> to vector<8xf32>
    %335 = vector.shape_cast %334 : vector<8xf32> to vector<8x1xf32>
    %336 = tpu.reciprocal %335 {approx = true} : vector<8x1xf32> -> vector<8x1xf32>
    %337 = vector.broadcast %336 : vector<8x1xf32> to vector<8x8xf32>
    %338 = arith.mulf %333, %337 : vector<8x8xf32>
    %cst_136 = arith.constant dense<0.000000e+00> : vector<8x16xf32>
    %339 = tpu.matmul %338, %323, %cst_136 {dimension_numbers = #tpu.dot_dimension_numbers<[1], [0], [0], [1], [0, 0, 1, 1], [], []>} : vector<8x8xf32>, vector<8x16xf32>, vector<8x16xf32> -> vector<8x16xf32>
    %c0_137 = arith.constant 0 : index
    %c16_138 = arith.constant 16 : index
    %340 = vector.load %arg19[%c0_137, %c16_138] : memref<16x64xf32, #tpu.memory_space<vmem>>, vector<8x16xf32>
    tpu.vector_store %arg19[%c0_137, %c16_138], %339 {strides = array<i32>} : memref<16x64xf32, #tpu.memory_space<vmem>>, vector<8x16xf32>,
    %341 = vector.extract_strided_slice %297 {offsets = [0, 32], sizes = [8, 16], strides = [1, 1]} : vector<8x64xf32> to vector<8x16xf32>
    %342 = vector.extract_strided_slice %298 {offsets = [0, 32], sizes = [8, 16], strides = [1, 1]} : vector<8x64xf32> to vector<8x16xf32>
    %343 = vector.extract_strided_slice %299 {offsets = [0, 32], sizes = [8, 16], strides = [1, 1]} : vector<8x64xf32> to vector<8x16xf32>
    %cst_139 = arith.constant dense<0.000000e+00> : vector<8x8xf32>
    %344 = tpu.matmul %341, %342, %cst_139 {dimension_numbers = #tpu.dot_dimension_numbers<[1], [1], [0], [0], [0, 0, 1, 0], [], []>} : vector<8x16xf32>, vector<8x16xf32>, vector<8x8xf32> -> vector<8x8xf32>
    %cst_140 = arith.constant 2.500000e-01 : f32
    %345 = vector.broadcast %cst_140 : f32 to vector<8x8xf32>
    %346 = arith.mulf %344, %345 : vector<8x8xf32>
    %347 = vector.broadcast %300 : vector<1x8xf32> to vector<8x8xf32>
    %348 = arith.addf %346, %347 : vector<8x8xf32>
    %cst_141 = arith.constant dense<0xFF800000> : vector<8xf32>
    %349 = vector.multi_reduction <maximumf>, %348, %cst_141 [1] : vector<8x8xf32> to vector<8xf32>
    %350 = vector.shape_cast %349 : vector<8xf32> to vector<8x1xf32>
    %351 = vector.broadcast %350 : vector<8x1xf32> to vector<8x8xf32>
    %352 = arith.subf %348, %351 : vector<8x8xf32>
    %353 = math.exp %352 : vector<8x8xf32>
    %cst_142 = arith.constant dense<0.000000e+00> : vector<8xf32>
    %354 = vector.multi_reduction <add>, %353, %cst_142 [1] : vector<8x8xf32> to vector<8xf32>
    %355 = vector.shape_cast %354 : vector<8xf32> to vector<8x1xf32>
    %356 = tpu.reciprocal %355 {approx = true} : vector<8x1xf32> -> vector<8x1xf32>
    %357 = vector.broadcast %356 : vector<8x1xf32> to vector<8x8xf32>
    %358 = arith.mulf %353, %357 : vector<8x8xf32>
    %cst_143 = arith.constant dense<0.000000e+00> : vector<8x16xf32>
    %359 = tpu.matmul %358, %343, %cst_143 {dimension_numbers = #tpu.dot_dimension_numbers<[1], [0], [0], [1], [0, 0, 1, 1], [], []>} : vector<8x8xf32>, vector<8x16xf32>, vector<8x16xf32> -> vector<8x16xf32>
    %c0_144 = arith.constant 0 : index
    %c32_145 = arith.constant 32 : index
    %360 = vector.load %arg19[%c0_144, %c32_145] : memref<16x64xf32, #tpu.memory_space<vmem>>, vector<8x16xf32>
    tpu.vector_store %arg19[%c0_144, %c32_145], %359 {strides = array<i32>} : memref<16x64xf32, #tpu.memory_space<vmem>>, vector<8x16xf32>,
    %361 = vector.extract_strided_slice %297 {offsets = [0, 48], sizes = [8, 16], strides = [1, 1]} : vector<8x64xf32> to vector<8x16xf32>
    %362 = vector.extract_strided_slice %298 {offsets = [0, 48], sizes = [8, 16], strides = [1, 1]} : vector<8x64xf32> to vector<8x16xf32>
    %363 = vector.extract_strided_slice %299 {offsets = [0, 48], sizes = [8, 16], strides = [1, 1]} : vector<8x64xf32> to vector<8x16xf32>
    %cst_146 = arith.constant dense<0.000000e+00> : vector<8x8xf32>
    %364 = tpu.matmul %361, %362, %cst_146 {dimension_numbers = #tpu.dot_dimension_numbers<[1], [1], [0], [0], [0, 0, 1, 0], [], []>} : vector<8x16xf32>, vector<8x16xf32>, vector<8x8xf32> -> vector<8x8xf32>
    %cst_147 = arith.constant 2.500000e-01 : f32
    %365 = vector.broadcast %cst_147 : f32 to vector<8x8xf32>
    %366 = arith.mulf %364, %365 : vector<8x8xf32>
    %367 = vector.broadcast %300 : vector<1x8xf32> to vector<8x8xf32>
    %368 = arith.addf %366, %367 : vector<8x8xf32>
    %cst_148 = arith.constant dense<0xFF800000> : vector<8xf32>
    %369 = vector.multi_reduction <maximumf>, %368, %cst_148 [1] : vector<8x8xf32> to vector<8xf32>
    %370 = vector.shape_cast %369 : vector<8xf32> to vector<8x1xf32>
    %371 = vector.broadcast %370 : vector<8x1xf32> to vector<8x8xf32>
    %372 = arith.subf %368, %371 : vector<8x8xf32>
    %373 = math.exp %372 : vector<8x8xf32>
    %cst_149 = arith.constant dense<0.000000e+00> : vector<8xf32>
    %374 = vector.multi_reduction <add>, %373, %cst_149 [1] : vector<8x8xf32> to vector<8xf32>
    %375 = vector.shape_cast %374 : vector<8xf32> to vector<8x1xf32>
    %376 = tpu.reciprocal %375 {approx = true} : vector<8x1xf32> -> vector<8x1xf32>
    %377 = vector.broadcast %376 : vector<8x1xf32> to vector<8x8xf32>
    %378 = arith.mulf %373, %377 : vector<8x8xf32>
    %cst_150 = arith.constant dense<0.000000e+00> : vector<8x16xf32>
    %379 = tpu.matmul %378, %363, %cst_150 {dimension_numbers = #tpu.dot_dimension_numbers<[1], [0], [0], [1], [0, 0, 1, 1], [], []>} : vector<8x8xf32>, vector<8x16xf32>, vector<8x16xf32> -> vector<8x16xf32>
    %c0_151 = arith.constant 0 : index
    %c48_152 = arith.constant 48 : index
    %380 = vector.load %arg19[%c0_151, %c48_152] : memref<16x64xf32, #tpu.memory_space<vmem>>, vector<8x16xf32>
    tpu.vector_store %arg19[%c0_151, %c48_152], %379 {strides = array<i32>} : memref<16x64xf32, #tpu.memory_space<vmem>>, vector<8x16xf32>,
    %381 = vector.extract_strided_slice %294 {offsets = [8, 0], sizes = [8, 64], strides = [1, 1]} : vector<16x64xf32> to vector<8x64xf32>
    %382 = vector.extract_strided_slice %295 {offsets = [8, 0], sizes = [8, 64], strides = [1, 1]} : vector<16x64xf32> to vector<8x64xf32>
    %383 = vector.extract_strided_slice %296 {offsets = [8, 0], sizes = [8, 64], strides = [1, 1]} : vector<16x64xf32> to vector<8x64xf32>
    %384 = vector.extract_strided_slice %23 {offsets = [1, 0], sizes = [1, 8], strides = [1, 1]} : vector<2x8xf32> to vector<1x8xf32>
    %385 = vector.extract_strided_slice %381 {offsets = [0, 0], sizes = [8, 16], strides = [1, 1]} : vector<8x64xf32> to vector<8x16xf32>
    %386 = vector.extract_strided_slice %382 {offsets = [0, 0], sizes = [8, 16], strides = [1, 1]} : vector<8x64xf32> to vector<8x16xf32>
    %387 = vector.extract_strided_slice %383 {offsets = [0, 0], sizes = [8, 16], strides = [1, 1]} : vector<8x64xf32> to vector<8x16xf32>
    %cst_153 = arith.constant dense<0.000000e+00> : vector<8x8xf32>
    %388 = tpu.matmul %385, %386, %cst_153 {dimension_numbers = #tpu.dot_dimension_numbers<[1], [1], [0], [0], [0, 0, 1, 0], [], []>} : vector<8x16xf32>, vector<8x16xf32>, vector<8x8xf32> -> vector<8x8xf32>
    %cst_154 = arith.constant 2.500000e-01 : f32
    %389 = vector.broadcast %cst_154 : f32 to vector<8x8xf32>
    %390 = arith.mulf %388, %389 : vector<8x8xf32>
    %391 = vector.broadcast %384 : vector<1x8xf32> to vector<8x8xf32>
    %392 = arith.addf %390, %391 : vector<8x8xf32>
    %cst_155 = arith.constant dense<0xFF800000> : vector<8xf32>
    %393 = vector.multi_reduction <maximumf>, %392, %cst_155 [1] : vector<8x8xf32> to vector<8xf32>
    %394 = vector.shape_cast %393 : vector<8xf32> to vector<8x1xf32>
    %395 = vector.broadcast %394 : vector<8x1xf32> to vector<8x8xf32>
    %396 = arith.subf %392, %395 : vector<8x8xf32>
    %397 = math.exp %396 : vector<8x8xf32>
    %cst_156 = arith.constant dense<0.000000e+00> : vector<8xf32>
    %398 = vector.multi_reduction <add>, %397, %cst_156 [1] : vector<8x8xf32> to vector<8xf32>
    %399 = vector.shape_cast %398 : vector<8xf32> to vector<8x1xf32>
    %400 = tpu.reciprocal %399 {approx = true} : vector<8x1xf32> -> vector<8x1xf32>
    %401 = vector.broadcast %400 : vector<8x1xf32> to vector<8x8xf32>
    %402 = arith.mulf %397, %401 : vector<8x8xf32>
    %cst_157 = arith.constant dense<0.000000e+00> : vector<8x16xf32>
    %403 = tpu.matmul %402, %387, %cst_157 {dimension_numbers = #tpu.dot_dimension_numbers<[1], [0], [0], [1], [0, 0, 1, 1], [], []>} : vector<8x8xf32>, vector<8x16xf32>, vector<8x16xf32> -> vector<8x16xf32>
    %c8_158 = arith.constant 8 : index
    %c0_159 = arith.constant 0 : index
    %404 = vector.load %arg19[%c8_158, %c0_159] : memref<16x64xf32, #tpu.memory_space<vmem>>, vector<8x16xf32>
    tpu.vector_store %arg19[%c8_158, %c0_159], %403 {strides = array<i32>} : memref<16x64xf32, #tpu.memory_space<vmem>>, vector<8x16xf32>,
    %405 = vector.extract_strided_slice %381 {offsets = [0, 16], sizes = [8, 16], strides = [1, 1]} : vector<8x64xf32> to vector<8x16xf32>
    %406 = vector.extract_strided_slice %382 {offsets = [0, 16], sizes = [8, 16], strides = [1, 1]} : vector<8x64xf32> to vector<8x16xf32>
    %407 = vector.extract_strided_slice %383 {offsets = [0, 16], sizes = [8, 16], strides = [1, 1]} : vector<8x64xf32> to vector<8x16xf32>
    %cst_160 = arith.constant dense<0.000000e+00> : vector<8x8xf32>
    %408 = tpu.matmul %405, %406, %cst_160 {dimension_numbers = #tpu.dot_dimension_numbers<[1], [1], [0], [0], [0, 0, 1, 0], [], []>} : vector<8x16xf32>, vector<8x16xf32>, vector<8x8xf32> -> vector<8x8xf32>
    %cst_161 = arith.constant 2.500000e-01 : f32
    %409 = vector.broadcast %cst_161 : f32 to vector<8x8xf32>
    %410 = arith.mulf %408, %409 : vector<8x8xf32>
    %411 = vector.broadcast %384 : vector<1x8xf32> to vector<8x8xf32>
    %412 = arith.addf %410, %411 : vector<8x8xf32>
    %cst_162 = arith.constant dense<0xFF800000> : vector<8xf32>
    %413 = vector.multi_reduction <maximumf>, %412, %cst_162 [1] : vector<8x8xf32> to vector<8xf32>
    %414 = vector.shape_cast %413 : vector<8xf32> to vector<8x1xf32>
    %415 = vector.broadcast %414 : vector<8x1xf32> to vector<8x8xf32>
    %416 = arith.subf %412, %415 : vector<8x8xf32>
    %417 = math.exp %416 : vector<8x8xf32>
    %cst_163 = arith.constant dense<0.000000e+00> : vector<8xf32>
    %418 = vector.multi_reduction <add>, %417, %cst_163 [1] : vector<8x8xf32> to vector<8xf32>
    %419 = vector.shape_cast %418 : vector<8xf32> to vector<8x1xf32>
    %420 = tpu.reciprocal %419 {approx = true} : vector<8x1xf32> -> vector<8x1xf32>
    %421 = vector.broadcast %420 : vector<8x1xf32> to vector<8x8xf32>
    %422 = arith.mulf %417, %421 : vector<8x8xf32>
    %cst_164 = arith.constant dense<0.000000e+00> : vector<8x16xf32>
    %423 = tpu.matmul %422, %407, %cst_164 {dimension_numbers = #tpu.dot_dimension_numbers<[1], [0], [0], [1], [0, 0, 1, 1], [], []>} : vector<8x8xf32>, vector<8x16xf32>, vector<8x16xf32> -> vector<8x16xf32>
    %c8_165 = arith.constant 8 : index
    %c16_166 = arith.constant 16 : index
    %424 = vector.load %arg19[%c8_165, %c16_166] : memref<16x64xf32, #tpu.memory_space<vmem>>, vector<8x16xf32>
    tpu.vector_store %arg19[%c8_165, %c16_166], %423 {strides = array<i32>} : memref<16x64xf32, #tpu.memory_space<vmem>>, vector<8x16xf32>,
    %425 = vector.extract_strided_slice %381 {offsets = [0, 32], sizes = [8, 16], strides = [1, 1]} : vector<8x64xf32> to vector<8x16xf32>
    %426 = vector.extract_strided_slice %382 {offsets = [0, 32], sizes = [8, 16], strides = [1, 1]} : vector<8x64xf32> to vector<8x16xf32>
    %427 = vector.extract_strided_slice %383 {offsets = [0, 32], sizes = [8, 16], strides = [1, 1]} : vector<8x64xf32> to vector<8x16xf32>
    %cst_167 = arith.constant dense<0.000000e+00> : vector<8x8xf32>
    %428 = tpu.matmul %425, %426, %cst_167 {dimension_numbers = #tpu.dot_dimension_numbers<[1], [1], [0], [0], [0, 0, 1, 0], [], []>} : vector<8x16xf32>, vector<8x16xf32>, vector<8x8xf32> -> vector<8x8xf32>
    %cst_168 = arith.constant 2.500000e-01 : f32
    %429 = vector.broadcast %cst_168 : f32 to vector<8x8xf32>
    %430 = arith.mulf %428, %429 : vector<8x8xf32>
    %431 = vector.broadcast %384 : vector<1x8xf32> to vector<8x8xf32>
    %432 = arith.addf %430, %431 : vector<8x8xf32>
    %cst_169 = arith.constant dense<0xFF800000> : vector<8xf32>
    %433 = vector.multi_reduction <maximumf>, %432, %cst_169 [1] : vector<8x8xf32> to vector<8xf32>
    %434 = vector.shape_cast %433 : vector<8xf32> to vector<8x1xf32>
    %435 = vector.broadcast %434 : vector<8x1xf32> to vector<8x8xf32>
    %436 = arith.subf %432, %435 : vector<8x8xf32>
    %437 = math.exp %436 : vector<8x8xf32>
    %cst_170 = arith.constant dense<0.000000e+00> : vector<8xf32>
    %438 = vector.multi_reduction <add>, %437, %cst_170 [1] : vector<8x8xf32> to vector<8xf32>
    %439 = vector.shape_cast %438 : vector<8xf32> to vector<8x1xf32>
    %440 = tpu.reciprocal %439 {approx = true} : vector<8x1xf32> -> vector<8x1xf32>
    %441 = vector.broadcast %440 : vector<8x1xf32> to vector<8x8xf32>
    %442 = arith.mulf %437, %441 : vector<8x8xf32>
    %cst_171 = arith.constant dense<0.000000e+00> : vector<8x16xf32>
    %443 = tpu.matmul %442, %427, %cst_171 {dimension_numbers = #tpu.dot_dimension_numbers<[1], [0], [0], [1], [0, 0, 1, 1], [], []>} : vector<8x8xf32>, vector<8x16xf32>, vector<8x16xf32> -> vector<8x16xf32>
    %c8_172 = arith.constant 8 : index
    %c32_173 = arith.constant 32 : index
    %444 = vector.load %arg19[%c8_172, %c32_173] : memref<16x64xf32, #tpu.memory_space<vmem>>, vector<8x16xf32>
    tpu.vector_store %arg19[%c8_172, %c32_173], %443 {strides = array<i32>} : memref<16x64xf32, #tpu.memory_space<vmem>>, vector<8x16xf32>,
    %445 = vector.extract_strided_slice %381 {offsets = [0, 48], sizes = [8, 16], strides = [1, 1]} : vector<8x64xf32> to vector<8x16xf32>
    %446 = vector.extract_strided_slice %382 {offsets = [0, 48], sizes = [8, 16], strides = [1, 1]} : vector<8x64xf32> to vector<8x16xf32>
    %447 = vector.extract_strided_slice %383 {offsets = [0, 48], sizes = [8, 16], strides = [1, 1]} : vector<8x64xf32> to vector<8x16xf32>
    %cst_174 = arith.constant dense<0.000000e+00> : vector<8x8xf32>
    %448 = tpu.matmul %445, %446, %cst_174 {dimension_numbers = #tpu.dot_dimension_numbers<[1], [1], [0], [0], [0, 0, 1, 0], [], []>} : vector<8x16xf32>, vector<8x16xf32>, vector<8x8xf32> -> vector<8x8xf32>
    %cst_175 = arith.constant 2.500000e-01 : f32
    %449 = vector.broadcast %cst_175 : f32 to vector<8x8xf32>
    %450 = arith.mulf %448, %449 : vector<8x8xf32>
    %451 = vector.broadcast %384 : vector<1x8xf32> to vector<8x8xf32>
    %452 = arith.addf %450, %451 : vector<8x8xf32>
    %cst_176 = arith.constant dense<0xFF800000> : vector<8xf32>
    %453 = vector.multi_reduction <maximumf>, %452, %cst_176 [1] : vector<8x8xf32> to vector<8xf32>
    %454 = vector.shape_cast %453 : vector<8xf32> to vector<8x1xf32>
    %455 = vector.broadcast %454 : vector<8x1xf32> to vector<8x8xf32>
    %456 = arith.subf %452, %455 : vector<8x8xf32>
    %457 = math.exp %456 : vector<8x8xf32>
    %cst_177 = arith.constant dense<0.000000e+00> : vector<8xf32>
    %458 = vector.multi_reduction <add>, %457, %cst_177 [1] : vector<8x8xf32> to vector<8xf32>
    %459 = vector.shape_cast %458 : vector<8xf32> to vector<8x1xf32>
    %460 = tpu.reciprocal %459 {approx = true} : vector<8x1xf32> -> vector<8x1xf32>
    %461 = vector.broadcast %460 : vector<8x1xf32> to vector<8x8xf32>
    %462 = arith.mulf %457, %461 : vector<8x8xf32>
    %cst_178 = arith.constant dense<0.000000e+00> : vector<8x16xf32>
    %463 = tpu.matmul %462, %447, %cst_178 {dimension_numbers = #tpu.dot_dimension_numbers<[1], [0], [0], [1], [0, 0, 1, 1], [], []>} : vector<8x8xf32>, vector<8x16xf32>, vector<8x16xf32> -> vector<8x16xf32>
    %c8_179 = arith.constant 8 : index
    %c48_180 = arith.constant 48 : index
    %464 = vector.load %arg19[%c8_179, %c48_180] : memref<16x64xf32, #tpu.memory_space<vmem>>, vector<8x16xf32>
    tpu.vector_store %arg19[%c8_179, %c48_180], %463 {strides = array<i32>} : memref<16x64xf32, #tpu.memory_space<vmem>>, vector<8x16xf32>,
    %c0_181 = arith.constant 0 : index
    %c0_182 = arith.constant 0 : index
    %465 = vector.load %arg19[%c0_181, %c0_182] : memref<16x64xf32, #tpu.memory_space<vmem>>, vector<16x64xf32>
    %c1_183 = arith.constant 1 : index
    %c0_184 = arith.constant 0 : index
    %c0_185 = arith.constant 0 : index
    %466 = vector.load %arg6[%c1_183, %c0_184, %c0_185] : memref<2x64x64xf32, #tpu.memory_space<vmem>>, vector<1x64x64xf32>
    %467 = vector.shape_cast %466 : vector<1x64x64xf32> to vector<64x64xf32>
    %cst_186 = arith.constant dense<0.000000e+00> : vector<16x64xf32>
    %468 = tpu.matmul %465, %467, %cst_186 {dimension_numbers = #tpu.dot_dimension_numbers<[1], [0], [0], [1], [0, 0, 1, 1], [], []>} : vector<16x64xf32>, vector<64x64xf32>, vector<16x64xf32> -> vector<16x64xf32>
    %c1_187 = arith.constant 1 : index
    %c0_188 = arith.constant 0 : index
    %c0_189 = arith.constant 0 : index
    %469 = vector.load %arg7[%c1_187, %c0_188, %c0_189] : memref<2x1x64xf32, #tpu.memory_space<vmem>>, vector<1x1x64xf32>
    %470 = vector.shape_cast %469 : vector<1x1x64xf32> to vector<1x64xf32>
    %471 = vector.broadcast %470 : vector<1x64xf32> to vector<16x64xf32>
    %472 = arith.addf %468, %471 : vector<16x64xf32>
    %473 = arith.addf %286, %472 : vector<16x64xf32>
    %c1_190 = arith.constant 1 : index
    %c0_191 = arith.constant 0 : index
    %c0_192 = arith.constant 0 : index
    %474 = vector.load %arg8[%c1_190, %c0_191, %c0_192] : memref<2x1x64xf32, #tpu.memory_space<vmem>>, vector<1x1x64xf32>
    %475 = vector.shape_cast %474 : vector<1x1x64xf32> to vector<1x64xf32>
    %c1_193 = arith.constant 1 : index
    %c0_194 = arith.constant 0 : index
    %c0_195 = arith.constant 0 : index
    %476 = vector.load %arg9[%c1_193, %c0_194, %c0_195] : memref<2x1x64xf32, #tpu.memory_space<vmem>>, vector<1x1x64xf32>
    %477 = vector.shape_cast %476 : vector<1x1x64xf32> to vector<1x64xf32>
    %cst_196 = arith.constant dense<0.000000e+00> : vector<16xf32>
    %478 = vector.multi_reduction <add>, %473, %cst_196 [1] : vector<16x64xf32> to vector<16xf32>
    %479 = vector.shape_cast %478 : vector<16xf32> to vector<16x1xf32>
    %cst_197 = arith.constant 6.400000e+01 : f32
    %480 = vector.broadcast %cst_197 : f32 to vector<16x1xf32>
    %481 = arith.divf %479, %480 : vector<16x1xf32>
    %482 = vector.broadcast %481 : vector<16x1xf32> to vector<16x64xf32>
    %483 = arith.subf %473, %482 : vector<16x64xf32>
    %484 = arith.mulf %483, %483 : vector<16x64xf32>
    %cst_198 = arith.constant dense<0.000000e+00> : vector<16xf32>
    %485 = vector.multi_reduction <add>, %484, %cst_198 [1] : vector<16x64xf32> to vector<16xf32>
    %486 = vector.shape_cast %485 : vector<16xf32> to vector<16x1xf32>
    %cst_199 = arith.constant 6.400000e+01 : f32
    %487 = vector.broadcast %cst_199 : f32 to vector<16x1xf32>
    %488 = arith.divf %486, %487 : vector<16x1xf32>
    %cst_200 = arith.constant 1.000000e-07 : f32
    %489 = vector.broadcast %cst_200 : f32 to vector<16x1xf32>
    %490 = arith.addf %488, %489 : vector<16x1xf32>
    %491 = math.rsqrt %490 : vector<16x1xf32>
    %492 = vector.broadcast %491 : vector<16x1xf32> to vector<16x64xf32>
    %493 = arith.mulf %483, %492 : vector<16x64xf32>
    %494 = vector.broadcast %475 : vector<1x64xf32> to vector<16x64xf32>
    %495 = arith.mulf %493, %494 : vector<16x64xf32>
    %496 = vector.broadcast %477 : vector<1x64xf32> to vector<16x64xf32>
    %497 = arith.addf %495, %496 : vector<16x64xf32>
    %c1_201 = arith.constant 1 : index
    %c0_202 = arith.constant 0 : index
    %c0_203 = arith.constant 0 : index
    %498 = vector.load %arg10[%c1_201, %c0_202, %c0_203] : memref<2x64x128xf32, #tpu.memory_space<vmem>>, vector<1x64x128xf32>
    %499 = vector.shape_cast %498 : vector<1x64x128xf32> to vector<64x128xf32>
    %cst_204 = arith.constant dense<0.000000e+00> : vector<16x128xf32>
    %500 = tpu.matmul %497, %499, %cst_204 {dimension_numbers = #tpu.dot_dimension_numbers<[1], [0], [0], [1], [0, 0, 1, 1], [], []>} : vector<16x64xf32>, vector<64x128xf32>, vector<16x128xf32> -> vector<16x128xf32>
    %c1_205 = arith.constant 1 : index
    %c0_206 = arith.constant 0 : index
    %c0_207 = arith.constant 0 : index
    %501 = vector.load %arg11[%c1_205, %c0_206, %c0_207] : memref<2x1x128xf32, #tpu.memory_space<vmem>>, vector<1x1x128xf32>
    %502 = vector.shape_cast %501 : vector<1x1x128xf32> to vector<1x128xf32>
    %503 = vector.broadcast %502 : vector<1x128xf32> to vector<16x128xf32>
    %504 = arith.addf %500, %503 : vector<16x128xf32>
    %cst_208 = arith.constant 5.000000e-01 : f32
    %505 = vector.broadcast %cst_208 : f32 to vector<16x128xf32>
    %506 = arith.mulf %505, %504 : vector<16x128xf32>
    %cst_209 = arith.constant 4.471500e-02 : f32
    %507 = vector.broadcast %cst_209 : f32 to vector<16x128xf32>
    %508 = arith.mulf %507, %504 : vector<16x128xf32>
    %509 = arith.mulf %508, %504 : vector<16x128xf32>
    %510 = arith.mulf %509, %504 : vector<16x128xf32>
    %511 = arith.addf %504, %510 : vector<16x128xf32>
    %cst_210 = arith.constant 0.797884583 : f32
    %512 = vector.broadcast %cst_210 : f32 to vector<16x128xf32>
    %513 = arith.mulf %512, %511 : vector<16x128xf32>
    %514 = math.tanh %513 : vector<16x128xf32>
    %cst_211 = arith.constant 1.000000e+00 : f32
    %515 = vector.broadcast %cst_211 : f32 to vector<16x128xf32>
    %516 = arith.addf %515, %514 : vector<16x128xf32>
    %517 = arith.mulf %506, %516 : vector<16x128xf32>
    %c1_212 = arith.constant 1 : index
    %c0_213 = arith.constant 0 : index
    %c0_214 = arith.constant 0 : index
    %518 = vector.load %arg12[%c1_212, %c0_213, %c0_214] : memref<2x128x64xf32, #tpu.memory_space<vmem>>, vector<1x128x64xf32>
    %519 = vector.shape_cast %518 : vector<1x128x64xf32> to vector<128x64xf32>
    %cst_215 = arith.constant dense<0.000000e+00> : vector<16x64xf32>
    %520 = tpu.matmul %517, %519, %cst_215 {dimension_numbers = #tpu.dot_dimension_numbers<[1], [0], [0], [1], [0, 0, 1, 1], [], []>} : vector<16x128xf32>, vector<128x64xf32>, vector<16x64xf32> -> vector<16x64xf32>
    %c1_216 = arith.constant 1 : index
    %c0_217 = arith.constant 0 : index
    %c0_218 = arith.constant 0 : index
    %521 = vector.load %arg13[%c1_216, %c0_217, %c0_218] : memref<2x1x64xf32, #tpu.memory_space<vmem>>, vector<1x1x64xf32>
    %522 = vector.shape_cast %521 : vector<1x1x64xf32> to vector<1x64xf32>
    %523 = vector.broadcast %522 : vector<1x64xf32> to vector<16x64xf32>
    %524 = arith.addf %520, %523 : vector<16x64xf32>
    %525 = arith.addf %497, %524 : vector<16x64xf32>
    %c1_219 = arith.constant 1 : index
    %c0_220 = arith.constant 0 : index
    %c0_221 = arith.constant 0 : index
    %526 = vector.load %arg14[%c1_219, %c0_220, %c0_221] : memref<2x1x64xf32, #tpu.memory_space<vmem>>, vector<1x1x64xf32>
    %527 = vector.shape_cast %526 : vector<1x1x64xf32> to vector<1x64xf32>
    %c1_222 = arith.constant 1 : index
    %c0_223 = arith.constant 0 : index
    %c0_224 = arith.constant 0 : index
    %528 = vector.load %arg15[%c1_222, %c0_223, %c0_224] : memref<2x1x64xf32, #tpu.memory_space<vmem>>, vector<1x1x64xf32>
    %529 = vector.shape_cast %528 : vector<1x1x64xf32> to vector<1x64xf32>
    %cst_225 = arith.constant dense<0.000000e+00> : vector<16xf32>
    %530 = vector.multi_reduction <add>, %525, %cst_225 [1] : vector<16x64xf32> to vector<16xf32>
    %531 = vector.shape_cast %530 : vector<16xf32> to vector<16x1xf32>
    %cst_226 = arith.constant 6.400000e+01 : f32
    %532 = vector.broadcast %cst_226 : f32 to vector<16x1xf32>
    %533 = arith.divf %531, %532 : vector<16x1xf32>
    %534 = vector.broadcast %533 : vector<16x1xf32> to vector<16x64xf32>
    %535 = arith.subf %525, %534 : vector<16x64xf32>
    %536 = arith.mulf %535, %535 : vector<16x64xf32>
    %cst_227 = arith.constant dense<0.000000e+00> : vector<16xf32>
    %537 = vector.multi_reduction <add>, %536, %cst_227 [1] : vector<16x64xf32> to vector<16xf32>
    %538 = vector.shape_cast %537 : vector<16xf32> to vector<16x1xf32>
    %cst_228 = arith.constant 6.400000e+01 : f32
    %539 = vector.broadcast %cst_228 : f32 to vector<16x1xf32>
    %540 = arith.divf %538, %539 : vector<16x1xf32>
    %cst_229 = arith.constant 1.000000e-07 : f32
    %541 = vector.broadcast %cst_229 : f32 to vector<16x1xf32>
    %542 = arith.addf %540, %541 : vector<16x1xf32>
    %543 = math.rsqrt %542 : vector<16x1xf32>
    %544 = vector.broadcast %543 : vector<16x1xf32> to vector<16x64xf32>
    %545 = arith.mulf %535, %544 : vector<16x64xf32>
    %546 = vector.broadcast %527 : vector<1x64xf32> to vector<16x64xf32>
    %547 = arith.mulf %545, %546 : vector<16x64xf32>
    %548 = vector.broadcast %529 : vector<1x64xf32> to vector<16x64xf32>
    %549 = arith.addf %547, %548 : vector<16x64xf32>
    %550 = vector.extract_strided_slice %549 {offsets = [0, 0], sizes = [1, 64], strides = [1, 1]} : vector<16x64xf32> to vector<1x64xf32>
    %c0_230 = arith.constant 0 : index
    %c0_231 = arith.constant 0 : index
    %551 = vector.load %arg16[%c0_230, %c0_231] : memref<64x128xf32, #tpu.memory_space<vmem>>, vector<64x128xf32>
    %cst_232 = arith.constant dense<0.000000e+00> : vector<1x128xf32>
    %552 = tpu.matmul %550, %551, %cst_232 {dimension_numbers = #tpu.dot_dimension_numbers<[1], [0], [0], [1], [0, 0, 1, 1], [], []>} : vector<1x64xf32>, vector<64x128xf32>, vector<1x128xf32> -> vector<1x128xf32>
    %c0_233 = arith.constant 0 : index
    %c0_234 = arith.constant 0 : index
    %553 = vector.load %arg17[%c0_233, %c0_234] : memref<1x128xf32, #tpu.memory_space<vmem>>, vector<1x128xf32>
    %554 = arith.addf %552, %553 : vector<1x128xf32>
    %c0_235 = arith.constant 0 : index
    %c0_236 = arith.constant 0 : index
    %555 = vector.load %arg18[%c0_235, %c0_236] : memref<2x128xf32, #tpu.memory_space<vmem>>, vector<1x128xf32>
    tpu.vector_store %arg18[%c0_235, %c0_236], %554 {strides = array<i32>} : memref<2x128xf32, #tpu.memory_space<vmem>>, vector<1x128xf32>,
    %556 = vector.extract_strided_slice %549 {offsets = [8, 0], sizes = [1, 64], strides = [1, 1]} : vector<16x64xf32> to vector<1x64xf32>
    %c0_237 = arith.constant 0 : index
    %c0_238 = arith.constant 0 : index
    %557 = vector.load %arg16[%c0_237, %c0_238] : memref<64x128xf32, #tpu.memory_space<vmem>>, vector<64x128xf32>
    %cst_239 = arith.constant dense<0.000000e+00> : vector<1x128xf32>
    %558 = tpu.matmul %556, %557, %cst_239 {dimension_numbers = #tpu.dot_dimension_numbers<[1], [0], [0], [1], [0, 0, 1, 1], [], []>} : vector<1x64xf32>, vector<64x128xf32>, vector<1x128xf32> -> vector<1x128xf32>
    %c0_240 = arith.constant 0 : index
    %c0_241 = arith.constant 0 : index
    %559 = vector.load %arg17[%c0_240, %c0_241] : memref<1x128xf32, #tpu.memory_space<vmem>>, vector<1x128xf32>
    %560 = arith.addf %558, %559 : vector<1x128xf32>
    %c1_242 = arith.constant 1 : index
    %c0_243 = arith.constant 0 : index
    %561 = vector.load %arg18[%c1_242, %c0_243] : memref<2x128xf32, #tpu.memory_space<vmem>>, vector<1x128xf32>
    tpu.vector_store %arg18[%c1_242, %c0_243], %560 {strides = array<i32>} : memref<2x128xf32, #tpu.memory_space<vmem>>, vector<1x128xf32>,
    return
  }
}

</mosaic_0001>

<bundles_post_ra>
// kernel: deberta_classifier_forward.1
= control target key start
LH: loop header
LB: loop body
LE: loop exit
PB: predicated region body
PF: predicated region fallthrough
CT: control target
= control target key end

     0   :  { %s5916_s0 = inlined_call_operand.vmem [shape: f32[16,64], index: 0, kind: input, shape index: {}]   ;;  %s5917_s1 = inlined_call_operand.vmem [shape: f32[2,8], index: 1, kind: input, shape index: {}]   ;;  %s5918_s2 = inlined_call_operand.vmem [shape: f32[1,64], index: 2, kind: input, shape index: {}]   ;;  %s5919_s3 = inlined_call_operand.vmem [shape: f32[1,64], index: 3, kind: input, shape index: {}]   ;;  %s5920_s4 = inlined_call_operand.vmem [shape: f32[2,64,192], index: 4, kind: input, shape index: {}]   ;;  %s5921_s5 = inlined_call_operand.vmem [shape: f32[2,1,192], index: 5, kind: input, shape index: {}]   ;;  %s5922_s6 = inlined_call_operand.vmem [shape: f32[2,64,64], index: 6, kind: input, shape index: {}]   ;;  %s5923_s7 = inlined_call_operand.vmem [shape: f32[2,1,64], index: 7, kind: input, shape index: {}]   ;;  %s5924_s8 = inlined_call_operand.vmem [shape: f32[2,1,64], index: 8, kind: input, shape index: {}]   ;;  %s5925_s9 = inlined_call_operand.vmem [shape: f32[2,1,64], index: 9, kind: input, shape index: {}]   ;;  %s5926_s10 = inlined_call_operand.vmem [shape: f32[2,64,128], index: 10, kind: input, shape index: {}]   ;;  %s5927_s11 = inlined_call_operand.vmem [shape: f32[2,1,128], index: 11, kind: input, shape index: {}]   ;;  %s5928_s12 = inlined_call_operand.vmem [shape: f32[2,128,64], index: 12, kind: input, shape index: {}]   ;;  %s5929_s13 = inlined_call_operand.vmem [shape: f32[2,1,64], index: 13, kind: input, shape index: {}]   ;;  %s5930_s14 = inlined_call_operand.vmem [shape: f32[2,1,64], index: 14, kind: input, shape index: {}]   ;;  %s5931_s15 = inlined_call_operand.vmem [shape: f32[2,1,64], index: 15, kind: input, shape index: {}]   ;;  %s5932_s16 = inlined_call_operand.vmem [shape: f32[64,128], index: 16, kind: input, shape index: {}]   ;;  %s5933_s17 = inlined_call_operand.vmem [shape: f32[1,128], index: 17, kind: input, shape index: {}]   ;;  %s5934_s18 = inlined_call_operand.hbm [shape: f32[2,128], index: 18, kind: output, shape index: {}]  }
   0x1   :  { %5938 = sst [smem:[#allocation6_spill]] %s5916_s0 }
   0x2   :  { %5939 = sst [smem:[#allocation7_spill]] %s5917_s1 }
   0x3   :  { %5940 = sst [smem:[#allocation8_spill]] %s5918_s2 }
   0x4   :  { %s5941_s29 = sld [smem:[#allocation6_spill]]  ;;  %vm64_vm0 = vcmask 523264  }
   0xa   :  { %v60_v0 = vld [vmem:[%s5941_s29] sm:$0xff] }
   0xb   :  { %23 = vsyncpa [#allocation4], 0  ;;  %v65_v1 = vsel %vm64_vm0, %v60_v0, 0.0  ;;  %v110_v7 = vld [vmem:[%s5920_s4 + $0x8] sm:$0xff]  ;;  %v112_v8 = vld [vmem:[%s5920_s4 + $0x18] sm:$0xff]  ;;  %v5011_v20 = vmov 0.0   ;;  %v127_v41 = vlaneseq }
   0xc   :  { %66 = vadd.xlane.f32.xlu0 %v65_v1  ;;  %v4700_v9 = vpack.c.bf16 %v112_v8, %v110_v7  ;;  %v109_v10 = vld [vmem:[%s5920_s4] sm:$0xff]  ;;  %v111_v11 = vld [vmem:[%s5920_s4 + $0x10] sm:$0xff]  ;;  %v114_v13 = vld [vmem:[%s5920_s4 + $0x28] sm:$0xff]  ;;  %207 = vmatprep.mubr.f32.mxu0 %v5011_v20  ;;  %s5942_s22 = sld [smem:[#allocation8_spill]]  ;;  %vm5012_vm1 = vmmov 0   ;;  %s5936_s25 = smov 48  }
   0xd   :  { %v4702_v12 = vpack.c.bf16 %v111_v11, %v109_v10  ;;  %v116_v14 = vld [vmem:[%s5920_s4 + $0x38] sm:$0xff]  ;;  %v113_v15 = vld [vmem:[%s5920_s4 + $0x20] sm:$0xff]  ;;  %v115_v17 = vld [vmem:[%s5920_s4 + $0x30] sm:$0xff]  ;;  %4356 = vmatprep.subr.mxu1 %v5011_v20  ;;  %v128_v42 = vshrl.u32 %v127_v41, 7  ;;  %4358 = vmatprep.mubr.msk.f32.mxu1 %vm5012_vm1, %v5011_v20  ;;  %s5014_s26 = smov 64   ;;  %vm223_vm2 = vcmask 130048  }
   0xe   :  { %4701 = vmatprep.subr.bf16.mxu0 %v4700_v9  ;;  %v4704_v16 = vpack.c.bf16 %v116_v14, %v114_v13  ;;  %v118_v18 = vld [vmem:[%s5920_s4 + $0x48] sm:$0xff]  ;;  %v120_v19 = vld [vmem:[%s5920_s4 + $0x58] sm:$0xff]  ;;  %v4706_v21 = vpack.c.bf16 %v115_v17, %v113_v15  ;;  %v117_v23 = vld [vmem:[%s5920_s4 + $0x40] sm:$0xff]  ;;  %s5943_s30 = sld [smem:[#allocation7_spill]]  ;;  %vm304_vm3 = vcmask 64512   ;;  %s5015_s0 = smov 112  }
   0xf   :  { %4703 = vmatpush1.bf16.msra.mxu0 %v4702_v12  ;;  %v4708_v22 = vpack.c.bf16 %v120_v19, %v118_v18  ;;  %v119_v24 = vld [vmem:[%s5920_s4 + $0x50] sm:$0xff]  ;;  %v122_v25 = vld [vmem:[%s5920_s4 + $0x68] sm:$0xff]  ;;  %v124_v26 = vld [vmem:[%s5920_s4 + $0x78] sm:$0xff]  ;;  %v5192_v43 = vsub.s32 0, %v128_v42  ;;  %v5207_v49 = vsub.s32 1, %v128_v42  ;;  %s5016_s20 = smov 32  }
  0x10   :  { %4705 = vmatprep.subr.bf16.mxu0 %v4704_v16  ;;  %v4710_v27 = vpack.c.bf16 %v119_v24, %v117_v23  ;;  %v4712_v28 = vpack.c.bf16 %v124_v26, %v122_v25  ;;  %v121_v29 = vld [vmem:[%s5920_s4 + $0x60] sm:$0xff]  ;;  %v123_v30 = vld [vmem:[%s5920_s4 + $0x70] sm:$0xff]  ;;  %v61_v1 = vld [vmem:[%s5941_s29 + $0x8] sm:$0xff]  ;;  %s5017_s29 = smov 96   ;;  %s5018_s21 = smov 16   ;;  %vm562_vm4 = vcmask 261248  }
  0x11   :  { %v4714_v31 = vpack.c.bf16 %v123_v30, %v121_v29  ;;  %v5181_v38 = vld [vmem:[%s5919_s3] ss:$0 sm:$0xff]  ;;  %vm735_vm5 = vcmask 392448   ;;  %vm908_vm6 = vcmask 523648  }
  0x12   :  { %v5176_v36 = vld [vmem:[%s5942_s22] ss:$0 sm:$0xff]  ;;  %s5019_s22 = smov 80  }
  0x13   :  { %4707 = vmatpush1.bf16.msra.mxu0 %v4706_v21  ;;  %v125_v44 = vld [vmem:[%s5921_s5] sm:$0x3] }
  0x14   :  { %4709 = vmatprep.subr.bf16.mxu0 %v4708_v22  ;;  %v5198_v45 = vrot.slane %v125_v44, %v5192_v43  ;;  %v5210_v50 = vrot.slane %v125_v44, %v5207_v49  ;;  %v5226_v53 = vld [vmem:[%s5943_s30] sm:$0x3] }
  0x15   :  { %v5230_v54 = vrot.slane %v5226_v53, %v5192_v43 }
  0x17   :  { %4711 = vmatpush1.bf16.msra.mxu0 %v4710_v27 }
  0x18   :  { %4713 = vmatprep.subr.bf16.mxu0 %v4712_v28 }
  0x1b   :  { %4715 = vmatpush1.bf16.msra.mxu0 %v4714_v31 }
  0x1c   :  { %4381 = vmatprep.subr.mxu0 %v5011_v20 }
  0x99   :  { %v67_v2 = vpop.xlane.xlu0 %66 }
  0x9a   :  { %v72_v3 = vmul.f32 0.015625, %v67_v2  ;;  %v68_v2 = vsel %vm64_vm0, %v61_v1, 0.0 }
  0x9c   :  { %v74_v4 = vsub.f32 %v60_v0, %v72_v3 }
  0x9e   :  { %v76_v5 = vmul.f32 %v74_v4, %v74_v4 }
  0xa0   :  { %v78_v6 = vsel %vm64_vm0, %v76_v5, 0.0 }
  0xa1   :  { %79 = vadd.xlane.f32.xlu0 %v78_v6 }
 0x12e   :  { %v80_v32 = vpop.xlane.xlu0 %79 }
 0x12f   :  { %v84_v33 = vmul.f32 0.015625, %v80_v32 }
 0x131   :  { %v86_v34 = vadd.f32 1e-07, %v84_v33 }
 0x133   :  { %4895 = vrsqrt.f32 %v86_v34 }
 0x13d   :  { %v4896_v35 = vpop.eup %4895 }
 0x13e   :  { %v90_v37 = vmul.f32 %v4896_v35, %v74_v4 }
 0x140   :  { %v98_v39 = vmul.f32 %v5176_v36, %v90_v37 }
 0x142   :  { %v5185_v40 = vadd.f32 %v5181_v38, %v98_v39 }
 0x144   :  { %4066 = vmatmul.mubr.msk.f32.vlgmr.msra.gmra.mrb[0].mxu0 %vm64_vm0, %v5185_v40 }
 0x145   :  { %213 = vmatprep.mubr.f32.mxu0 %v5011_v20 }
 0x217   :  { %v209_v46 = vpop.f32.mrb[0].mxu0 }
 0x218   :  { %v5201_v47 = vadd.f32 %v209_v46, %v5198_v45  ;;  %v211_v48 = vpop.f32.mrb[1].mxu0 }
 0x219   :  { %v5215_v52 = vadd.f32 %v211_v48, %v5210_v50 }
 0x21a   :  { %392 = vrot.lane.b32.xlu0 %v5201_v47, %s5936_s25  ;;  %221 = vrot.lane.b32.xlu1 %v5201_v47, %s5014_s26 }
 0x28c   :  { %v222_v51 = vpop.permute.xlu1 %221  ;;  %v393_v3 = vpop.permute.xlu0 %392 }
 0x28d   :  { %4357 = vmatpush3.xpose.msk.msra.mxu1 %vm223_vm2, %v222_v51 }
 0x28e   :  { %4361 = vmatprep.subr.mxu1 %v5011_v20 }
 0x290   :  { %4359 = vmatmul.mubr.msk.f32.vlgmr.msra.gmra.mrb[0].mxu1 %vm223_vm2, %v5201_v47 }
 0x291   :  { %4362 = vmatpush3.msra.mxu1 %v5215_v52  ;;  %4363 = vmatprep.mubr.msk.f32.mxu1 %vm5012_vm1, %v5011_v20 }
 0x292   :  { %4366 = vmatprep.subr.mxu1 %v5011_v20 }
 0x363   :  { %v294_v55 = vpop.f32.mrb[0].mxu1 }
 0x364   :  { %v298_v56 = vmul.f32 0.25, %v294_v55  ;;  %v4360_v57 = vpop.f32.mrb[1].mxu1 }
 0x366   :  { %v303_v58 = vadd.f32 %v5230_v54, %v298_v56 }
 0x368   :  { %v305_v59 = vsel %vm304_vm3, %v303_v58, -inf }
 0x369   :  { %306 = vmax.xlane.f32.xlu1 %v305_v59 }
 0x3f6   :  { %v307_v60 = vpop.xlane.xlu1 %306 }
 0x3f7   :  { %v308_v61 = vsub.f32 %v303_v58, %v307_v60 }
 0x3f9   :  { %v309_v62 = vmul.f32 1.442695, %v308_v61 }
 0x3fb   :  { %4897 = vpow2.f32 %v309_v62 }
 0x405   :  { %v4898_v63 = vpop.eup %4897 }
 0x406   :  { %v311_v0 = vsel %vm304_vm3, %v4898_v63, 0.0 }
 0x407   :  { %312 = vadd.xlane.f32.xlu0 %v311_v0 }
 0x41d   :  { %390 = vrot.lane.b32.xlu0 %v5201_v47, %s5015_s0 }
 0x43c   :  { %69 = vadd.xlane.f32.xlu0 %v68_v2 }
 0x452   :  { %566 = vrot.lane.b32.xlu0 %v5201_v47, %s5016_s20 }
 0x494   :  { %v313_v4 = vpop.xlane.xlu0 %312 }
 0x495   :  { %4899 = vrcp.f32 %v313_v4  ;;  %v5319_v4 = vrot.slane %v5226_v53, %v5207_v49 }
 0x498   :  { %v391_v7 = vpop.permute.xlu0 %390 }
 0x49f   :  { %v4900_v5 = vpop.eup %4899 }
 0x4a0   :  { %v315_v6 = vmul.f32 %v4900_v5, %v4898_v63 }
 0x4a2   :  { %4364 = vmatmul.mubr.msk.f32.vlgmr.msra.gmra.mrb[2].mxu1 %vm304_vm3, %v315_v6 }
 0x4a3   :  { %4367 = vmatpush3.xpose.msk.msra.mxu1 %vm223_vm2, %v393_v3  ;;  %4368 = vmatprep.mubr.msk.f32.mxu1 %vm5012_vm1, %v5011_v20 }
 0x4a4   :  { %4371 = vmatprep.subr.mxu1 %v5011_v20 }
 0x4a6   :  { %4369 = vmatmul.mubr.msk.f32.vlgmr.msra.gmra.mrb[4].mxu1 %vm223_vm2, %v391_v7 }
 0x4a7   :  { %4373 = vmatprep.mubr.msk.f32.mxu1 %vm5012_vm1, %v5011_v20 }
 0x4c9   :  { %v70_v8 = vpop.xlane.xlu0 %69 }
 0x4ca   :  { %v73_v9 = vmul.f32 0.015625, %v70_v8 }
 0x4cc   :  { %v75_v10 = vsub.f32 %v61_v1, %v73_v9 }
 0x4ce   :  { %v77_v11 = vmul.f32 %v75_v10, %v75_v10 }
 0x4d0   :  { %v81_v12 = vsel %vm64_vm0, %v77_v11, 0.0 }
 0x4d1   :  { %82 = vadd.xlane.f32.xlu1 %v81_v12 }
 0x55e   :  { %v83_v13 = vpop.xlane.xlu1 %82 }
 0x55f   :  { %v85_v14 = vmul.f32 0.015625, %v83_v13 }
 0x561   :  { %v87_v15 = vadd.f32 1e-07, %v85_v14 }
 0x563   :  { %4901 = vrsqrt.f32 %v87_v15 }
 0x56d   :  { %v4902_v16 = vpop.eup %4901 }
 0x56e   :  { %v91_v17 = vmul.f32 %v4902_v16, %v75_v10 }
 0x570   :  { %v99_v18 = vmul.f32 %v5176_v36, %v91_v17 }
 0x572   :  { %v5254_v19 = vadd.f32 %v5181_v38, %v99_v18 }
 0x574   :  { %4067 = vmatmul.mubr.msk.f32.gmra.mrb[2].mxu0 %vm64_vm0, %v5254_v19 }
 0x575   :  { %v385_v21 = vpop.f32.mrb[2].mxu1  ;;  %4383 = vmatprep.mubr.msk.f32.mxu0 %vm5012_vm1, %v5011_v20 }
 0x576   :  { %389 = vst.msk [vmem:[#allocation2] sm:$0xff] %vm223_vm2, %v385_v21  ;;  %v4365_v22 = vpop.f32.mrb[3].mxu1 }
 0x579   :  { %v464_v23 = vpop.f32.mrb[4].mxu1 }
 0x57a   :  { %v468_v24 = vmul.f32 0.25, %v464_v23  ;;  %v4370_v25 = vpop.f32.mrb[5].mxu1 }
 0x57c   :  { %v469_v26 = vadd.f32 %v468_v24, %v5230_v54 }
 0x57e   :  { %v470_v27 = vsel %vm304_vm3, %v469_v26, -inf }
 0x57f   :  { %471 = vmax.xlane.f32.xlu1 %v470_v27 }
 0x590   :  { %482 = vrot.lane.b32.xlu1 %v5215_v52, %s5015_s0 }
 0x594   :  { %564 = vrot.lane.b32.xlu1 %v5201_v47, %s5017_s29 }
 0x598   :  { %739 = vrot.lane.b32.xlu1 %v5201_v47, %s5018_s21 }
 0x59c   :  { %737 = vrot.lane.b32.xlu1 %v5201_v47, %s5019_s22 }
 0x60c   :  { %v472_v28 = vpop.xlane.xlu1 %471 }
 0x60d   :  { %v473_v29 = vsub.f32 %v469_v26, %v472_v28 }
 0x60f   :  { %v474_v30 = vmul.f32 1.442695, %v473_v29 }
 0x610   :  { %v483_v31 = vpop.permute.xlu1 %482 }
 0x611   :  { %4903 = vpow2.f32 %v474_v30  ;;  %4372 = vmatpush3.msra.mxu1 %v483_v31 }
 0x612   :  { %4376 = vmatprep.subr.mxu1 %v5011_v20 }
 0x614   :  { %v565_v37 = vpop.permute.xlu1 %564 }
 0x618   :  { %v740_v38 = vpop.permute.xlu1 %739 }
 0x61b   :  { %v4904_v32 = vpop.eup %4903 }
 0x61c   :  { %v476_v33 = vsel %vm304_vm3, %v4904_v32, 0.0  ;;  %v738_v39 = vpop.permute.xlu1 %737 }
 0x61d   :  { %477 = vadd.xlane.f32.xlu1 %v476_v33 }
 0x647   :  { %v215_v34 = vpop.f32.mrb[2].mxu0 }
 0x648   :  { %v216_v35 = vadd.f32 %v215_v34, %v5198_v45  ;;  %v5274_v36 = vpop.f32.mrb[3].mxu0  ;;  %v567_v45 = vpop.permute.xlu0 %566 }
 0x64a   :  { %1253 = vrot.lane.b32.xlu0 %v216_v35, %s5016_s20  ;;  %911 = vrot.lane.b32.xlu1 %v216_v35, %s5014_s26 }
 0x64e   :  { %1425 = vrot.lane.b32.xlu0 %v216_v35, %s5018_s21  ;;  %1080 = vrot.lane.b32.xlu1 %v216_v35, %s5936_s25 }
 0x652   :  { %1078 = vrot.lane.b32.xlu1 %v216_v35, %s5015_s0 }
 0x656   :  { %1251 = vrot.lane.b32.xlu1 %v216_v35, %s5017_s29 }
 0x65a   :  { %1423 = vrot.lane.b32.xlu1 %v216_v35, %s5019_s22 }
 0x6aa   :  { %v478_v41 = vpop.xlane.xlu1 %477 }
 0x6ab   :  { %4905 = vrcp.f32 %v478_v41 }
 0x6b5   :  { %v4906_v42 = vpop.eup %4905 }
 0x6b6   :  { %v480_v44 = vmul.f32 %v4906_v42, %v4904_v32  ;;  %v218_v42 = vadd.f32 %v5274_v36, %v5210_v50 }
 0x6b8   :  { %4374 = vmatmul.mubr.msk.f32.vlgmr.msra.gmra.mrb[6].mxu1 %vm304_vm3, %v480_v44 }
 0x6b9   :  { %4377 = vmatpush3.xpose.msk.msra.mxu1 %vm223_vm2, %v567_v45  ;;  %4378 = vmatprep.mubr.msk.f32.mxu1 %vm5012_vm1, %v5011_v20 }
 0x6ba   :  { %4386 = vmatprep.subr.mxu1 %v5011_v20 }
 0x6bc   :  { %4379 = vmatmul.mubr.msk.f32.vlgmr.msra.gmra.mrb[8].mxu1 %vm223_vm2, %v565_v37  ;;  %v912_v46 = vpop.permute.xlu1 %911  ;;  %v1254_v51 = vpop.permute.xlu0 %1253 }
 0x6bd   :  { %4387 = vmatpush3.xpose.msk.msra.mxu1 %vm223_vm2, %v740_v38  ;;  %4388 = vmatprep.mubr.msk.f32.mxu1 %vm5012_vm1, %v5011_v20 }
 0x6be   :  { %4396 = vmatprep.subr.mxu1 %v5011_v20 }
 0x6c0   :  { %4389 = vmatmul.mubr.msk.f32.vlgmr.msra.gmra.mrb[10].mxu1 %vm223_vm2, %v738_v39  ;;  %v1081_v47 = vpop.permute.xlu1 %1080  ;;  %v1426_v56 = vpop.permute.xlu0 %1425 }
 0x6c1   :  { %4397 = vmatpush3.xpose.msk.msra.mxu1 %vm223_vm2, %v912_v46  ;;  %4398 = vmatprep.mubr.msk.f32.mxu1 %vm5012_vm1, %v5011_v20 }
 0x6c2   :  { %4406 = vmatprep.subr.mxu1 %v5011_v20 }
 0x6c4   :  { %4399 = vmatmul.mubr.msk.f32.vlgmr.msra.gmra.mrb[12].mxu1 %vm223_vm2, %v216_v35  ;;  %v1079_v48 = vpop.permute.xlu1 %1078 }
 0x6c5   :  { %4407 = vmatpush3.xpose.msk.msra.mxu1 %vm223_vm2, %v1081_v47  ;;  %4408 = vmatprep.mubr.msk.f32.mxu1 %vm5012_vm1, %v5011_v20 }
 0x6c6   :  { %4416 = vmatprep.subr.mxu1 %v5011_v20 }
 0x6c8   :  { %4409 = vmatmul.mubr.msk.f32.vlgmr.msra.gmra.mrb[14].mxu1 %vm223_vm2, %v1079_v48  ;;  %v1252_v55 = vpop.permute.xlu1 %1251 }
 0x6c9   :  { %4417 = vmatpush3.xpose.msk.msra.mxu1 %vm223_vm2, %v1254_v51  ;;  %4418 = vmatprep.mubr.msk.f32.mxu1 %vm5012_vm1, %v5011_v20 }
 0x6ca   :  { %4426 = vmatprep.subr.mxu1 %v5011_v20 }
 0x6cc   :  { %4419 = vmatmul.mubr.msk.f32.vlgmr.msra.gmra.mrb[16].mxu1 %vm223_vm2, %v1252_v55  ;;  %v1424_v57 = vpop.permute.xlu1 %1423 }
 0x6cd   :  { %4427 = vmatpush3.xpose.msk.msra.mxu1 %vm223_vm2, %v1426_v56  ;;  %4428 = vmatprep.mubr.msk.f32.mxu1 %vm5012_vm1, %v5011_v20 }
 0x6d0   :  { %4429 = vmatmul.mubr.msk.f32.vlgmr.msra.gmra.mrb[18].mxu1 %vm223_vm2, %v1424_v57 }
 0x78b   :  { %v5313_v58 = vpop.f32.mrb[6].mxu1 }
 0x78c   :  { %v4375_v59 = vpop.f32.mrb[7].mxu1 }
 0x78f   :  { %v638_v60 = vpop.f32.mrb[8].mxu1 }
 0x790   :  { %v642_v61 = vmul.f32 0.25, %v638_v60  ;;  %v4380_v62 = vpop.f32.mrb[9].mxu1 }
 0x792   :  { %v643_v63 = vadd.f32 %v642_v61, %v5230_v54 }
 0x793   :  { %v811_v0 = vpop.f32.mrb[10].mxu1 }
 0x794   :  { %v815_v1 = vmul.f32 0.25, %v811_v0  ;;  %v4390_v2 = vpop.f32.mrb[11].mxu1  ;;  %v644_v3 = vsel %vm304_vm3, %v643_v63, -inf }
 0x795   :  { %645 = vmax.xlane.f32.xlu0 %v644_v3 }
 0x796   :  { %v816_v5 = vadd.f32 %v815_v1, %v5230_v54 }
 0x797   :  { %v983_v6 = vpop.f32.mrb[12].mxu1 }
 0x798   :  { %v987_v7 = vmul.f32 0.25, %v983_v6  ;;  %v4400_v8 = vpop.f32.mrb[13].mxu1  ;;  %v817_v9 = vsel %vm304_vm3, %v816_v5, -inf }
 0x799   :  { %818 = vmax.xlane.f32.xlu1 %v817_v9 }
 0x79a   :  { %v992_v10 = vadd.f32 %v5319_v4, %v987_v7 }
 0x79b   :  { %v1152_v11 = vpop.f32.mrb[14].mxu1 }
 0x79c   :  { %v1156_v12 = vmul.f32 0.25, %v1152_v11  ;;  %v4410_v13 = vpop.f32.mrb[15].mxu1  ;;  %v993_v14 = vsel %vm304_vm3, %v992_v10, -inf }
 0x79d   :  { %994 = vmax.xlane.f32.xlu0 %v993_v14 }
 0x79e   :  { %v1157_v15 = vadd.f32 %v1156_v12, %v5319_v4 }
 0x79f   :  { %v1325_v53 = vpop.f32.mrb[16].mxu1 }
 0x7a0   :  { %v1329_v16 = vmul.f32 0.25, %v1325_v53  ;;  %v4420_v17 = vpop.f32.mrb[17].mxu1  ;;  %v1158_v18 = vsel %vm304_vm3, %v1157_v15, -inf }
 0x7a1   :  { %1159 = vmax.xlane.f32.xlu0 %v1158_v18 }
 0x7a2   :  { %v1330_v21 = vadd.f32 %v1329_v16, %v5319_v4 }
 0x7a3   :  { %v1497_v22 = vpop.f32.mrb[18].mxu1 }
 0x7a4   :  { %v1501_v23 = vmul.f32 0.25, %v1497_v22  ;;  %v4430_v24 = vpop.f32.mrb[19].mxu1  ;;  %v1331_v25 = vsel %vm304_vm3, %v1330_v21, -inf }
 0x7a5   :  { %1332 = vmax.xlane.f32.xlu1 %v1331_v25 }
 0x7a6   :  { %v1502_v26 = vadd.f32 %v1501_v23, %v5319_v4 }
 0x7a8   :  { %v1503_v27 = vsel %vm304_vm3, %v1502_v26, -inf }
 0x7a9   :  { %1504 = vmax.xlane.f32.xlu0 %v1503_v27 }
 0x7b6   :  { %655 = vrot.lane.b32.xlu1 %v5215_v52, %s5017_s29 }
 0x822   :  { %v646_v28 = vpop.xlane.xlu0 %645 }
 0x823   :  { %v647_v29 = vsub.f32 %v643_v63, %v646_v28 }
 0x825   :  { %v648_v30 = vmul.f32 1.442695, %v647_v29 }
 0x826   :  { %v819_v31 = vpop.xlane.xlu1 %818 }
 0x827   :  { %4907 = vpow2.f32 %v648_v30  ;;  %v820_v32 = vsub.f32 %v816_v5, %v819_v31  ;;  %v1597_v30 = vld [vmem:[%s5922_s6] sm:$0xff]  ;;  %v1598_v31 = vld [vmem:[%s5922_s6 + $0x8] sm:$0xff] }
 0x829   :  { %v821_v33 = vmul.f32 1.442695, %v820_v32  ;;  %v4716_v32 = vpack.c.bf16 %v1598_v31, %v1597_v30  ;;  %v1854_v30 = vld [vmem:[%s5928_s12 + $0x8] sm:$0xff] }
 0x82a   :  { %v995_v44 = vpop.xlane.xlu0 %994 }
 0x82b   :  { %4909 = vpow2.f32 %v821_v33  ;;  %v996_v45 = vsub.f32 %v992_v10, %v995_v44  ;;  %4717 = vmatprep.subr.bf16.mxu1 %v4716_v32  ;;  %v1599_v33 = vld [vmem:[%s5922_s6 + $0x10] sm:$0xff] }
 0x82c   :  { %4719 = vmatpush3.bf16.msra.mxu1 %v4716_v32  ;;  %v1603_v44 = vld [vmem:[%s5922_s6 + $0x30] sm:$0xff] }
 0x82d   :  { %v997_v48 = vmul.f32 1.442695, %v996_v45  ;;  %v1604_v45 = vld [vmem:[%s5922_s6 + $0x38] sm:$0xff] }
 0x82e   :  { %v1160_v46 = vpop.xlane.xlu0 %1159 }
 0x82f   :  { %v1161_v47 = vsub.f32 %v1157_v15, %v1160_v46  ;;  %4911 = vpow2.f32 %v997_v48  ;;  %v4728_v46 = vpack.c.bf16 %v1604_v45, %v1603_v44 }
 0x831   :  { %v4908_v34 = vpop.eup %4907  ;;  %v1162_v56 = vmul.f32 1.442695, %v1161_v47 }
 0x832   :  { %v1333_v35 = vpop.xlane.xlu1 %1332  ;;  %v650_v37 = vsel %vm304_vm3, %v4908_v34, 0.0 }
 0x833   :  { %651 = vadd.xlane.f32.xlu1 %v650_v37  ;;  %v1334_v51 = vsub.f32 %v1330_v21, %v1333_v35  ;;  %4913 = vpow2.f32 %v1162_v56  ;;  %v1601_v37 = vld [vmem:[%s5922_s6 + $0x20] sm:$0xff] }
 0x835   :  { %v4910_v38 = vpop.eup %4909  ;;  %v1335_v57 = vmul.f32 1.442695, %v1334_v51 }
 0x836   :  { %v656_v39 = vpop.permute.xlu1 %655  ;;  %v823_v41 = vsel %vm304_vm3, %v4910_v38, 0.0  ;;  %v1505_v55 = vpop.xlane.xlu0 %1504 }
 0x837   :  { %4382 = vmatpush3.msra.mxu0 %v656_v39  ;;  %824 = vadd.xlane.f32.xlu0 %v823_v41  ;;  %v1506_v59 = vsub.f32 %v1502_v26, %v1505_v55  ;;  %4915 = vpow2.f32 %v1335_v57 }
 0x838   :  { %4391 = vmatprep.subr.mxu0 %v5011_v20 }
 0x839   :  { %v1507_v60 = vmul.f32 1.442695, %v1506_v59  ;;  %v4912_v50 = vpop.eup %4911 }
 0x83a   :  { %v999_v61 = vsel %vm304_vm3, %v4912_v50, 0.0 }
 0x83b   :  { %4917 = vpow2.f32 %v1507_v60 }
 0x83d   :  { %v4914_v36 = vpop.eup %4913 }
 0x83e   :  { %v1164_v63 = vsel %vm304_vm3, %v4914_v36, 0.0 }
 0x841   :  { %v4916_v62 = vpop.eup %4915 }
 0x844   :  { %1170 = vrot.lane.b32.xlu1 %v218_v42, %s5015_s0 }
 0x845   :  { %v4918_v0 = vpop.eup %4917 }
 0x846   :  { %v1509_v1 = vsel %vm304_vm3, %v4918_v0, 0.0 }
 0x84d   :  { %828 = vrot.lane.b32.xlu0 %v5215_v52, %s5019_s22  ;;  %v1337_v52 = vsel %vm304_vm3, %v4916_v62, 0.0 }
 0x868   :  { %1000 = vadd.xlane.f32.xlu1 %v999_v61 }
 0x86c   :  { %1338 = vadd.xlane.f32.xlu1 %v1337_v52  ;;  %1165 = vadd.xlane.f32.xlu0 %v1164_v63  ;;  %v4092_v63 = vld [vmem:[%s5923_s7] ss:$0 sm:$0xff] }
 0x870   :  { %1510 = vadd.xlane.f32.xlu0 %v1509_v1 }
 0x87d   :  { %1342 = vrot.lane.b32.xlu1 %v218_v42, %s5017_s29 }
 0x881   :  { %559 = vrot.lane.b32.xlu1 %v5313_v58, %s5018_s21 }
 0x886   :  { %1514 = vrot.lane.b32.xlu0 %v218_v42, %s5019_s22 }
 0x8c0   :  { %v652_v2 = vpop.xlane.xlu1 %651 }
 0x8c1   :  { %4919 = vrcp.f32 %v652_v2 }
 0x8c4   :  { %v825_v3 = vpop.xlane.xlu0 %824  ;;  %v1171_v58 = vpop.permute.xlu1 %1170 }
 0x8c5   :  { %4921 = vrcp.f32 %v825_v3 }
 0x8c8   :  { %v829_v7 = vpop.permute.xlu0 %828 }
 0x8cb   :  { %v4920_v5 = vpop.eup %4919 }
 0x8cc   :  { %v654_v6 = vmul.f32 %v4920_v5, %v4908_v34  ;;  %v1600_v34 = vld [vmem:[%s5922_s6 + $0x18] sm:$0xff] }
 0x8cd   :  { %v4720_v35 = vpack.c.bf16 %v1600_v34, %v1599_v33 }
 0x8ce   :  { %4384 = vmatmul.mubr.msk.f32.vlgmr.msra.gmra.mrb[4].mxu0 %vm304_vm3, %v654_v6 }
 0x8cf   :  { %v4922_v8 = vpop.eup %4921  ;;  %4392 = vmatpush3.msra.mxu0 %v829_v7  ;;  %4393 = vmatprep.mubr.msk.f32.mxu0 %vm5012_vm1, %v5011_v20 }
 0x8d0   :  { %v827_v9 = vmul.f32 %v4922_v8, %v4910_v38  ;;  %4401 = vmatprep.subr.mxu0 %v5011_v20  ;;  %4721 = vmatprep.subr.bf16.mxu1 %v4720_v35  ;;  %v1602_v38 = vld [vmem:[%s5922_s6 + $0x28] sm:$0xff] }
 0x8d1   :  { %4723 = vmatpush3.bf16.msra.mxu1 %v4720_v35  ;;  %v4724_v41 = vpack.c.bf16 %v1602_v38, %v1601_v37 }
 0x8d2   :  { %4394 = vmatmul.mubr.msk.f32.vlgmr.msra.gmra.mrb[6].mxu0 %vm304_vm3, %v827_v9 }
 0x8d3   :  { %4402 = vmatpush3.msra.mxu0 %v218_v42  ;;  %4403 = vmatprep.mubr.msk.f32.mxu0 %vm5012_vm1, %v5011_v20 }
 0x8d4   :  { %4411 = vmatprep.subr.mxu0 %v5011_v20  ;;  %4725 = vmatprep.subr.bf16.mxu1 %v4724_v41 }
 0x8d5   :  { %4727 = vmatpush3.bf16.msra.mxu1 %v4724_v41  ;;  %v4095_v41 = vld [vmem:[%s5924_s8] ss:$0 sm:$0xff] }
 0x8d6   :  { %4729 = vmatprep.subr.bf16.mxu1 %v4728_v46 }
 0x8d9   :  { %4731 = vmatpush3.bf16.msra.mxu1 %v4728_v46  ;;  %v4096_v46 = vld [vmem:[%s5925_s9] ss:$0 sm:$0xff] }
 0x8f5   :  { %v1001_v10 = vpop.xlane.xlu1 %1000 }
 0x8f6   :  { %4923 = vrcp.f32 %v1001_v10 }
 0x8f9   :  { %v1339_v11 = vpop.xlane.xlu1 %1338  ;;  %v1166_v12 = vpop.xlane.xlu0 %1165 }
 0x8fa   :  { %4925 = vrcp.f32 %v1166_v12 }
 0x8fb   :  { %4927 = vrcp.f32 %v1339_v11 }
 0x8fd   :  { %v1343_v13 = vpop.permute.xlu1 %1342  ;;  %v1511_v14 = vpop.xlane.xlu0 %1510 }
 0x8fe   :  { %4929 = vrcp.f32 %v1511_v14 }
 0x900   :  { %v4924_v15 = vpop.eup %4923 }
 0x901   :  { %v1003_v53 = vmul.f32 %v4924_v15, %v4912_v50  ;;  %v560_v16 = vpop.permute.xlu1 %559  ;;  %v1515_v24 = vpop.permute.xlu0 %1514 }
 0x902   :  { %563 = vst.msk [vmem:[#allocation2] sm:$0xff] %vm562_vm4, %v560_v16  ;;  %v1740_v16 = vld [vmem:[%s5926_s10 + $0x8] sm:$0xff] }
 0x903   :  { %4404 = vmatmul.mubr.msk.f32.vlgmr.msra.gmra.mrb[8].mxu0 %vm304_vm3, %v1003_v53 }
 0x904   :  { %4412 = vmatpush3.msra.mxu0 %v1171_v58  ;;  %4413 = vmatprep.mubr.msk.f32.mxu0 %vm5012_vm1, %v5011_v20  ;;  %v4926_v17 = vpop.eup %4925 }
 0x905   :  { %4421 = vmatprep.subr.mxu0 %v5011_v20  ;;  %v1168_v18 = vmul.f32 %v4926_v17, %v4914_v36  ;;  %v4928_v21 = vpop.eup %4927 }
 0x906   :  { %v1341_v22 = vmul.f32 %v4928_v21, %v4916_v62  ;;  %v1742_v21 = vld [vmem:[%s5926_s10 + $0x18] sm:$0xff] }
 0x907   :  { %4414 = vmatmul.mubr.msk.f32.vlgmr.msra.gmra.mrb[10].mxu0 %vm304_vm3, %v1168_v18  ;;  %v1741_v18 = vld [vmem:[%s5926_s10 + $0x10] sm:$0xff] }
 0x908   :  { %4422 = vmatpush3.msra.mxu0 %v1343_v13  ;;  %4423 = vmatprep.mubr.msk.f32.mxu0 %vm5012_vm1, %v5011_v20  ;;  %v4930_v23 = vpop.eup %4929 }
 0x909   :  { %4431 = vmatprep.subr.mxu0 %v5011_v20  ;;  %v1513_v25 = vmul.f32 %v4930_v23, %v4918_v0  ;;  %v1743_v23 = vld [vmem:[%s5926_s10 + $0x20] sm:$0xff] }
 0x90b   :  { %4424 = vmatmul.mubr.msk.f32.vlgmr.msra.gmra.mrb[12].mxu0 %vm304_vm3, %v1341_v22  ;;  %v4736_v22 = vpack.c.bf16 %v1742_v21, %v1741_v18 }
 0x90c   :  { %4432 = vmatpush3.msra.mxu0 %v1515_v24  ;;  %4433 = vmatprep.mubr.msk.f32.mxu0 %vm5012_vm1, %v5011_v20  ;;  %v1744_v24 = vld [vmem:[%s5926_s10 + $0x28] sm:$0xff] }
 0x90f   :  { %4434 = vmatmul.mubr.msk.f32.vlgmr.msra.gmra.mrb[14].mxu0 %vm304_vm3, %v1513_v25  ;;  %v4740_v25 = vpack.c.bf16 %v1744_v24, %v1743_v23 }
 0x9a1   :  { %v727_v26 = vpop.f32.mrb[4].mxu0 }
 0x9a2   :  { %v4385_v27 = vpop.f32.mrb[5].mxu0  ;;  %732 = vrot.lane.b32.xlu0 %v727_v26, %s5016_s20  ;;  %v1745_v26 = vld [vmem:[%s5926_s10 + $0x30] sm:$0xff] }
 0x9a3   :  { %v1746_v27 = vld [vmem:[%s5926_s10 + $0x38] sm:$0xff] }
 0x9a5   :  { %v900_v28 = vpop.f32.mrb[6].mxu0 }
 0x9a6   :  { %905 = vrot.lane.b32.xlu0 %v900_v28, %s5936_s25  ;;  %v4395_v29 = vpop.f32.mrb[7].mxu0  ;;  %v4744_v28 = vpack.c.bf16 %v1746_v27, %v1745_v26 }
 0x9a7   :  { %v1853_v29 = vld [vmem:[%s5928_s12] sm:$0xff] }
 0x9a8   :  { %v4748_v31 = vpack.c.bf16 %v1854_v30, %v1853_v29 }
 0x9aa   :  { %4749 = vmatprep.subr.bf16.mxu1 %v4748_v31 }
 0x9d6   :  { %v1073_v39 = vpop.f32.mrb[8].mxu0 }
 0x9d7   :  { %1077 = vst.msk [vmem:[#allocation2 + $0x8] sm:$0xff] %vm223_vm2, %v1073_v39  ;;  %v4405_v42 = vpop.f32.mrb[9].mxu0 }
 0x9da   :  { %v1242_v47 = vpop.f32.mrb[10].mxu0 }
 0x9db   :  { %1247 = vrot.lane.b32.xlu1 %v1242_v47, %s5018_s21  ;;  %v4415_v48 = vpop.f32.mrb[11].mxu0 }
 0x9de   :  { %v1414_v51 = vpop.f32.mrb[12].mxu0 }
 0x9df   :  { %1419 = vrot.lane.b32.xlu1 %v1414_v51, %s5016_s20  ;;  %v4425_v55 = vpop.f32.mrb[13].mxu0 }
 0x9e2   :  { %v1586_v56 = vpop.f32.mrb[14].mxu0 }
 0x9e3   :  { %1591 = vrot.lane.b32.xlu0 %v1586_v56, %s5936_s25  ;;  %v4435_v57 = vpop.f32.mrb[15].mxu0  ;;  %v1855_v56 = vld [vmem:[%s5928_s12 + $0x10] sm:$0xff] }
 0x9e4   :  { %v1856_v57 = vld [vmem:[%s5928_s12 + $0x18] sm:$0xff] }
 0xa14   :  { %v733_v59 = vpop.permute.xlu0 %732 }
 0xa15   :  { %736 = vst.msk [vmem:[#allocation2] sm:$0xff] %vm735_vm5, %v733_v59  ;;  %v4752_v59 = vpack.c.bf16 %v1856_v57, %v1855_v56 }
 0xa18   :  { %v906_v60 = vpop.permute.xlu0 %905 }
 0xa19   :  { %909 = vst.msk [vmem:[#allocation2] sm:$0xff] %vm908_vm6, %v906_v60  ;;  %v1857_v60 = vld [vmem:[%s5928_s12 + $0x20] sm:$0xff] }
 0xa20   :  { %v1595_v50 = vld [vmem:[#allocation2] sm:$0xff] }
 0xa21   :  { %4452 = vmatprep.mubr.msk.f32.mxu1 %vm64_vm0, %v1595_v50  ;;  %v1858_v50 = vld [vmem:[%s5928_s12 + $0x28] sm:$0xff] }
 0xa4d   :  { %v1248_v36 = vpop.permute.xlu1 %1247 }
 0xa4e   :  { %1250 = vst.msk [vmem:[#allocation2 + $0x8] sm:$0xff] %vm562_vm4, %v1248_v36  ;;  %v4756_v36 = vpack.c.bf16 %v1858_v50, %v1857_v60 }
 0xa51   :  { %v1420_v61 = vpop.permute.xlu1 %1419 }
 0xa52   :  { %1422 = vst.msk [vmem:[#allocation2 + $0x8] sm:$0xff] %vm735_vm5, %v1420_v61  ;;  %v1859_v61 = vld [vmem:[%s5928_s12 + $0x30] sm:$0xff] }
 0xa55   :  { %v1592_v62 = vpop.permute.xlu0 %1591 }
 0xa56   :  { %1594 = vst.msk [vmem:[#allocation2 + $0x8] sm:$0xff] %vm908_vm6, %v1592_v62  ;;  %v1860_v62 = vld [vmem:[%s5928_s12 + $0x38] sm:$0xff] }
 0xa5d   :  { %v1596_v52 = vld [vmem:[#allocation2 + $0x8] sm:$0xff] }
 0xa5e   :  { %4453 = vmatmul.mubr.msk.f32.vlgmr.msra.gmra.mrb[20].mxu1 %vm64_vm0, %v1596_v52  ;;  %v4760_v52 = vpack.c.bf16 %v1860_v62, %v1859_v61  ;;  %v4103_v62 = vld [vmem:[%s5920_s4 + $0x80] sm:$0xff] }
 0xa5f   :  { %4751 = vmatpush3.bf16.msra.mxu1 %v4748_v31 }
 0xa60   :  { %4753 = vmatprep.subr.bf16.mxu1 %v4752_v59 }
 0xa63   :  { %4755 = vmatpush3.bf16.msra.mxu1 %v4752_v59 }
 0xa64   :  { %4757 = vmatprep.subr.bf16.mxu1 %v4756_v36 }
 0xa67   :  { %4759 = vmatpush3.bf16.msra.mxu1 %v4756_v36  ;;  %v4106_v36 = vld [vmem:[%s5920_s4 + $0x98] sm:$0xff] }
 0xa68   :  { %4761 = vmatprep.subr.bf16.mxu1 %v4760_v52 }
 0xa6b   :  { %4763 = vmatpush3.bf16.msra.mxu1 %v4760_v52  ;;  %v4105_v52 = vld [vmem:[%s5920_s4 + $0x90] sm:$0xff] }
 0xb31   :  { %v4454_v0 = vpop.f32.mrb[20].mxu1 }
 0xb32   :  { %v1690_v1 = vadd.f32 %v4454_v0, %v4092_v63  ;;  %v1684_v2 = vpop.f32.mrb[21].mxu1  ;;  %v1862_v0 = vld [vmem:[%s5928_s12 + $0x48] sm:$0xff] }
 0xb33   :  { %v1685_v3 = vadd.f32 %v4092_v63, %v1684_v2  ;;  %v1861_v63 = vld [vmem:[%s5928_s12 + $0x40] sm:$0xff]  ;;  %v1863_v2 = vld [vmem:[%s5928_s12 + $0x50] sm:$0xff] }
 0xb34   :  { %v1694_v5 = vadd.f32 %v1690_v1, %v5254_v19  ;;  %v4764_v1 = vpack.c.bf16 %v1862_v0, %v1861_v63  ;;  %v4782_v63 = vpack.c.bf16 %v4105_v52, %v4103_v62  ;;  %v4108_v0 = vld [vmem:[%s5920_s4 + $0xa8] sm:$0xff] }
 0xb35   :  { %v1693_v6 = vadd.f32 %v1685_v3, %v5185_v40  ;;  %v1739_v40 = vld [vmem:[%s5926_s10] sm:$0xff]  ;;  %v1864_v3 = vld [vmem:[%s5928_s12 + $0x58] sm:$0xff] }
 0xb36   :  { %v1700_v7 = vsel %vm64_vm0, %v1694_v5, 0.0  ;;  %v4732_v17 = vpack.c.bf16 %v1740_v16, %v1739_v40  ;;  %4765 = vmatprep.subr.bf16.mxu1 %v4764_v1 }
 0xb37   :  { %1701 = vadd.xlane.f32.xlu0 %v1700_v7  ;;  %v1697_v8 = vsel %vm64_vm0, %v1693_v6, 0.0  ;;  %v1866_v7 = vld [vmem:[%s5928_s12 + $0x68] sm:$0xff]  ;;  %4767 = vmatpush3.bf16.msra.mxu1 %v4764_v1  ;;  %v4110_v1 = vld [vmem:[%s5920_s4 + $0xb8] sm:$0xff] }
 0xb38   :  { %1698 = vadd.xlane.f32.xlu1 %v1697_v8  ;;  %4733 = vmatprep.subr.bf16.mxu0 %v4732_v17 }
 0xb39   :  { %4735 = vmatpush3.bf16.msra.mxu0 %v4732_v17 }
 0xb3a   :  { %4737 = vmatprep.subr.bf16.mxu0 %v4736_v22 }
 0xb3d   :  { %4739 = vmatpush3.bf16.msra.mxu0 %v4736_v22 }
 0xb3e   :  { %4741 = vmatprep.subr.bf16.mxu0 %v4740_v25 }
 0xb41   :  { %4743 = vmatpush3.bf16.msra.mxu0 %v4740_v25 }
 0xb42   :  { %4745 = vmatprep.subr.bf16.mxu0 %v4744_v28 }
 0xb45   :  { %4747 = vmatpush3.bf16.msra.mxu0 %v4744_v28 }
 0xbc4   :  { %v1702_v9 = vpop.xlane.xlu0 %1701 }
 0xbc5   :  { %v1704_v58 = vmul.f32 0.015625, %v1702_v9  ;;  %v1699_v10 = vpop.xlane.xlu1 %1698  ;;  %v1867_v9 = vld [vmem:[%s5928_s12 + $0x70] sm:$0xff] }
 0xbc6   :  { %v1703_v11 = vmul.f32 0.015625, %v1699_v10 }
 0xbc7   :  { %v1706_v12 = vsub.f32 %v1694_v5, %v1704_v58  ;;  %v4768_v5 = vpack.c.bf16 %v1864_v3, %v1863_v2  ;;  %v1868_v58 = vld [vmem:[%s5928_s12 + $0x78] sm:$0xff]  ;;  %v4784_v2 = vpack.c.bf16 %v4110_v1, %v4108_v0  ;;  %v4107_v3 = vld [vmem:[%s5920_s4 + $0xa0] sm:$0xff] }
 0xbc8   :  { %v1705_v13 = vsub.f32 %v1693_v6, %v1703_v11  ;;  %v1865_v6 = vld [vmem:[%s5928_s12 + $0x60] sm:$0xff]  ;;  %v4776_v10 = vpack.c.bf16 %v1868_v58, %v1867_v9 }
 0xbc9   :  { %v1708_v14 = vmul.f32 %v1706_v12, %v1706_v12  ;;  %4769 = vmatprep.subr.bf16.mxu1 %v4768_v5  ;;  %v4772_v8 = vpack.c.bf16 %v1866_v7, %v1865_v6  ;;  %v4097_v11 = vld [vmem:[%s5927_s11] ss:$0 sm:$0xff]  ;;  %v4112_v7 = vld [vmem:[%s5920_s4 + $0xc8] sm:$0xff] }
 0xbca   :  { %v1707_v15 = vmul.f32 %v1705_v13, %v1705_v13  ;;  %4771 = vmatpush3.bf16.msra.mxu1 %v4768_v5  ;;  %v4109_v5 = vld [vmem:[%s5920_s4 + $0xb0] sm:$0xff]  ;;  %v4111_v58 = vld [vmem:[%s5920_s4 + $0xc0] sm:$0xff] }
 0xbcb   :  { %v1712_v53 = vsel %vm64_vm0, %v1708_v14, 0.0  ;;  %4773 = vmatprep.subr.bf16.mxu1 %v4772_v8  ;;  %v4786_v6 = vpack.c.bf16 %v4109_v5, %v4107_v3 }
 0xbcc   :  { %1713 = vadd.xlane.f32.xlu1 %v1712_v53  ;;  %v1709_v19 = vsel %vm64_vm0, %v1707_v15, 0.0 }
 0xbcd   :  { %1710 = vadd.xlane.f32.xlu0 %v1709_v19 }
 0xbce   :  { %4775 = vmatpush3.bf16.msra.mxu1 %v4772_v8  ;;  %v4114_v8 = vld [vmem:[%s5920_s4 + $0xd8] sm:$0xff] }
 0xbcf   :  { %4777 = vmatprep.subr.bf16.mxu1 %v4776_v10  ;;  %v4788_v9 = vpack.c.bf16 %v4114_v8, %v4112_v7 }
 0xbd2   :  { %4779 = vmatpush3.bf16.msra.mxu1 %v4776_v10  ;;  %v4113_v10 = vld [vmem:[%s5920_s4 + $0xd0] sm:$0xff] }
 0xbd3   :  { %4524 = vmatprep.subr.mxu1 %v5011_v20 }
 0xc59   :  { %v1714_v32 = vpop.xlane.xlu1 %1713 }
 0xc5a   :  { %v1716_v33 = vmul.f32 0.015625, %v1714_v32  ;;  %v1711_v34 = vpop.xlane.xlu0 %1710 }
 0xc5b   :  { %v1715_v35 = vmul.f32 0.015625, %v1711_v34 }
 0xc5c   :  { %v1718_v37 = vadd.f32 1e-07, %v1716_v33  ;;  %v4100_v33 = vld [vmem:[%s5929_s13] ss:$0 sm:$0xff] }
 0xc5d   :  { %v1717_v38 = vadd.f32 1e-07, %v1715_v35 }
 0xc5e   :  { %4931 = vrsqrt.f32 %v1718_v37 }
 0xc5f   :  { %4933 = vrsqrt.f32 %v1717_v38 }
 0xc68   :  { %v4932_v39 = vpop.eup %4931 }
 0xc69   :  { %v4934_v42 = vpop.eup %4933  ;;  %v1722_v44 = vmul.f32 %v4932_v39, %v1706_v12 }
 0xc6a   :  { %v1721_v45 = vmul.f32 %v4934_v42, %v1705_v13 }
 0xc6b   :  { %v1730_v47 = vmul.f32 %v4095_v41, %v1722_v44 }
 0xc6c   :  { %v1729_v48 = vmul.f32 %v4095_v41, %v1721_v45 }
 0xc6d   :  { %v5454_v55 = vadd.f32 %v4096_v46, %v1730_v47 }
 0xc6e   :  { %v5452_v51 = vadd.f32 %v4096_v46, %v1729_v48 }
 0xc70   :  { %4471 = vmatprep.mubr.msk.f32.mxu0 %vm64_vm0, %v5452_v51 }
 0xc71   :  { %4472 = vmatmul.mubr.msk.f32.vlgmr.msra.gmra.mrb[16].mxu0 %vm64_vm0, %v5454_v55 }
 0xc72   :  { %2097 = vmatprep.mubr.f32.mxu0 %v5011_v20 }
 0xd44   :  { %v4473_v12 = vpop.f32.mrb[16].mxu0 }
 0xd45   :  { %v1832_v13 = vadd.f32 %v4473_v12, %v4097_v11  ;;  %v1826_v14 = vpop.f32.mrb[17].mxu0  ;;  %v4116_v12 = vld [vmem:[%s5920_s4 + $0xe8] sm:$0xff] }
 0xd46   :  { %v1827_v15 = vadd.f32 %v4097_v11, %v1826_v14  ;;  %v4790_v11 = vpack.c.bf16 %v4113_v10, %v4111_v58  ;;  %v4115_v14 = vld [vmem:[%s5920_s4 + $0xe0] sm:$0xff] }
 0xd47   :  { %v1838_v53 = vmul.f32 0.044715, %v1832_v13  ;;  %v1836_v30 = vmul.f32 0.5, %v1832_v13 }
 0xd48   :  { %v1837_v19 = vmul.f32 0.044715, %v1827_v15  ;;  %v1835_v28 = vmul.f32 0.5, %v1827_v15 }
 0xd49   :  { %v1840_v40 = vmul.f32 %v1838_v53, %v1832_v13  ;;  %v4117_v53 = vld [vmem:[%s5920_s4 + $0xf0] sm:$0xff] }
 0xd4a   :  { %v1839_v16 = vmul.f32 %v1837_v19, %v1827_v15  ;;  %v4794_v19 = vpack.c.bf16 %v4117_v53, %v4115_v14 }
 0xd4b   :  { %v1842_v17 = vmul.f32 %v1840_v40, %v1832_v13 }
 0xd4c   :  { %v1841_v18 = vmul.f32 %v1839_v16, %v1827_v15 }
 0xd4d   :  { %v1844_v21 = vadd.f32 %v1842_v17, %v1832_v13  ;;  %v4118_v13 = vld [vmem:[%s5920_s4 + $0xf8] sm:$0xff] }
 0xd4e   :  { %v1843_v22 = vadd.f32 %v1841_v18, %v1827_v15  ;;  %v4792_v15 = vpack.c.bf16 %v4118_v13, %v4116_v12 }
 0xd4f   :  { %v1846_v23 = vmul.f32 0.7978846, %v1844_v21 }
 0xd50   :  { %v1845_v24 = vmul.f32 0.7978846, %v1843_v22 }
 0xd51   :  { %4935 = vtanh.f32 %v1846_v23 }
 0xd52   :  { %4937 = vtanh.f32 %v1845_v24  ;;  %v4101_v24 = vld [vmem:[%s5930_s14] ss:$0 sm:$0xff] }
 0xd5b   :  { %v4936_v25 = vpop.eup %4935 }
 0xd5c   :  { %v4938_v26 = vpop.eup %4937  ;;  %v1850_v27 = vadd.f32 1.0, %v4936_v25 }
 0xd5d   :  { %v1849_v29 = vadd.f32 1.0, %v4938_v26  ;;  %v4102_v26 = vld [vmem:[%s5931_s15] ss:$0 sm:$0xff] }
 0xd5e   :  { %v1852_v32 = vmul.f32 %v1850_v27, %v1836_v30 }
 0xd5f   :  { %v1851_v31 = vmul.f32 %v1849_v29, %v1835_v28 }
 0xd61   :  { %4506 = vmatprep.mubr.f32.mxu1 %v1851_v31 }
 0xd62   :  { %4507 = vmatmul.mubr.f32.vlgmr.msra.gmra.mrb[22].mxu1 %v1852_v32 }
 0xd63   :  { %4526 = vmatprep.mubr.msk.f32.mxu1 %vm5012_vm1, %v5011_v20 }
 0xe35   :  { %v4508_v34 = vpop.f32.mrb[22].mxu1 }
 0xe36   :  { %v1942_v35 = vpop.f32.mrb[23].mxu1  ;;  %v1948_v37 = vadd.f32 %v4508_v34, %v4100_v33 }
 0xe37   :  { %v1943_v38 = vadd.f32 %v4100_v33, %v1942_v35  ;;  %v4119_v33 = vld [vmem:[%s5921_s5 + $0x2] sm:$0x3]  ;;  %s5944_s5 = smov 48  }
 0xe38   :  { %v1952_v42 = vadd.f32 %v1948_v37, %v5454_v55  ;;  %v4104_v55 = vld [vmem:[%s5920_s4 + $0x88] sm:$0xff]  ;;  %v2020_v34 = vrot.slane %v4119_v33, %v5192_v43 }
 0xe39   :  { %v1951_v39 = vadd.f32 %v1943_v38, %v5452_v51  ;;  %v4780_v61 = vpack.c.bf16 %v4106_v36, %v4104_v55 }
 0xe3a   :  { %v1958_v44 = vsel %vm64_vm0, %v1952_v42, 0.0 }
 0xe3b   :  { %v1955_v41 = vsel %vm64_vm0, %v1951_v39, 0.0  ;;  %4781 = vmatprep.subr.bf16.mxu0 %v4780_v61 }
 0xe3c   :  { %1956 = vadd.xlane.f32.xlu0 %v1955_v41  ;;  %4783 = vmatpush1.bf16.msra.mxu0 %v4782_v63 }
 0xe3d   :  { %4785 = vmatprep.subr.bf16.mxu0 %v4784_v2 }
 0xe40   :  { %1959 = vadd.xlane.f32.xlu0 %v1958_v44  ;;  %4787 = vmatpush1.bf16.msra.mxu0 %v4786_v6 }
 0xe41   :  { %4789 = vmatprep.subr.bf16.mxu0 %v4788_v9 }
 0xe44   :  { %4791 = vmatpush1.bf16.msra.mxu0 %v4790_v11 }
 0xe45   :  { %4793 = vmatprep.subr.bf16.mxu0 %v4792_v15 }
 0xe48   :  { %4795 = vmatpush1.bf16.msra.mxu0 %v4794_v19 }
 0xe49   :  { %4509 = vmatprep.subr.mxu0 %v5011_v20 }
 0xec9   :  { %v1957_v45 = vpop.xlane.xlu0 %1956 }
 0xeca   :  { %v1961_v46 = vmul.f32 0.015625, %v1957_v45 }
 0xecc   :  { %v1963_v47 = vsub.f32 %v1951_v39, %v1961_v46  ;;  %v2024_v39 = vrot.slane %v4119_v33, %v5207_v49 }
 0xecd   :  { %v1960_v48 = vpop.xlane.xlu0 %1959 }
 0xece   :  { %v1962_v56 = vmul.f32 0.015625, %v1960_v48  ;;  %v1965_v57 = vmul.f32 %v1963_v47, %v1963_v47 }
 0xed0   :  { %v1964_v59 = vsub.f32 %v1952_v42, %v1962_v56  ;;  %v1967_v60 = vsel %vm64_vm0, %v1965_v57, 0.0 }
 0xed1   :  { %1968 = vadd.xlane.f32.xlu1 %v1967_v60 }
 0xed2   :  { %v1966_v50 = vmul.f32 %v1964_v59, %v1964_v59 }
 0xed4   :  { %v1970_v51 = vsel %vm64_vm0, %v1966_v50, 0.0 }
 0xed5   :  { %1971 = vadd.xlane.f32.xlu1 %v1970_v51 }
 0xf5e   :  { %v1969_v40 = vpop.xlane.xlu1 %1968 }
 0xf5f   :  { %v1973_v16 = vmul.f32 0.015625, %v1969_v40 }
 0xf61   :  { %v1975_v17 = vadd.f32 1e-07, %v1973_v16 }
 0xf62   :  { %v1972_v18 = vpop.xlane.xlu1 %1971 }
 0xf63   :  { %4939 = vrsqrt.f32 %v1975_v17  ;;  %v1974_v21 = vmul.f32 0.015625, %v1972_v18 }
 0xf65   :  { %v1976_v22 = vadd.f32 1e-07, %v1974_v21 }
 0xf67   :  { %4941 = vrsqrt.f32 %v1976_v22 }
 0xf6d   :  { %v4940_v23 = vpop.eup %4939 }
 0xf6e   :  { %v1979_v25 = vmul.f32 %v4940_v23, %v1963_v47 }
 0xf70   :  { %v1987_v27 = vmul.f32 %v4101_v24, %v1979_v25 }
 0xf71   :  { %v4942_v28 = vpop.eup %4941 }
 0xf72   :  { %v5573_v29 = vadd.f32 %v4102_v26, %v1987_v27  ;;  %v1980_v30 = vmul.f32 %v4942_v28, %v1964_v59 }
 0xf74   :  { %4120 = vmatmul.mubr.msk.f32.vlgmr.msra.gmra.mrb[18].mxu0 %vm64_vm0, %v5573_v29  ;;  %v1988_v31 = vmul.f32 %v4101_v24, %v1980_v30 }
 0xf75   :  { %2103 = vmatprep.mubr.f32.mxu0 %v5011_v20 }
 0xf76   :  { %v5578_v32 = vadd.f32 %v4102_v26, %v1988_v31 }
 0xf78   :  { %4121 = vmatmul.mubr.msk.f32.gmra.mrb[20].mxu0 %vm64_vm0, %v5578_v32 }
 0xf79   :  { %4511 = vmatprep.mubr.msk.f32.mxu0 %vm5012_vm1, %v5011_v20 }
0x1047   :  { %v2099_v35 = vpop.f32.mrb[18].mxu0 }
0x1048   :  { %v2100_v37 = vadd.f32 %v2099_v35, %v2020_v34  ;;  %v2101_v38 = vpop.f32.mrb[19].mxu0 }
0x1049   :  { %v5601_v49 = vadd.f32 %v2101_v38, %v2024_v39 }
0x104a   :  { %2111 = vrot.lane.b32.xlu0 %v2100_v37, %s5014_s26 }
0x104b   :  { %v2105_v41 = vpop.f32.mrb[20].mxu0 }
0x104c   :  { %v2107_v42 = vpop.f32.mrb[21].mxu0  ;;  %v2106_v45 = vadd.f32 %v2105_v41, %v2020_v34 }
0x104d   :  { %v5590_v44 = vadd.f32 %v2107_v42, %v2024_v39 }
0x104e   :  { %2274 = vrot.lane.b32.xlu0 %v2100_v37, %s5015_s0 }
0x1052   :  { %2449 = vrot.lane.b32.xlu0 %v2100_v37, %s5016_s20 }
0x1056   :  { %2621 = vrot.lane.b32.xlu0 %v2100_v37, %s5018_s21 }
0x105a   :  { %2792 = vrot.lane.b32.xlu0 %v2106_v45, %s5014_s26 }
0x105e   :  { %2955 = vrot.lane.b32.xlu0 %v2106_v45, %s5015_s0 }
0x1062   :  { %3128 = vrot.lane.b32.xlu0 %v2106_v45, %s5017_s29 }
0x1066   :  { %3300 = vrot.lane.b32.xlu0 %v2106_v45, %s5019_s22 }
0x10bc   :  { %v2112_v43 = vpop.permute.xlu0 %2111 }
0x10bd   :  { %4510 = vmatpush3.xpose.msk.msra.mxu0 %vm223_vm2, %v2112_v43 }
0x10be   :  { %4514 = vmatprep.subr.mxu0 %v5011_v20 }
0x10c0   :  { %4512 = vmatmul.mubr.msk.f32.vlgmr.msra.gmra.mrb[22].mxu0 %vm223_vm2, %v2100_v37  ;;  %v2275_v62 = vpop.permute.xlu0 %2274 }
0x10c1   :  { %4515 = vmatpush3.msra.mxu0 %v5601_v49  ;;  %4516 = vmatprep.mubr.msk.f32.mxu0 %vm5012_vm1, %v5011_v20 }
0x10c2   :  { %4519 = vmatprep.subr.mxu0 %v5011_v20 }
0x10c4   :  { %v2450_v63 = vpop.permute.xlu0 %2449 }
0x10c8   :  { %v2622_v2 = vpop.permute.xlu0 %2621 }
0x10cc   :  { %v2793_v5 = vpop.permute.xlu0 %2792 }
0x10d0   :  { %v2956_v7 = vpop.permute.xlu0 %2955 }
0x10d4   :  { %v3129_v9 = vpop.permute.xlu0 %3128 }
0x10d8   :  { %v3301_v10 = vpop.permute.xlu0 %3300 }
0x1193   :  { %v2183_v46 = vpop.f32.mrb[22].mxu0 }
0x1194   :  { %v2187_v47 = vmul.f32 0.25, %v2183_v46  ;;  %v4513_v48 = vpop.f32.mrb[23].mxu0 }
0x1196   :  { %v2188_v56 = vadd.f32 %v2187_v47, %v5230_v54 }
0x1198   :  { %v2189_v57 = vsel %vm304_vm3, %v2188_v56, -inf }
0x1199   :  { %2190 = vmax.xlane.f32.xlu1 %v2189_v57 }
0x11aa   :  { %2276 = vrot.lane.b32.xlu1 %v2100_v37, %s5944_s5 }
0x1226   :  { %v2191_v59 = vpop.xlane.xlu1 %2190 }
0x1227   :  { %v2192_v60 = vsub.f32 %v2188_v56, %v2191_v59 }
0x1229   :  { %v2193_v50 = vmul.f32 1.442695, %v2192_v60 }
0x122a   :  { %v2277_v36 = vpop.permute.xlu1 %2276 }
0x122b   :  { %4943 = vpow2.f32 %v2193_v50 }
0x1235   :  { %v4944_v51 = vpop.eup %4943 }
0x1236   :  { %v2195_v55 = vsel %vm304_vm3, %v4944_v51, 0.0 }
0x1237   :  { %2196 = vadd.xlane.f32.xlu1 %v2195_v55 }
0x1248   :  { %2447 = vrot.lane.b32.xlu1 %v2100_v37, %s5017_s29 }
0x124c   :  { %2619 = vrot.lane.b32.xlu1 %v2100_v37, %s5019_s22 }
0x1250   :  { %2957 = vrot.lane.b32.xlu1 %v2106_v45, %s5944_s5 }
0x1254   :  { %3130 = vrot.lane.b32.xlu1 %v2106_v45, %s5016_s20 }
0x1258   :  { %3302 = vrot.lane.b32.xlu1 %v2106_v45, %s5018_s21 }
0x12c4   :  { %v2197_v61 = vpop.xlane.xlu1 %2196 }
0x12c5   :  { %4945 = vrcp.f32 %v2197_v61 }
0x12c8   :  { %v2448_v1 = vpop.permute.xlu1 %2447 }
0x12cc   :  { %v2620_v3 = vpop.permute.xlu1 %2619 }
0x12cf   :  { %v4946_v52 = vpop.eup %4945 }
0x12d0   :  { %v2199_v0 = vmul.f32 %v4946_v52, %v4944_v51  ;;  %v2958_v6 = vpop.permute.xlu1 %2957 }
0x12d2   :  { %4517 = vmatmul.mubr.msk.f32.vlgmr.msra.gmra.mrb[24].mxu0 %vm304_vm3, %v2199_v0 }
0x12d3   :  { %4520 = vmatpush3.xpose.msk.msra.mxu0 %vm223_vm2, %v2277_v36  ;;  %4521 = vmatprep.mubr.msk.f32.mxu0 %vm5012_vm1, %v5011_v20 }
0x12d4   :  { %4529 = vmatprep.subr.mxu0 %v5011_v20  ;;  %v3131_v8 = vpop.permute.xlu1 %3130 }
0x12d6   :  { %4522 = vmatmul.mubr.msk.f32.vlgmr.msra.gmra.mrb[26].mxu0 %vm223_vm2, %v2275_v62 }
0x12d7   :  { %4530 = vmatpush3.xpose.msk.msra.mxu0 %vm223_vm2, %v2450_v63  ;;  %4531 = vmatprep.mubr.msk.f32.mxu0 %vm5012_vm1, %v5011_v20 }
0x12d8   :  { %4539 = vmatprep.subr.mxu0 %v5011_v20  ;;  %v3303_v58 = vpop.permute.xlu1 %3302 }
0x12da   :  { %4532 = vmatmul.mubr.msk.f32.vlgmr.msra.gmra.mrb[28].mxu0 %vm223_vm2, %v2448_v1 }
0x12db   :  { %4540 = vmatpush3.xpose.msk.msra.mxu0 %vm223_vm2, %v2622_v2  ;;  %4541 = vmatprep.mubr.msk.f32.mxu0 %vm5012_vm1, %v5011_v20 }
0x12dc   :  { %4549 = vmatprep.subr.mxu0 %v5011_v20 }
0x12de   :  { %4542 = vmatmul.mubr.msk.f32.vlgmr.msra.gmra.mrb[30].mxu0 %vm223_vm2, %v2620_v3 }
0x12df   :  { %4550 = vmatpush3.xpose.msk.msra.mxu0 %vm223_vm2, %v2793_v5  ;;  %4551 = vmatprep.mubr.msk.f32.mxu0 %vm5012_vm1, %v5011_v20 }
0x12e0   :  { %4559 = vmatprep.subr.mxu0 %v5011_v20 }
0x12e2   :  { %4552 = vmatmul.mubr.msk.f32.vlgmr.msra.gmra.mrb[32].mxu0 %vm223_vm2, %v2106_v45 }
0x12e3   :  { %4560 = vmatpush3.xpose.msk.msra.mxu0 %vm223_vm2, %v2958_v6  ;;  %4561 = vmatprep.mubr.msk.f32.mxu0 %vm5012_vm1, %v5011_v20 }
0x12e4   :  { %4569 = vmatprep.subr.mxu0 %v5011_v20 }
0x12e6   :  { %4562 = vmatmul.mubr.msk.f32.vlgmr.msra.gmra.mrb[34].mxu0 %vm223_vm2, %v2956_v7 }
0x12e7   :  { %4570 = vmatpush3.xpose.msk.msra.mxu0 %vm223_vm2, %v3131_v8  ;;  %4571 = vmatprep.mubr.msk.f32.mxu0 %vm5012_vm1, %v5011_v20 }
0x12e8   :  { %4579 = vmatprep.subr.mxu0 %v5011_v20 }
0x12ea   :  { %4572 = vmatmul.mubr.msk.f32.vlgmr.msra.gmra.mrb[36].mxu0 %vm223_vm2, %v3129_v9 }
0x12eb   :  { %4580 = vmatpush3.xpose.msk.msra.mxu0 %vm223_vm2, %v3303_v58  ;;  %4581 = vmatprep.mubr.msk.f32.mxu0 %vm5012_vm1, %v5011_v20 }
0x12ee   :  { %4582 = vmatmul.mubr.msk.f32.vlgmr.msra.gmra.mrb[38].mxu0 %vm223_vm2, %v3301_v10 }
0x13a5   :  { %v2269_v11 = vpop.f32.mrb[24].mxu0 }
0x13a6   :  { %2273 = vst.msk [vmem:[#allocation2] sm:$0xff] %vm223_vm2, %v2269_v11  ;;  %v4518_v12 = vpop.f32.mrb[25].mxu0 }
0x13a9   :  { %v2348_v13 = vpop.f32.mrb[26].mxu0 }
0x13aa   :  { %v2352_v14 = vmul.f32 0.25, %v2348_v13  ;;  %v4523_v15 = vpop.f32.mrb[27].mxu0 }
0x13ac   :  { %v2353_v53 = vadd.f32 %v2352_v14, %v5230_v54 }
0x13ad   :  { %v2521_v19 = vpop.f32.mrb[28].mxu0 }
0x13ae   :  { %v2525_v40 = vmul.f32 0.25, %v2521_v19  ;;  %v4533_v16 = vpop.f32.mrb[29].mxu0  ;;  %v2354_v17 = vsel %vm304_vm3, %v2353_v53, -inf }
0x13af   :  { %2355 = vmax.xlane.f32.xlu1 %v2354_v17 }
0x13b0   :  { %v2526_v18 = vadd.f32 %v2525_v40, %v5230_v54 }
0x13b1   :  { %v2693_v21 = vpop.f32.mrb[30].mxu0 }
0x13b2   :  { %v2697_v22 = vmul.f32 0.25, %v2693_v21  ;;  %v4543_v23 = vpop.f32.mrb[31].mxu0  ;;  %v2527_v24 = vsel %vm304_vm3, %v2526_v18, -inf }
0x13b3   :  { %2528 = vmax.xlane.f32.xlu0 %v2527_v24 }
0x13b4   :  { %v2698_v25 = vadd.f32 %v2697_v22, %v5230_v54 }
0x13b5   :  { %v2864_v26 = vpop.f32.mrb[32].mxu0 }
0x13b6   :  { %v2868_v27 = vmul.f32 0.25, %v2864_v26  ;;  %v4553_v28 = vpop.f32.mrb[33].mxu0  ;;  %v2699_v30 = vsel %vm304_vm3, %v2698_v25, -inf }
0x13b7   :  { %2700 = vmax.xlane.f32.xlu0 %v2699_v30 }
0x13b8   :  { %v2869_v31 = vadd.f32 %v2868_v27, %v5319_v4 }
0x13b9   :  { %v3029_v33 = vpop.f32.mrb[34].mxu0 }
0x13ba   :  { %v3033_v34 = vmul.f32 0.25, %v3029_v33  ;;  %v4563_v35 = vpop.f32.mrb[35].mxu0  ;;  %v2870_v37 = vsel %vm304_vm3, %v2869_v31, -inf }
0x13bb   :  { %2871 = vmax.xlane.f32.xlu1 %v2870_v37 }
0x13bc   :  { %v3034_v38 = vadd.f32 %v3033_v34, %v5319_v4 }
0x13bd   :  { %v3202_v39 = vpop.f32.mrb[36].mxu0 }
0x13be   :  { %v3206_v41 = vmul.f32 0.25, %v3202_v39  ;;  %v4573_v42 = vpop.f32.mrb[37].mxu0  ;;  %v3035_v54 = vsel %vm304_vm3, %v3034_v38, -inf }
0x13bf   :  { %3036 = vmax.xlane.f32.xlu0 %v3035_v54 }
0x13c0   :  { %v3207_v45 = vadd.f32 %v3206_v41, %v5319_v4 }
0x13c1   :  { %v3374_v43 = vpop.f32.mrb[38].mxu0 }
0x13c2   :  { %v3378_v46 = vmul.f32 0.25, %v3374_v43  ;;  %v4583_v47 = vpop.f32.mrb[39].mxu0  ;;  %v3208_v48 = vsel %vm304_vm3, %v3207_v45, -inf }
0x13c3   :  { %3209 = vmax.xlane.f32.xlu1 %v3208_v48 }
0x13c4   :  { %v3379_v56 = vadd.f32 %v3378_v46, %v5319_v4 }
0x13c6   :  { %v3380_v57 = vsel %vm304_vm3, %v3379_v56, -inf }
0x13c7   :  { %3381 = vmax.xlane.f32.xlu0 %v3380_v57 }
0x13d4   :  { %2538 = vrot.lane.b32.xlu1 %v5601_v49, %s5017_s29 }
0x13d8   :  { %2710 = vrot.lane.b32.xlu1 %v5601_v49, %s5019_s22 }
0x13dd   :  { %2366 = vrot.lane.b32.xlu0 %v5601_v49, %s5015_s0 }
0x143c   :  { %v2356_v59 = vpop.xlane.xlu1 %2355 }
0x143d   :  { %v2357_v60 = vsub.f32 %v2353_v53, %v2356_v59 }
0x143f   :  { %v2358_v50 = vmul.f32 1.442695, %v2357_v60 }
0x1440   :  { %v2529_v51 = vpop.xlane.xlu0 %2528 }
0x1441   :  { %4947 = vpow2.f32 %v2358_v50  ;;  %v2530_v55 = vsub.f32 %v2526_v18, %v2529_v51 }
0x1443   :  { %v2531_v36 = vmul.f32 1.442695, %v2530_v55  ;;  %v4146_v55 = vld [vmem:[%s5922_s6 + $0x40] sm:$0xff] }
0x1444   :  { %v2701_v4 = vpop.xlane.xlu0 %2700 }
0x1445   :  { %4949 = vpow2.f32 %v2531_v36  ;;  %v2702_v61 = vsub.f32 %v2698_v25, %v2701_v4  ;;  %v4147_v36 = vld [vmem:[%s5922_s6 + $0x48] sm:$0xff] }
0x1447   :  { %v2703_v62 = vmul.f32 1.442695, %v2702_v61  ;;  %v4796_v61 = vpack.c.bf16 %v4147_v36, %v4146_v55  ;;  %v4175_v55 = vld [vmem:[%s5928_s12 + $0x88] sm:$0xff] }
0x1448   :  { %v2872_v52 = vpop.xlane.xlu1 %2871 }
0x1449   :  { %4951 = vpow2.f32 %v2703_v62  ;;  %v2873_v63 = vsub.f32 %v2869_v31, %v2872_v52  ;;  %4797 = vmatprep.subr.bf16.mxu0 %v4796_v61 }
0x144a   :  { %4799 = vmatpush3.bf16.msra.mxu0 %v4796_v61 }
0x144b   :  { %v4948_v0 = vpop.eup %4947  ;;  %v2874_v1 = vmul.f32 1.442695, %v2873_v63 }
0x144c   :  { %v3037_v2 = vpop.xlane.xlu0 %3036  ;;  %v2360_v3 = vsel %vm304_vm3, %v4948_v0, 0.0 }
0x144d   :  { %4953 = vpow2.f32 %v2874_v1  ;;  %v3038_v49 = vsub.f32 %v3034_v38, %v3037_v2  ;;  %2361 = vadd.xlane.f32.xlu1 %v2360_v3  ;;  %v4148_v3 = vld [vmem:[%s5922_s6 + $0x50] sm:$0xff] }
0x144f   :  { %v4950_v5 = vpop.eup %4949  ;;  %v3039_v6 = vmul.f32 1.442695, %v3038_v49  ;;  %v4149_v49 = vld [vmem:[%s5922_s6 + $0x58] sm:$0xff] }
0x1450   :  { %v2533_v7 = vsel %vm304_vm3, %v4950_v5, 0.0  ;;  %v3210_v16 = vpop.xlane.xlu1 %3209 }
0x1451   :  { %4955 = vpow2.f32 %v3039_v6  ;;  %2534 = vadd.xlane.f32.xlu0 %v2533_v7  ;;  %v3211_v17 = vsub.f32 %v3207_v45, %v3210_v16  ;;  %v4150_v6 = vld [vmem:[%s5922_s6 + $0x60] sm:$0xff]  ;;  %v4151_v7 = vld [vmem:[%s5922_s6 + $0x68] sm:$0xff] }
0x1453   :  { %v4952_v8 = vpop.eup %4951  ;;  %v3212_v18 = vmul.f32 1.442695, %v3211_v17 }
0x1454   :  { %v3382_v9 = vpop.xlane.xlu0 %3381  ;;  %v2705_v58 = vsel %vm304_vm3, %v4952_v8, 0.0  ;;  %v2539_v23 = vpop.permute.xlu1 %2538 }
0x1455   :  { %v3383_v10 = vsub.f32 %v3379_v56, %v3382_v9  ;;  %2706 = vadd.xlane.f32.xlu1 %v2705_v58  ;;  %v4152_v9 = vld [vmem:[%s5922_s6 + $0x70] sm:$0xff]  ;;  %v4153_v58 = vld [vmem:[%s5922_s6 + $0x78] sm:$0xff] }
0x1457   :  { %v4954_v11 = vpop.eup %4953  ;;  %v3384_v12 = vmul.f32 1.442695, %v3383_v10  ;;  %v4808_v10 = vpack.c.bf16 %v4153_v58, %v4152_v9 }
0x1458   :  { %v2367_v13 = vpop.permute.xlu0 %2366  ;;  %v2876_v14 = vsel %vm304_vm3, %v4954_v11, 0.0  ;;  %v2711_v24 = vpop.permute.xlu1 %2710 }
0x1459   :  { %4957 = vpow2.f32 %v3384_v12  ;;  %2877 = vadd.xlane.f32.xlu0 %v2876_v14  ;;  %4525 = vmatpush3.msra.mxu1 %v2367_v13 }
0x145a   :  { %4534 = vmatprep.subr.mxu1 %v5011_v20  ;;  %4959 = vpow2.f32 %v3212_v18 }
0x145b   :  { %v4956_v15 = vpop.eup %4955 }
0x145c   :  { %v3041_v53 = vsel %vm304_vm3, %v4956_v15, 0.0 }
0x145d   :  { %3042 = vadd.xlane.f32.xlu1 %v3041_v53 }
0x1463   :  { %v5679_v19 = vpop.eup %4957 }
0x1464   :  { %v3386_v40 = vsel %vm304_vm3, %v5679_v19, 0.0  ;;  %v4960_v21 = vpop.eup %4959 }
0x1465   :  { %3387 = vadd.xlane.f32.xlu1 %v3386_v40  ;;  %v3214_v22 = vsel %vm304_vm3, %v4960_v21, 0.0 }
0x146f   :  { %3047 = vrot.lane.b32.xlu0 %v5590_v44, %s5015_s0 }
0x1476   :  { %3219 = vrot.lane.b32.xlu1 %v5590_v44, %s5017_s29 }
0x148e   :  { %3215 = vadd.xlane.f32.xlu0 %v3214_v22  ;;  %v4155_v22 = vld [vmem:[%s5923_s7 + $0x1] ss:$0 sm:$0xff] }
0x14a4   :  { %3391 = vrot.lane.b32.xlu0 %v5590_v44, %s5019_s22  ;;  %s5021_s22 = smov [#allocation3]  }
0x14a5   :  { %s4056_s24 = sshll.u32 %s5021_s22, 4  ;;  %s4057_s24 = int_to_ptr.vmem [resolvable:$true] %s4056_s24 }
0x14a6   :  { %s4987_s27 = scalar_lea.vmem %s4057_s24, 32  ;;  %p4992_p1 = scmp.lt.s32.totalorder %s4057_s24, %s4057_s24 }
0x14a7   :  { %p4988_p0 = scmp.ne.s32.totalorder %s4057_s24, %s4987_s27  ;;  %p4993_p2 = scmp.lt.s32.totalorder %s4987_s27, %s4987_s27 }
0x14a9   :  { %p4994_p3 = por %p4993_p2, %p4992_p1 }
0x14ab   :  { %p4995_p4 = pnand %p4994_p3, %p4988_p0 }
0x14da   :  { %v2362_v25 = vpop.xlane.xlu1 %2361 }
0x14db   :  { %4961 = vrcp.f32 %v2362_v25 }
0x14de   :  { %v2535_v26 = vpop.xlane.xlu0 %2534 }
0x14df   :  { %4963 = vrcp.f32 %v2535_v26 }
0x14e2   :  { %v2707_v27 = vpop.xlane.xlu1 %2706 }
0x14e3   :  { %4965 = vrcp.f32 %v2707_v27 }
0x14e5   :  { %v4962_v28 = vpop.eup %4961 }
0x14e6   :  { %v2364_v30 = vmul.f32 %v4962_v28, %v4948_v0  ;;  %v2878_v31 = vpop.xlane.xlu0 %2877 }
0x14e7   :  { %4967 = vrcp.f32 %v2878_v31 }
0x14e8   :  { %4527 = vmatmul.mubr.msk.f32.vlgmr.msra.gmra.mrb[24].mxu1 %vm304_vm3, %v2364_v30 }
0x14e9   :  { %v4964_v33 = vpop.eup %4963  ;;  %4535 = vmatpush3.msra.mxu1 %v2539_v23  ;;  %4536 = vmatprep.mubr.msk.f32.mxu1 %vm5012_vm1, %v5011_v20 }
0x14ea   :  { %v2537_v34 = vmul.f32 %v4964_v33, %v4950_v5  ;;  %v3043_v35 = vpop.xlane.xlu1 %3042  ;;  %4544 = vmatprep.subr.mxu1 %v5011_v20  ;;  %v3048_v54 = vpop.permute.xlu0 %3047  ;;  %v4800_v5 = vpack.c.bf16 %v4149_v49, %v4148_v3 }
0x14eb   :  { %4969 = vrcp.f32 %v3043_v35 }
0x14ec   :  { %4537 = vmatmul.mubr.msk.f32.vlgmr.msra.gmra.mrb[26].mxu1 %vm304_vm3, %v2537_v34  ;;  %4801 = vmatprep.subr.bf16.mxu0 %v4800_v5 }
0x14ed   :  { %v4966_v37 = vpop.eup %4965  ;;  %4545 = vmatpush3.msra.mxu1 %v2711_v24  ;;  %4546 = vmatprep.mubr.msk.f32.mxu1 %vm5012_vm1, %v5011_v20 }
0x14ee   :  { %v2709_v38 = vmul.f32 %v4966_v37, %v4952_v8  ;;  %4554 = vmatprep.subr.mxu1 %v5011_v20  ;;  %4803 = vmatpush3.bf16.msra.mxu0 %v4800_v5  ;;  %v4804_v8 = vpack.c.bf16 %v4151_v7, %v4150_v6  ;;  %v4161_v6 = vld [vmem:[%s5925_s9 + $0x1] ss:$0 sm:$0xff] }
0x14f0   :  { %4547 = vmatmul.mubr.msk.f32.vlgmr.msra.gmra.mrb[28].mxu1 %vm304_vm3, %v2709_v38  ;;  %4805 = vmatprep.subr.bf16.mxu0 %v4804_v8 }
0x14f1   :  { %v4968_v39 = vpop.eup %4967  ;;  %4555 = vmatpush3.msra.mxu1 %v5590_v44  ;;  %4556 = vmatprep.mubr.msk.f32.mxu1 %vm5012_vm1, %v5011_v20 }
0x14f2   :  { %v2880_v41 = vmul.f32 %v4968_v39, %v4954_v11  ;;  %v3388_v42 = vpop.xlane.xlu1 %3387  ;;  %4564 = vmatprep.subr.mxu1 %v5011_v20  ;;  %4807 = vmatpush3.bf16.msra.mxu0 %v4804_v8 }
0x14f3   :  { %4809 = vmatprep.subr.bf16.mxu0 %v4808_v10 }
0x14f4   :  { %4557 = vmatmul.mubr.msk.f32.vlgmr.msra.gmra.mrb[30].mxu1 %vm304_vm3, %v2880_v41 }
0x14f5   :  { %v4970_v45 = vpop.eup %4969  ;;  %4565 = vmatpush3.msra.mxu1 %v3048_v54  ;;  %4566 = vmatprep.mubr.msk.f32.mxu1 %vm5012_vm1, %v5011_v20 }
0x14f6   :  { %v3045_v43 = vmul.f32 %v4970_v45, %v4956_v15  ;;  %v3220_v46 = vpop.permute.xlu1 %3219  ;;  %4574 = vmatprep.subr.mxu1 %v5011_v20  ;;  %4811 = vmatpush3.bf16.msra.mxu0 %v4808_v10  ;;  %v4163_v45 = vld [vmem:[%s5926_s10 + $0x48] sm:$0xff]  ;;  %v4176_v10 = vld [vmem:[%s5928_s12 + $0x90] sm:$0xff] }
0x14f8   :  { %4567 = vmatmul.mubr.msk.f32.vlgmr.msra.gmra.mrb[32].mxu1 %vm304_vm3, %v3045_v43 }
0x14f9   :  { %4575 = vmatpush3.msra.mxu1 %v3220_v46  ;;  %4576 = vmatprep.mubr.msk.f32.mxu1 %vm5012_vm1, %v5011_v20  ;;  %v4164_v46 = vld [vmem:[%s5926_s10 + $0x50] sm:$0xff] }
0x14fa   :  { %4584 = vmatprep.subr.mxu1 %v5011_v20 }
0x151b   :  { %v3216_v44 = vpop.xlane.xlu0 %3215 }
0x151c   :  { %4971 = vrcp.f32 %v3216_v44  ;;  %v4165_v44 = vld [vmem:[%s5926_s10 + $0x58] sm:$0xff] }
0x151d   :  { %4973 = vrcp.f32 %v3388_v42 }
0x151f   :  { %v3392_v57 = vpop.permute.xlu0 %3391 }
0x1526   :  { %v4972_v47 = vpop.eup %4971 }
0x1527   :  { %v3218_v48 = vmul.f32 %v4972_v47, %v4960_v21  ;;  %v4974_v56 = vpop.eup %4973  ;;  %v4816_v47 = vpack.c.bf16 %v4165_v44, %v4164_v46 }
0x1528   :  { %v3390_v59 = vmul.f32 %v4974_v56, %v5679_v19  ;;  %v4167_v56 = vld [vmem:[%s5926_s10 + $0x68] sm:$0xff] }
0x1529   :  { %4577 = vmatmul.mubr.msk.f32.vlgmr.msra.gmra.mrb[34].mxu1 %vm304_vm3, %v3218_v48  ;;  %v4166_v48 = vld [vmem:[%s5926_s10 + $0x60] sm:$0xff] }
0x152a   :  { %4585 = vmatpush3.msra.mxu1 %v3392_v57  ;;  %4586 = vmatprep.mubr.msk.f32.mxu1 %vm5012_vm1, %v5011_v20  ;;  %v4820_v57 = vpack.c.bf16 %v4167_v56, %v4166_v48 }
0x152d   :  { %4587 = vmatmul.mubr.msk.f32.vlgmr.msra.gmra.mrb[36].mxu1 %vm304_vm3, %v3390_v59  ;;  %v4168_v59 = vld [vmem:[%s5926_s10 + $0x70] sm:$0xff] }
0x15bb   :  { %v2438_v60 = vpop.f32.mrb[24].mxu1 }
0x15bc   :  { %2443 = vrot.lane.b32.xlu1 %v2438_v60, %s5018_s21  ;;  %v4528_v50 = vpop.f32.mrb[25].mxu1  ;;  %v4169_v60 = vld [vmem:[%s5926_s10 + $0x78] sm:$0xff] }
0x15bd   :  { %v4824_v50 = vpack.c.bf16 %v4169_v60, %v4168_v59 }
0x15bf   :  { %v2610_v51 = vpop.f32.mrb[26].mxu1 }
0x15c0   :  { %2615 = vrot.lane.b32.xlu0 %v2610_v51, %s5016_s20  ;;  %v4538_v4 = vpop.f32.mrb[27].mxu1  ;;  %v4174_v51 = vld [vmem:[%s5928_s12 + $0x80] sm:$0xff] }
0x15c1   :  { %v4828_v36 = vpack.c.bf16 %v4175_v55, %v4174_v51  ;;  %v4191_v51 = vld [vmem:[%s5929_s13 + $0x1] ss:$0 sm:$0xff] }
0x15c3   :  { %v2782_v62 = vpop.f32.mrb[28].mxu1  ;;  %4829 = vmatprep.subr.bf16.mxu0 %v4828_v36 }
0x15c4   :  { %2787 = vrot.lane.b32.xlu0 %v2782_v62, %s5944_s5  ;;  %v4548_v52 = vpop.f32.mrb[29].mxu1 }
0x15c7   :  { %v2950_v63 = vpop.f32.mrb[30].mxu1 }
0x15c8   :  { %2954 = vst.msk [vmem:[#allocation2 + $0x8] sm:$0xff] %vm223_vm2, %v2950_v63  ;;  %v4558_v0 = vpop.f32.mrb[31].mxu1 }
0x15cb   :  { %v3119_v1 = vpop.f32.mrb[32].mxu1 }
0x15cc   :  { %3124 = vrot.lane.b32.xlu1 %v3119_v1, %s5018_s21  ;;  %v4568_v2 = vpop.f32.mrb[33].mxu1 }
0x15cd   :  { %v4160_v2 = vld [vmem:[%s5924_s8 + $0x1] ss:$0 sm:$0xff] }
0x15fc   :  { %v3291_v11 = vpop.f32.mrb[34].mxu1 }
0x15fd   :  { %3296 = vrot.lane.b32.xlu1 %v3291_v11, %s5016_s20  ;;  %v4578_v12 = vpop.f32.mrb[35].mxu1  ;;  %v4177_v11 = vld [vmem:[%s5928_s12 + $0x98] sm:$0xff] }
0x15fe   :  { %v4832_v12 = vpack.c.bf16 %v4177_v11, %v4176_v10  ;;  %v3885_v11 = vld [vmem:[%s5932_s16 + $0x8] sm:$0xff] }
0x1600   :  { %v3463_v13 = vpop.f32.mrb[36].mxu1 }
0x1601   :  { %3468 = vrot.lane.b32.xlu0 %v3463_v13, %s5944_s5  ;;  %v4588_v14 = vpop.f32.mrb[37].mxu1  ;;  %v4178_v13 = vld [vmem:[%s5928_s12 + $0xa0] sm:$0xff] }
0x1602   :  { %v4179_v14 = vld [vmem:[%s5928_s12 + $0xa8] sm:$0xff] }
0x162e   :  { %v2444_v15 = vpop.permute.xlu1 %2443 }
0x162f   :  { %2446 = vst.msk [vmem:[#allocation2] sm:$0xff] %vm562_vm4, %v2444_v15  ;;  %v4836_v15 = vpack.c.bf16 %v4179_v14, %v4178_v13  ;;  %v5020_v13 = vmov 0.0|0.0   ;;  %v3886_v14 = vld [vmem:[%s5932_s16 + $0x10] sm:$0xff] }
0x1632   :  { %v2616_v53 = vpop.permute.xlu0 %2615 }
0x1633   :  { %2618 = vst.msk [vmem:[#allocation2] sm:$0xff] %vm735_vm5, %v2616_v53  ;;  %v4180_v53 = vld [vmem:[%s5928_s12 + $0xb0] sm:$0xff] }
0x1636   :  { %v2788_v19 = vpop.permute.xlu0 %2787 }
0x1637   :  { %2790 = vst.msk [vmem:[#allocation2] sm:$0xff] %vm908_vm6, %v2788_v19  ;;  %v4181_v19 = vld [vmem:[%s5928_s12 + $0xb8] sm:$0xff] }
0x163e   :  { %v3125_v40 = vpop.permute.xlu1 %3124  ;;  %v3472_v16 = vld [vmem:[#allocation2] sm:$0xff] }
0x163f   :  { %3127 = vst.msk [vmem:[#allocation2 + $0x8] sm:$0xff] %vm562_vm4, %v3125_v40  ;;  %4605 = vmatprep.mubr.msk.f32.mxu0 %vm64_vm0, %v3472_v16  ;;  %v4840_v40 = vpack.c.bf16 %v4181_v19, %v4180_v53  ;;  %v4182_v16 = vld [vmem:[%s5928_s12 + $0xc0] sm:$0xff] }
0x1640   :  { %v3888_v19 = vld [vmem:[%s5932_s16 + $0x20] sm:$0xff] }
0x166f   :  { %v3297_v17 = vpop.permute.xlu1 %3296 }
0x1670   :  { %3299 = vst.msk [vmem:[#allocation2 + $0x8] sm:$0xff] %vm735_vm5, %v3297_v17  ;;  %v4183_v17 = vld [vmem:[%s5928_s12 + $0xc8] sm:$0xff] }
0x1673   :  { %v3469_v18 = vpop.permute.xlu0 %3468 }
0x1674   :  { %3471 = vst.msk [vmem:[#allocation2 + $0x8] sm:$0xff] %vm908_vm6, %v3469_v18  ;;  %v4844_v18 = vpack.c.bf16 %v4183_v17, %v4182_v16  ;;  %v3890_v17 = vld [vmem:[%s5932_s16 + $0x30] sm:$0xff] }
0x167b   :  { %v3473_v21 = vld [vmem:[#allocation2 + $0x8] sm:$0xff] }
0x167c   :  { %4606 = vmatmul.mubr.msk.f32.vlgmr.msra.gmra.mrb[40].mxu0 %vm64_vm0, %v3473_v21  ;;  %v4184_v21 = vld [vmem:[%s5928_s12 + $0xd0] sm:$0xff] }
0x167d   :  { %4831 = vmatpush3.bf16.msra.mxu0 %v4828_v36 }
0x167e   :  { %4833 = vmatprep.subr.bf16.mxu0 %v4832_v12 }
0x1681   :  { %4835 = vmatpush3.bf16.msra.mxu0 %v4832_v12 }
0x1682   :  { %4837 = vmatprep.subr.bf16.mxu0 %v4836_v15 }
0x1685   :  { %4839 = vmatpush3.bf16.msra.mxu0 %v4836_v15  ;;  %v3887_v15 = vld [vmem:[%s5932_s16 + $0x18] sm:$0xff] }
0x1686   :  { %4841 = vmatprep.subr.bf16.mxu0 %v4840_v40  ;;  %v4864_v53 = vpack.c.bf16 %v3887_v15, %v3886_v14 }
0x1689   :  { %4843 = vmatpush3.bf16.msra.mxu0 %v4840_v40  ;;  %v3889_v40 = vld [vmem:[%s5932_s16 + $0x28] sm:$0xff] }
0x168a   :  { %4845 = vmatprep.subr.bf16.mxu0 %v4844_v18  ;;  %v4867_v16 = vpack.c.bf16 %v3889_v40, %v3888_v19 }
0x168d   :  { %4847 = vmatpush3.bf16.msra.mxu0 %v4844_v18  ;;  %v3891_v18 = vld [vmem:[%s5932_s16 + $0x38] sm:$0xff] }
0x174f   :  { %v4607_v23 = vpop.f32.mrb[40].mxu0 }
0x1750   :  { %v3569_v24 = vadd.f32 %v4607_v23, %v4155_v22  ;;  %v3563_v25 = vpop.f32.mrb[41].mxu0 }
0x1751   :  { %v3564_v26 = vadd.f32 %v4155_v22, %v3563_v25  ;;  %v4185_v22 = vld [vmem:[%s5928_s12 + $0xd8] sm:$0xff]  ;;  %v4187_v25 = vld [vmem:[%s5928_s12 + $0xe8] sm:$0xff] }
0x1752   :  { %v3573_v27 = vadd.f32 %v3569_v24, %v5578_v32  ;;  %v4848_v23 = vpack.c.bf16 %v4185_v22, %v4184_v21  ;;  %v4186_v24 = vld [vmem:[%s5928_s12 + $0xe0] sm:$0xff]  ;;  %v4870_v21 = vpack.c.bf16 %v3891_v18, %v3890_v17 }
0x1753   :  { %v3572_v28 = vadd.f32 %v3564_v26, %v5573_v29  ;;  %v4162_v29 = vld [vmem:[%s5926_s10 + $0x40] sm:$0xff]  ;;  %v4852_v26 = vpack.c.bf16 %v4187_v25, %v4186_v24 }
0x1754   :  { %v3581_v30 = vsel %vm64_vm0, %v3573_v27, 0.0  ;;  %v4812_v43 = vpack.c.bf16 %v4163_v45, %v4162_v29  ;;  %4849 = vmatprep.subr.bf16.mxu0 %v4848_v23 }
0x1755   :  { %3582 = vadd.xlane.f32.xlu0 %v3581_v30  ;;  %v3578_v31 = vsel %vm64_vm0, %v3572_v28, 0.0  ;;  %4851 = vmatpush3.bf16.msra.mxu0 %v4848_v23 }
0x1756   :  { %3579 = vadd.xlane.f32.xlu1 %v3578_v31  ;;  %4813 = vmatprep.subr.bf16.mxu1 %v4812_v43  ;;  %v4171_v31 = vld [vmem:[%s5927_s11 + $0x1] ss:$0 sm:$0xff] }
0x1757   :  { %4815 = vmatpush3.bf16.msra.mxu1 %v4812_v43  ;;  %4853 = vmatprep.subr.bf16.mxu0 %v4852_v26 }
0x1758   :  { %4817 = vmatprep.subr.bf16.mxu1 %v4816_v47 }
0x1759   :  { %4855 = vmatpush3.bf16.msra.mxu0 %v4852_v26 }
0x175b   :  { %4819 = vmatpush3.bf16.msra.mxu1 %v4816_v47 }
0x175c   :  { %4821 = vmatprep.subr.bf16.mxu1 %v4820_v57 }
0x175f   :  { %4823 = vmatpush3.bf16.msra.mxu1 %v4820_v57 }
0x1760   :  { %4825 = vmatprep.subr.bf16.mxu1 %v4824_v50 }
0x1763   :  { %4827 = vmatpush3.bf16.msra.mxu1 %v4824_v50 }
0x1764   :  { %4860 = vmatprep.subr.bf16.mxu1 %v5020_v13 }
0x17e2   :  { %v3583_v33 = vpop.xlane.xlu0 %3582 }
0x17e3   :  { %v3585_v34 = vmul.f32 0.015625, %v3583_v33  ;;  %v3580_v35 = vpop.xlane.xlu1 %3579 }
0x17e4   :  { %v3584_v37 = vmul.f32 0.015625, %v3580_v35 }
0x17e5   :  { %v3587_v38 = vsub.f32 %v3573_v27, %v3585_v34  ;;  %v4188_v27 = vld [vmem:[%s5928_s12 + $0xf0] sm:$0xff] }
0x17e6   :  { %v3586_v39 = vsub.f32 %v3572_v28, %v3584_v37  ;;  %v4189_v28 = vld [vmem:[%s5928_s12 + $0xf8] sm:$0xff] }
0x17e7   :  { %v3589_v41 = vmul.f32 %v3587_v38, %v3587_v38  ;;  %v4856_v30 = vpack.c.bf16 %v4189_v28, %v4188_v27 }
0x17e8   :  { %v3588_v42 = vmul.f32 %v3586_v39, %v3586_v39 }
0x17e9   :  { %v3593_v54 = vsel %vm64_vm0, %v3589_v41, 0.0  ;;  %4857 = vmatprep.subr.bf16.mxu0 %v4856_v30 }
0x17ea   :  { %3594 = vadd.xlane.f32.xlu1 %v3593_v54  ;;  %v3590_v32 = vsel %vm64_vm0, %v3588_v42, 0.0  ;;  %4859 = vmatpush3.bf16.msra.mxu0 %v4856_v30  ;;  %v4194_v30 = vld [vmem:[%s5930_s14 + $0x1] ss:$0 sm:$0xff] }
0x17eb   :  { %3591 = vadd.xlane.f32.xlu0 %v3590_v32 }
0x1877   :  { %v3595_v4 = vpop.xlane.xlu1 %3594 }
0x1878   :  { %v3597_v61 = vmul.f32 0.015625, %v3595_v4  ;;  %v3592_v62 = vpop.xlane.xlu0 %3591 }
0x1879   :  { %v3596_v52 = vmul.f32 0.015625, %v3592_v62 }
0x187a   :  { %v3599_v63 = vadd.f32 1e-07, %v3597_v61 }
0x187b   :  { %v3598_v0 = vadd.f32 1e-07, %v3596_v52 }
0x187c   :  { %4975 = vrsqrt.f32 %v3599_v63 }
0x187d   :  { %4977 = vrsqrt.f32 %v3598_v0 }
0x1886   :  { %v4976_v1 = vpop.eup %4975 }
0x1887   :  { %v4978_v3 = vpop.eup %4977  ;;  %v3603_v49 = vmul.f32 %v4976_v1, %v3587_v38 }
0x1888   :  { %v3602_v5 = vmul.f32 %v4978_v3, %v3586_v39 }
0x1889   :  { %v3611_v7 = vmul.f32 %v4160_v2, %v3603_v49 }
0x188a   :  { %v3610_v8 = vmul.f32 %v4160_v2, %v3602_v5 }
0x188b   :  { %v5802_v58 = vadd.f32 %v4161_v6, %v3611_v7 }
0x188c   :  { %v5800_v9 = vadd.f32 %v4161_v6, %v3610_v8 }
0x188e   :  { %4624 = vmatprep.mubr.msk.f32.mxu1 %vm64_vm0, %v5800_v9 }
0x188f   :  { %4625 = vmatmul.mubr.msk.f32.vlgmr.msra.gmra.mrb[38].mxu1 %vm64_vm0, %v5802_v58 }
0x1890   :  { %4678 = vmatprep.mubr.msk.f32.mxu1 %vm5012_vm1, %v5011_v20 }
0x1962   :  { %v4626_v33 = vpop.f32.mrb[38].mxu1 }
0x1963   :  { %v3715_v34 = vadd.f32 %v4626_v33, %v4171_v31  ;;  %v3709_v35 = vpop.f32.mrb[39].mxu1  ;;  %v4195_v33 = vld [vmem:[%s5931_s15 + $0x1] ss:$0 sm:$0xff] }
0x1964   :  { %v3710_v37 = vadd.f32 %v4171_v31, %v3709_v35 }
0x1965   :  { %v3721_v38 = vmul.f32 0.044715, %v3715_v34  ;;  %v3719_v59 = vmul.f32 0.5, %v3715_v34 }
0x1966   :  { %v3720_v39 = vmul.f32 0.044715, %v3710_v37  ;;  %v3718_v56 = vmul.f32 0.5, %v3710_v37 }
0x1967   :  { %v3723_v41 = vmul.f32 %v3721_v38, %v3715_v34 }
0x1968   :  { %v3722_v42 = vmul.f32 %v3720_v39, %v3710_v37 }
0x1969   :  { %v3725_v54 = vmul.f32 %v3723_v41, %v3715_v34 }
0x196a   :  { %v3724_v32 = vmul.f32 %v3722_v42, %v3710_v37  ;;  %v3892_v42 = vld [vmem:[%s5933_s17] sm:$0x1] }
0x196b   :  { %v3727_v29 = vadd.f32 %v3725_v54, %v3715_v34 }
0x196c   :  { %v3726_v45 = vadd.f32 %v3724_v32, %v3710_v37 }
0x196d   :  { %v3729_v43 = vmul.f32 0.7978846, %v3727_v29 }
0x196e   :  { %v3728_v46 = vmul.f32 0.7978846, %v3726_v45 }
0x196f   :  { %4979 = vtanh.f32 %v3729_v43 }
0x1970   :  { %4981 = vtanh.f32 %v3728_v46 }
0x1979   :  { %v4980_v44 = vpop.eup %4979 }
0x197a   :  { %v4982_v47 = vpop.eup %4981  ;;  %v3733_v48 = vadd.f32 1.0, %v4980_v44 }
0x197b   :  { %v3732_v57 = vadd.f32 1.0, %v4982_v47 }
0x197c   :  { %v3735_v50 = vmul.f32 %v3733_v48, %v3719_v59 }
0x197d   :  { %v3734_v60 = vmul.f32 %v3732_v57, %v3718_v56 }
0x197f   :  { %4659 = vmatprep.mubr.f32.mxu0 %v3734_v60 }
0x1980   :  { %4660 = vmatmul.mubr.f32.vlgmr.msra.gmra.mrb[42].mxu0 %v3735_v50 }
0x1a53   :  { %v4661_v55 = vpop.f32.mrb[42].mxu0 }
0x1a54   :  { %v3833_v36 = vadd.f32 %v4661_v55, %v4191_v51  ;;  %v3827_v4 = vpop.f32.mrb[43].mxu0 }
0x1a55   :  { %v3828_v61 = vadd.f32 %v4191_v51, %v3827_v4 }
0x1a56   :  { %v3837_v62 = vadd.f32 %v3833_v36, %v5802_v58 }
0x1a57   :  { %v3836_v52 = vadd.f32 %v3828_v61, %v5800_v9  ;;  %v3884_v9 = vld [vmem:[%s5932_s16] sm:$0xff] }
0x1a58   :  { %v3845_v63 = vsel %vm64_vm0, %v3837_v62, 0.0  ;;  %v4861_v12 = vpack.c.bf16 %v3885_v11, %v3884_v9 }
0x1a59   :  { %3846 = vadd.xlane.f32.xlu1 %v3845_v63  ;;  %v3842_v0 = vsel %vm64_vm0, %v3836_v52, 0.0 }
0x1a5a   :  { %3843 = vadd.xlane.f32.xlu0 %v3842_v0  ;;  %4862 = vmatpush3.bf16.msra.mxu1 %v4861_v12 }
0x1a5b   :  { %4863 = vmatprep.subr.bf16.mxu1 %v5020_v13 }
0x1a5e   :  { %4865 = vmatpush3.bf16.msra.mxu1 %v4864_v53 }
0x1a5f   :  { %4866 = vmatprep.subr.bf16.mxu1 %v5020_v13 }
0x1a62   :  { %4868 = vmatpush3.bf16.msra.mxu1 %v4867_v16 }
0x1a63   :  { %4869 = vmatprep.subr.bf16.mxu1 %v5020_v13 }
0x1a66   :  { %4871 = vmatpush3.bf16.msra.mxu1 %v4870_v21 }
0x1a67   :  { %4872 = vmatprep.subr.bf16.mxu1 %v5020_v13 }
0x1ae6   :  { %v3847_v1 = vpop.xlane.xlu1 %3846 }
0x1ae7   :  { %v3849_v2 = vmul.f32 0.015625, %v3847_v1  ;;  %v3844_v3 = vpop.xlane.xlu0 %3843 }
0x1ae8   :  { %v3848_v49 = vmul.f32 0.015625, %v3844_v3 }
0x1ae9   :  { %v3851_v5 = vsub.f32 %v3837_v62, %v3849_v2 }
0x1aea   :  { %v3850_v6 = vsub.f32 %v3836_v52, %v3848_v49 }
0x1aeb   :  { %v3853_v7 = vmul.f32 %v3851_v5, %v3851_v5 }
0x1aec   :  { %v3852_v8 = vmul.f32 %v3850_v6, %v3850_v6 }
0x1aed   :  { %v3857_v10 = vsel %vm64_vm0, %v3853_v7, 0.0 }
0x1aee   :  { %3858 = vadd.xlane.f32.xlu1 %v3857_v10  ;;  %v3854_v58 = vsel %vm64_vm0, %v3852_v8, 0.0 }
0x1aef   :  { %3855 = vadd.xlane.f32.xlu0 %v3854_v58 }
0x1b7b   :  { %v3859_v25 = vpop.xlane.xlu1 %3858 }
0x1b7c   :  { %v3856_v22 = vpop.xlane.xlu0 %3855  ;;  %v3861_v26 = vmul.f32 0.015625, %v3859_v25 }
0x1b7d   :  { %v3860_v23 = vmul.f32 0.015625, %v3856_v22 }
0x1b7e   :  { %v3863_v27 = vadd.f32 1e-07, %v3861_v26 }
0x1b7f   :  { %v3862_v24 = vadd.f32 1e-07, %v3860_v23 }
0x1b81   :  { %4983 = vrsqrt.f32 %v3862_v24 }
0x1b82   :  { %4985 = vrsqrt.f32 %v3863_v27 }
0x1b8b   :  { %v4984_v28 = vpop.eup %4983 }
0x1b8c   :  { %v3866_v31 = vmul.f32 %v4984_v28, %v3850_v6  ;;  %v4986_v37 = vpop.eup %4985 }
0x1b8d   :  { %v3867_v38 = vmul.f32 %v4986_v37, %v3851_v5 }
0x1b8e   :  { %v3874_v34 = vmul.f32 %v4194_v30, %v3866_v31 }
0x1b8f   :  { %v3875_v39 = vmul.f32 %v4194_v30, %v3867_v38 }
0x1b90   :  { %v3882_v35 = vadd.f32 %v4195_v33, %v3874_v34 }
0x1b91   :  { %v3883_v41 = vadd.f32 %v4195_v33, %v3875_v39 }
0x1b92   :  { %4679 = vmatmul.mubr.msk.f32.vlgmr.msra.gmra.mrb[40].mxu1 %vm64_vm0, %v3882_v35 }
0x1b93   :  { %4874 = vmatpush3.bf16.msra.mxu1 %v4861_v12  ;;  %4697 = vmatprep.mubr.msk.f32.mxu1 %vm5012_vm1, %v5011_v20  ;;  %v3975_v20 = vld [vmem:[%s5933_s17] sm:$0x1] }
0x1b94   :  { %4875 = vmatprep.subr.bf16.mxu1 %v5020_v13 }
0x1b97   :  { %4877 = vmatpush3.bf16.msra.mxu1 %v4864_v53 }
0x1b98   :  { %4878 = vmatprep.subr.bf16.mxu1 %v5020_v13 }
0x1b9b   :  { %4880 = vmatpush3.bf16.msra.mxu1 %v4867_v16 }
0x1b9c   :  { %4881 = vmatprep.subr.bf16.mxu1 %v5020_v13 }
0x1b9f   :  { %4883 = vmatpush3.bf16.msra.mxu1 %v4870_v21 }
0x1ba2   :  { %4698 = vmatmul.mubr.msk.f32.vlgmr.msra.gmra.mrb[42].mxu1 %vm64_vm0, %v3883_v41 }
0x1c65   :  { %v3962_v54 = vpop.f32.mrb[40].mxu1 }
0x1c66   :  { %v3963_v32 = vadd.f32 %v3962_v54, %v3892_v42  ;;  %v4680_v29 = vpop.f32.mrb[41].mxu1 }
0x1c68   :  { %3966 = vst [vmem:[#allocation3] sm:$0x1] %v3963_v32 }
0x1c75   :  { %v4045_v45 = vpop.f32.mrb[42].mxu1 }
0x1c76   :  { %v4046_v43 = vadd.f32 %v4045_v45, %v3975_v20  ;;  %v4699_v46 = vpop.f32.mrb[43].mxu1 }
0x1c78   :  { %4049 = vst [vmem:[#allocation3 + $0x1] sm:$0x1] %v4046_v43 }
0x1c79   :  { %4998 = shalt.err (!%p4995_p4)
}
0x1c7a   :  { %s4999_s13 = scalar_lea.hbm %s5934_s18, 32 }
0x1c7b   :  { %p5000_p5 = scmp.ne.s32.totalorder %s5934_s18, %s4999_s13  ;;  %p5003_p6 = scmp.lt.u32.totalorder %s4999_s13, %s5934_s18 }
0x1c7d   :  { %p5005_p7 = pnand %p5003_p6, %p5000_p5 }
0x1c7f   :  { %5008 = shalt.err (!%p5005_p7)
}
0x1c80   :  { %4059 = dma.vmem_to_hbm [thread:$0]  %s4057_s24, 32, %s5934_s18, [#allocation4]  }
0x1c81   :  { %5009 = dma.done.wait [#allocation4], 32  }
0x1c82   :  { %5010 = vsyncadd [#allocation4], 4294967264 }
0x1c83   :  { %4063 = vsyncpa [#allocation4], 1 }

</bundles_post_ra>
